<compile_context>
chip_gen: v5e
topology: v5e:2x2
jax: 0.10.0
libtpu: 0.0.40
codegen_flags: <defaults>
</compile_context>

<pallas_src>
import jax
import jax.numpy as jnp
from jax.experimental import pallas as pl
from jax.experimental.pallas import tpu as pltpu

VOCAB = 21128
EMB = 300
HID = 300
FC1 = 192
NUM_CLASSES = 10


# --------------------------------------------------------------------------
# 1) Hoisted input projection: gates_x[d] = x_flat @ W_ih[d] + (b_ih+b_hh)[d]
#    One large M = T*B matmul per direction (grid over direction only).
# --------------------------------------------------------------------------
def _proj_kernel(x_ref, w_ref, b_ref, out_ref):
    # x: (T*B, EMB); w: (1, EMB, 4*HID); b: (1, 1, 4*HID); out: (1, T*B, 4*HID)
    out_ref[0] = (jnp.dot(x_ref[...], w_ref[0],
                          preferred_element_type=jnp.float32) + b_ref[0])


def input_projection(x_flat, w_ih_pair, bias_pair):
    """x_flat: (T*B, EMB); w_ih_pair: (2, EMB, 4*HID); bias_pair: (2, 1, 4*HID).
    Returns (2, T*B, 4*HID)."""
    TB = x_flat.shape[0]
    # TODO(synk): tile the T*B row dimension for very long sequences.
    return pl.pallas_call(
        _proj_kernel,
        out_shape=jax.ShapeDtypeStruct((2, TB, 4 * HID), jnp.float32),
        grid_spec=pltpu.PrefetchScalarGridSpec(
            num_scalar_prefetch=0,
            grid=(2,),
            in_specs=[
                pl.BlockSpec((TB, EMB), lambda d: (0, 0)),
                pl.BlockSpec((1, EMB, 4 * HID), lambda d: (d, 0, 0)),
                pl.BlockSpec((1, 1, 4 * HID), lambda d: (d, 0, 0)),
            ],
            out_specs=pl.BlockSpec((1, TB, 4 * HID), lambda d: (d, 0, 0)),
        ),
        compiler_params=pltpu.CompilerParams(
            dimension_semantics=("parallel",)),
    )(x_flat, w_ih_pair, bias_pair)


# --------------------------------------------------------------------------
# 2) Bidirectional recurrence.  Grid = (direction, time).
#    Per step: one fused (B, HID) @ (HID, 4*HID) dot + elementwise updates.
#    PyTorch gate order along the 4*HID axis: i, f, g, o.
# --------------------------------------------------------------------------
def _bilstm_kernel(gx_ref, whh_ref, out_ref, h_sc, c_sc):
    t = pl.program_id(1)

    @pl.when(t == 0)
    def _init():
        h_sc[...] = jnp.zeros_like(h_sc)
        c_sc[...] = jnp.zeros_like(c_sc)

    # gates_x already contains x @ W_ih + b_ih + b_hh (hoisted).
    gates = gx_ref[0, 0] + jnp.dot(h_sc[...], whh_ref[0],
                                   preferred_element_type=jnp.float32)  # (B, 4*HID)

    i_g = jax.nn.sigmoid(gates[:, 0 * HID:1 * HID])
    f_g = jax.nn.sigmoid(gates[:, 1 * HID:2 * HID])
    g_g = jnp.tanh(gates[:, 2 * HID:3 * HID])
    o_g = jax.nn.sigmoid(gates[:, 3 * HID:4 * HID])

    c_new = f_g * c_sc[...] + i_g * g_g
    h_new = o_g * jnp.tanh(c_new)
    c_sc[...] = c_new
    h_sc[...] = h_new
    out_ref[0, 0] = h_new


def bilstm_recurrence(gates_x, w_hh_pair):
    """gates_x: (2, T, B, 4*HID); w_hh_pair: (2, HID, 4*HID).
    Returns hidden states (2, T, B, HID) with time axis in sequence order."""
    _, T, B, _ = gates_x.shape

    def seq_map(d, t):
        # d == 0 (forward): time t;  d == 1 (backward): time T-1-t.
        return (d, t + d * (T - 1 - 2 * t), 0, 0)

    return pl.pallas_call(
        _bilstm_kernel,
        out_shape=jax.ShapeDtypeStruct((2, T, B, HID), jnp.float32),
        grid_spec=pltpu.PrefetchScalarGridSpec(
            num_scalar_prefetch=0,
            grid=(2, T),
            in_specs=[
                pl.BlockSpec((1, 1, B, 4 * HID), seq_map),
                # Constant per direction; stays resident within a direction.
                pl.BlockSpec((1, HID, 4 * HID), lambda d, t: (d, 0, 0)),
            ],
            out_specs=pl.BlockSpec((1, 1, B, HID), seq_map),
            scratch_shapes=[pltpu.VMEM((B, HID), jnp.float32),
                            pltpu.VMEM((B, HID), jnp.float32)],
        ),
        compiler_params=pltpu.CompilerParams(
            dimension_semantics=("parallel", "arbitrary")),
    )(gates_x, w_hh_pair)


# --------------------------------------------------------------------------
# 3) Head: fc1 -> relu -> fc2 over all T*B rows in one matmul pair, then
#    max over the time axis, all in a single (grid-less) kernel invocation.
#    No fwd/bwd concat: [fwd|bwd] @ W1 == fwd @ W1[:HID] + bwd @ W1[HID:].
# --------------------------------------------------------------------------
def _make_head_kernel(T, B):
    def _head_kernel(hs_ref, w1_ref, b1_ref, w2_ref, b2_ref, out_ref):
        fwd = hs_ref[0]                                   # (T*B, HID)
        bwd = hs_ref[1]                                   # (T*B, HID)
        h = (jnp.dot(fwd, w1_ref[0], preferred_element_type=jnp.float32)
             + jnp.dot(bwd, w1_ref[1], preferred_element_type=jnp.float32)
             + b1_ref[...])
        h = jnp.maximum(h, 0.0)
        logits = jnp.dot(h, w2_ref[...],
                         preferred_element_type=jnp.float32)  # (T*B, C)
        # Rows are time-major (row = t*B + b): running max over timesteps.
        # fc2 bias added after the max (max(x) + b == max(x + b)).
        # TODO(synk): for very long sequences, chunk T on a grid with a
        # running-max scratch instead of unrolling.
        mx = logits[0:B, :]
        for t in range(1, T):
            mx = jnp.maximum(mx, logits[t * B:(t + 1) * B, :])
        out_ref[...] = mx + b2_ref[...]
    return _head_kernel


def head(hs_flat, w1_pair, b1, w2, b2, *, T, B):
    """hs_flat: (2, T*B, HID); w1_pair: (2, HID, FC1); b1: (1, FC1);
    w2: (FC1, C); b2: (1, C).  Returns (B, C)."""
    C = w2.shape[1]
    return pl.pallas_call(
        _make_head_kernel(T, B),
        out_shape=jax.ShapeDtypeStruct((B, C), jnp.float32),
    )(hs_flat, w1_pair, b1, w2, b2)


# --------------------------------------------------------------------------
# Parameter init (deterministic, PyTorch-like shapes) and forward pass.
# --------------------------------------------------------------------------
def init_params(key, num_classes=NUM_CLASSES):
    ks = jax.random.split(key, 14)

    def u(k, shape, scale):
        return jax.random.uniform(k, shape, jnp.float32, -scale, scale)

    s_lstm = 1.0 / (HID ** 0.5)
    s_fc1 = 1.0 / ((2 * HID) ** 0.5)
    s_fc2 = 1.0 / (FC1 ** 0.5)
    return {
        "embedding": jax.random.normal(ks[0], (VOCAB, EMB), jnp.float32),
        # forward direction
        "w_ih_f": u(ks[1], (4 * HID, EMB), s_lstm),
        "w_hh_f": u(ks[2], (4 * HID, HID), s_lstm),
        "b_ih_f": u(ks[3], (4 * HID,), s_lstm),
        "b_hh_f": u(ks[4], (4 * HID,), s_lstm),
        # backward direction
        "w_ih_b": u(ks[5], (4 * HID, EMB), s_lstm),
        "w_hh_b": u(ks[6], (4 * HID, HID), s_lstm),
        "b_ih_b": u(ks[7], (4 * HID,), s_lstm),
        "b_hh_b": u(ks[8], (4 * HID,), s_lstm),
        # fc layers (PyTorch Linear weight shape: (out, in))
        "w_fc1": u(ks[9], (FC1, 2 * HID), s_fc1),
        "b_fc1": u(ks[10], (FC1,), s_fc1),
        "w_fc2": u(ks[11], (num_classes, FC1), s_fc2),
        "b_fc2": u(ks[12], (num_classes,), s_fc2),
    }


def bilstm_forward(params, tokens):
    B, T = tokens.shape

    # Embedding gather directly into time-major (T, B, EMB) layout.
    # TODO(synk): embedding gather could be a scalar-prefetch DMA-gather kernel.
    x_tb = params["embedding"][tokens.T]                  # (T, B, EMB)
    x_flat = x_tb.reshape(T * B, EMB)                     # free (row-major)

    # Fused / pre-transposed weights (constant prep, XLA glue).
    w_ih_pair = jnp.stack([params["w_ih_f"].T, params["w_ih_b"].T])   # (2, EMB, 4H)
    w_hh_pair = jnp.stack([params["w_hh_f"].T, params["w_hh_b"].T])   # (2, HID, 4H)
    bias_pair = jnp.stack([params["b_ih_f"] + params["b_hh_f"],
                           params["b_ih_b"] + params["b_hh_b"]]
                          ).reshape(2, 1, 4 * HID)

    # 1) hoisted input projection (one large matmul per direction).
    gates_x = input_projection(x_flat, w_ih_pair, bias_pair)          # (2, T*B, 4H)
    gates_x = gates_x.reshape(2, T, B, 4 * HID)                       # free

    # 2) recurrent part: both directions in a single kernel.
    hs = bilstm_recurrence(gates_x, w_hh_pair)                        # (2, T, B, HID)
    hs_flat = hs.reshape(2, T * B, HID)                               # free

    # 3) head (no concat; fc1/fc2 as big matmuls; in-kernel max over T).
    w1_t = params["w_fc1"].T                                          # (2*HID, FC1)
    w1_pair = jnp.stack([w1_t[:HID], w1_t[HID:]])                     # (2, HID, FC1)
    out = head(hs_flat, w1_pair,
               params["b_fc1"].reshape(1, FC1),
               params["w_fc2"].T,
               params["b_fc2"].reshape(1, -1),
               T=T, B=B)
    return out                                                        # (B, C)


# --------------------------------------------------------------------------
# Pure-JAX reference (mirrors the PyTorch forward) for a correctness check.
# --------------------------------------------------------------------------
def reference_forward(params, tokens):
    emb = params["embedding"][tokens]                 # (B, T, EMB)
    B = emb.shape[0]
    x_tbh = jnp.transpose(emb, (1, 0, 2))             # (T, B, EMB)

    def run_dir(w_ih, w_hh, b_ih, b_hh, reverse):
        def step(carry, x_t):
            h, c = carry
            gates = x_t @ w_ih.T + b_ih + h @ w_hh.T + b_hh
            i, f, g, o = jnp.split(gates, 4, axis=-1)
            i, f, o = jax.nn.sigmoid(i), jax.nn.sigmoid(f), jax.nn.sigmoid(o)
            g = jnp.tanh(g)
            c = f * c + i * g
            h = o * jnp.tanh(c)
            return (h, c), h

        xs = x_tbh[::-1] if reverse else x_tbh
        init = (jnp.zeros((B, HID), jnp.float32), jnp.zeros((B, HID), jnp.float32))
        _, hs = jax.lax.scan(step, init, xs)
        return hs[::-1] if reverse else hs            # (T, B, HID)

    fwd = run_dir(params["w_ih_f"], params["w_hh_f"],
                  params["b_ih_f"], params["b_hh_f"], False)
    bwd = run_dir(params["w_ih_b"], params["w_hh_b"],
                  params["b_ih_b"], params["b_hh_b"], True)
    y = jnp.concatenate([fwd, bwd], axis=-1)          # (T, B, 2*HID)
    h = jnp.maximum(jnp.einsum("tbh,oh->tbo", y, params["w_fc1"])
                    + params["b_fc1"], 0.0)
    logits = (jnp.einsum("tbh,oh->tbo", h, params["w_fc2"])
              + params["b_fc2"])                      # (T, B, C)
    return jnp.max(logits, axis=0)                    # (B, C)


if __name__ == "__main__":
    key = jax.random.PRNGKey(0)
    pkey, tkey = jax.random.split(key)
    params = init_params(pkey)

    B, T = 2, 8
    tokens = jax.random.randint(tkey, (B, T), 0, VOCAB, dtype=jnp.int32)

    out = jax.jit(bilstm_forward)(params, tokens)
    out = jax.block_until_ready(out)

    ref = jax.block_until_ready(reference_forward(params, tokens))
    assert out.shape == (B, NUM_CLASSES), out.shape
    assert jnp.allclose(out, ref, rtol=5e-3, atol=5e-3), (
        f"max abs err {jnp.max(jnp.abs(out - ref))}")

    print("KERNEL_OK")
</pallas_src>

<mosaic_0001>
module attributes {stable_mosaic.version = 11 : i64} {
  func.func @_proj_kernel(%arg0: i32, %arg1: memref<16x300xf32, #tpu.memory_space<vmem>>, %arg2: memref<1x300x1200xf32, #tpu.memory_space<vmem>>, %arg3: memref<1x1x1200xf32, #tpu.memory_space<vmem>>, %arg4: memref<1x16x1200xf32, #tpu.memory_space<vmem>>) attributes {dimension_semantics = [#tpu.dimension_semantics<parallel>], iteration_bounds = array<i64: 2>, scalar_prefetch = 0 : i64, scratch_operands = 0 : i64, tpu.core_type = #tpu.core_type<tc>, window_params = [{pipeline_mode = #tpu.pipeline_mode<synchronous>, transform_indices = @transform_0, window_bounds = array<i64: 16, 300>}, {transform_indices = @transform_1, window_bounds = array<i64: 1, 300, 1200>}, {transform_indices = @transform_2, window_bounds = array<i64: 1, 1, 1200>}, {transform_indices = @transform_3, window_bounds = array<i64: 1, 16, 1200>}]} {
    %c0 = arith.constant 0 : index
    %c0_0 = arith.constant 0 : index
    %0 = vector.load %arg1[%c0, %c0_0] : memref<16x300xf32, #tpu.memory_space<vmem>>, vector<16x300xf32>
    %c0_1 = arith.constant 0 : index
    %c0_2 = arith.constant 0 : index
    %c0_3 = arith.constant 0 : index
    %1 = vector.load %arg2[%c0_1, %c0_2, %c0_3] : memref<1x300x1200xf32, #tpu.memory_space<vmem>>, vector<1x300x1200xf32>
    %2 = vector.shape_cast %1 : vector<1x300x1200xf32> to vector<300x1200xf32>
    %cst = arith.constant dense<0.000000e+00> : vector<16x1200xf32>
    %3 = tpu.matmul %0, %2, %cst {dimension_numbers = #tpu.dot_dimension_numbers<[1], [0], [0], [1], [0, 0, 1, 1], [], []>} : vector<16x300xf32>, vector<300x1200xf32>, vector<16x1200xf32> -> vector<16x1200xf32>
    %c0_4 = arith.constant 0 : index
    %c0_5 = arith.constant 0 : index
    %c0_6 = arith.constant 0 : index
    %4 = vector.load %arg3[%c0_4, %c0_5, %c0_6] : memref<1x1x1200xf32, #tpu.memory_space<vmem>>, vector<1x1x1200xf32>
    %5 = vector.shape_cast %4 : vector<1x1x1200xf32> to vector<1x1200xf32>
    %6 = vector.broadcast %5 : vector<1x1200xf32> to vector<16x1200xf32>
    %7 = arith.addf %3, %6 : vector<16x1200xf32>
    %c0_7 = arith.constant 0 : index
    %c0_8 = arith.constant 0 : index
    %c0_9 = arith.constant 0 : index
    %8 = vector.load %arg4[%c0_7, %c0_8, %c0_9] : memref<1x16x1200xf32, #tpu.memory_space<vmem>>, vector<1x16x1200xf32>
    %9 = vector.shape_cast %8 : vector<1x16x1200xf32> to vector<16x1200xf32>
    %10 = vector.shape_cast %7 : vector<16x1200xf32> to vector<1x16x1200xf32>
    tpu.vector_store %arg4[%c0_7, %c0_8, %c0_9], %10 {strides = array<i32>} : memref<1x16x1200xf32, #tpu.memory_space<vmem>>, vector<1x16x1200xf32>,
    return
  }
  func.func @transform_0(%arg0: i32) -> (i32, i32) {
    %c0_i32 = arith.constant 0 : i32
    %c0_i32_0 = arith.constant 0 : i32
    %c0_i32_1 = arith.constant 0 : i32
    return %c0_i32, %c0_i32_0 : i32, i32
  }
  func.func @transform_1(%arg0: i32) -> (i32, i32, i32) {
    %c0_i32 = arith.constant 0 : i32
    %c0_i32_0 = arith.constant 0 : i32
    %c0_i32_1 = arith.constant 0 : i32
    return %arg0, %c0_i32, %c0_i32_0 : i32, i32, i32
  }
  func.func @transform_2(%arg0: i32) -> (i32, i32, i32) {
    %c0_i32 = arith.constant 0 : i32
    %c0_i32_0 = arith.constant 0 : i32
    %c0_i32_1 = arith.constant 0 : i32
    return %arg0, %c0_i32, %c0_i32_0 : i32, i32, i32
  }
  func.func @transform_3(%arg0: i32) -> (i32, i32, i32) {
    %c0_i32 = arith.constant 0 : i32
    %c0_i32_0 = arith.constant 0 : i32
    %c0_i32_1 = arith.constant 0 : i32
    return %arg0, %c0_i32, %c0_i32_0 : i32, i32, i32
  }
}

module attributes {stable_mosaic.version = 11 : i64} {
  func.func @_bilstm_kernel(%arg0: i32, %arg1: i32, %arg2: memref<1x1x2x1200xf32, #tpu.memory_space<vmem>>, %arg3: memref<1x300x1200xf32, #tpu.memory_space<vmem>>, %arg4: memref<1x1x2x300xf32, #tpu.memory_space<vmem>>, %arg5: memref<2x300xf32, #tpu.memory_space<vmem>>, %arg6: memref<2x300xf32, #tpu.memory_space<vmem>>) attributes {dimension_semantics = [#tpu.dimension_semantics<parallel>, #tpu.dimension_semantics<arbitrary>], iteration_bounds = array<i64: 2, 8>, scalar_prefetch = 0 : i64, scratch_operands = 2 : i64, tpu.core_type = #tpu.core_type<tc>, window_params = [{transform_indices = @transform_0, window_bounds = array<i64: 1, 1, 2, 1200>}, {transform_indices = @transform_1, window_bounds = array<i64: 1, 300, 1200>}, {transform_indices = @transform_2, window_bounds = array<i64: 1, 1, 2, 300>}]} {
    %c0_i32 = arith.constant 0 : i32
    %0 = arith.cmpi eq, %arg1, %c0_i32 : i32
    %1 = arith.extui %0 : i1 to i32
    %c0_i32_0 = arith.constant 0 : i32
    %2 = arith.cmpi ne, %1, %c0_i32_0 : i32
    scf.if %2 {
      %cst_22 = arith.constant 0.000000e+00 : f32
      %41 = vector.broadcast %cst_22 : f32 to vector<2x300xf32>
      %c0_23 = arith.constant 0 : index
      %c0_24 = arith.constant 0 : index
      %42 = vector.load %arg5[%c0_23, %c0_24] : memref<2x300xf32, #tpu.memory_space<vmem>>, vector<2x300xf32>
      tpu.vector_store %arg5[%c0_23, %c0_24], %41 {strides = array<i32>} : memref<2x300xf32, #tpu.memory_space<vmem>>, vector<2x300xf32>,
      %cst_25 = arith.constant 0.000000e+00 : f32
      %43 = vector.broadcast %cst_25 : f32 to vector<2x300xf32>
      %c0_26 = arith.constant 0 : index
      %c0_27 = arith.constant 0 : index
      %44 = vector.load %arg6[%c0_26, %c0_27] : memref<2x300xf32, #tpu.memory_space<vmem>>, vector<2x300xf32>
      tpu.vector_store %arg6[%c0_26, %c0_27], %43 {strides = array<i32>} : memref<2x300xf32, #tpu.memory_space<vmem>>, vector<2x300xf32>,
    } else {
    }
    %c0 = arith.constant 0 : index
    %c0_1 = arith.constant 0 : index
    %c0_2 = arith.constant 0 : index
    %c0_3 = arith.constant 0 : index
    %3 = vector.load %arg2[%c0, %c0_1, %c0_2, %c0_3] : memref<1x1x2x1200xf32, #tpu.memory_space<vmem>>, vector<1x1x2x1200xf32>
    %4 = vector.shape_cast %3 : vector<1x1x2x1200xf32> to vector<2x1200xf32>
    %c0_4 = arith.constant 0 : index
    %c0_5 = arith.constant 0 : index
    %5 = vector.load %arg5[%c0_4, %c0_5] : memref<2x300xf32, #tpu.memory_space<vmem>>, vector<2x300xf32>
    %c0_6 = arith.constant 0 : index
    %c0_7 = arith.constant 0 : index
    %c0_8 = arith.constant 0 : index
    %6 = vector.load %arg3[%c0_6, %c0_7, %c0_8] : memref<1x300x1200xf32, #tpu.memory_space<vmem>>, vector<1x300x1200xf32>
    %7 = vector.shape_cast %6 : vector<1x300x1200xf32> to vector<300x1200xf32>
    %cst = arith.constant dense<0.000000e+00> : vector<2x1200xf32>
    %8 = tpu.matmul %5, %7, %cst {dimension_numbers = #tpu.dot_dimension_numbers<[1], [0], [0], [1], [0, 0, 1, 1], [], []>} : vector<2x300xf32>, vector<300x1200xf32>, vector<2x1200xf32> -> vector<2x1200xf32>
    %9 = arith.addf %4, %8 : vector<2x1200xf32>
    %10 = vector.extract_strided_slice %9 {offsets = [0, 0], sizes = [2, 300], strides = [1, 1]} : vector<2x1200xf32> to vector<2x300xf32>
    %11 = arith.negf %10 : vector<2x300xf32>
    %12 = math.exp %11 : vector<2x300xf32>
    %cst_9 = arith.constant 1.000000e+00 : f32
    %13 = vector.broadcast %cst_9 : f32 to vector<2x300xf32>
    %14 = arith.addf %13, %12 : vector<2x300xf32>
    %15 = arith.divf %13, %14 : vector<2x300xf32>
    %16 = vector.extract_strided_slice %9 {offsets = [0, 300], sizes = [2, 300], strides = [1, 1]} : vector<2x1200xf32> to vector<2x300xf32>
    %17 = arith.negf %16 : vector<2x300xf32>
    %18 = math.exp %17 : vector<2x300xf32>
    %cst_10 = arith.constant 1.000000e+00 : f32
    %19 = vector.broadcast %cst_10 : f32 to vector<2x300xf32>
    %20 = arith.addf %19, %18 : vector<2x300xf32>
    %21 = arith.divf %19, %20 : vector<2x300xf32>
    %22 = vector.extract_strided_slice %9 {offsets = [0, 600], sizes = [2, 300], strides = [1, 1]} : vector<2x1200xf32> to vector<2x300xf32>
    %23 = math.tanh %22 : vector<2x300xf32>
    %24 = vector.extract_strided_slice %9 {offsets = [0, 900], sizes = [2, 300], strides = [1, 1]} : vector<2x1200xf32> to vector<2x300xf32>
    %25 = arith.negf %24 : vector<2x300xf32>
    %26 = math.exp %25 : vector<2x300xf32>
    %cst_11 = arith.constant 1.000000e+00 : f32
    %27 = vector.broadcast %cst_11 : f32 to vector<2x300xf32>
    %28 = arith.addf %27, %26 : vector<2x300xf32>
    %29 = arith.divf %27, %28 : vector<2x300xf32>
    %c0_12 = arith.constant 0 : index
    %c0_13 = arith.constant 0 : index
    %30 = vector.load %arg6[%c0_12, %c0_13] : memref<2x300xf32, #tpu.memory_space<vmem>>, vector<2x300xf32>
    %31 = arith.mulf %21, %30 : vector<2x300xf32>
    %32 = arith.mulf %15, %23 : vector<2x300xf32>
    %33 = arith.addf %31, %32 : vector<2x300xf32>
    %34 = math.tanh %33 : vector<2x300xf32>
    %35 = arith.mulf %29, %34 : vector<2x300xf32>
    %c0_14 = arith.constant 0 : index
    %c0_15 = arith.constant 0 : index
    %36 = vector.load %arg6[%c0_14, %c0_15] : memref<2x300xf32, #tpu.memory_space<vmem>>, vector<2x300xf32>
    tpu.vector_store %arg6[%c0_14, %c0_15], %33 {strides = array<i32>} : memref<2x300xf32, #tpu.memory_space<vmem>>, vector<2x300xf32>,
    %c0_16 = arith.constant 0 : index
    %c0_17 = arith.constant 0 : index
    %37 = vector.load %arg5[%c0_16, %c0_17] : memref<2x300xf32, #tpu.memory_space<vmem>>, vector<2x300xf32>
    tpu.vector_store %arg5[%c0_16, %c0_17], %35 {strides = array<i32>} : memref<2x300xf32, #tpu.memory_space<vmem>>, vector<2x300xf32>,
    %c0_18 = arith.constant 0 : index
    %c0_19 = arith.constant 0 : index
    %c0_20 = arith.constant 0 : index
    %c0_21 = arith.constant 0 : index
    %38 = vector.load %arg4[%c0_18, %c0_19, %c0_20, %c0_21] : memref<1x1x2x300xf32, #tpu.memory_space<vmem>>, vector<1x1x2x300xf32>
    %39 = vector.shape_cast %38 : vector<1x1x2x300xf32> to vector<2x300xf32>
    %40 = vector.shape_cast %35 : vector<2x300xf32> to vector<1x1x2x300xf32>
    tpu.vector_store %arg4[%c0_18, %c0_19, %c0_20, %c0_21], %40 {strides = array<i32>} : memref<1x1x2x300xf32, #tpu.memory_space<vmem>>, vector<1x1x2x300xf32>,
    return
  }
  func.func @transform_0(%arg0: i32, %arg1: i32) -> (i32, i32, i32, i32) {
    %c2_i32 = arith.constant 2 : i32
    %0 = arith.muli %c2_i32, %arg1 : i32
    %c7_i32 = arith.constant 7 : i32
    %1 = arith.subi %c7_i32, %0 : i32
    %2 = arith.muli %arg0, %1 : i32
    %3 = arith.addi %arg1, %2 : i32
    %c0_i32 = arith.constant 0 : i32
    %c0_i32_0 = arith.constant 0 : i32
    %c0_i32_1 = arith.constant 0 : i32
    return %arg0, %3, %c0_i32, %c0_i32_0 : i32, i32, i32, i32
  }
  func.func @transform_1(%arg0: i32, %arg1: i32) -> (i32, i32, i32) {
    %c0_i32 = arith.constant 0 : i32
    %c0_i32_0 = arith.constant 0 : i32
    %c0_i32_1 = arith.constant 0 : i32
    return %arg0, %c0_i32, %c0_i32_0 : i32, i32, i32
  }
  func.func @transform_2(%arg0: i32, %arg1: i32) -> (i32, i32, i32, i32) {
    %c2_i32 = arith.constant 2 : i32
    %0 = arith.muli %c2_i32, %arg1 : i32
    %c7_i32 = arith.constant 7 : i32
    %1 = arith.subi %c7_i32, %0 : i32
    %2 = arith.muli %arg0, %1 : i32
    %3 = arith.addi %arg1, %2 : i32
    %c0_i32 = arith.constant 0 : i32
    %c0_i32_0 = arith.constant 0 : i32
    %c0_i32_1 = arith.constant 0 : i32
    return %arg0, %3, %c0_i32, %c0_i32_0 : i32, i32, i32, i32
  }
}

module attributes {stable_mosaic.version = 11 : i64} {
  func.func @_head_kernel(%arg0: memref<2x16x300xf32, #tpu.memory_space<vmem>>, %arg1: memref<2x300x192xf32, #tpu.memory_space<vmem>>, %arg2: memref<1x192xf32, #tpu.memory_space<vmem>>, %arg3: memref<192x10xf32, #tpu.memory_space<vmem>>, %arg4: memref<1x10xf32, #tpu.memory_space<vmem>>, %arg5: memref<2x10xf32, #tpu.memory_space<vmem>>) attributes {dimension_semantics = [], scalar_prefetch = 0 : i64, scratch_operands = 0 : i64, tpu.core_type = #tpu.core_type<tc>} {
    %c0 = arith.constant 0 : index
    %c0_0 = arith.constant 0 : index
    %c0_1 = arith.constant 0 : index
    %0 = vector.load %arg0[%c0, %c0_0, %c0_1] : memref<2x16x300xf32, #tpu.memory_space<vmem>>, vector<1x16x300xf32>
    %1 = vector.shape_cast %0 : vector<1x16x300xf32> to vector<16x300xf32>
    %c1 = arith.constant 1 : index
    %c0_2 = arith.constant 0 : index
    %c0_3 = arith.constant 0 : index
    %2 = vector.load %arg0[%c1, %c0_2, %c0_3] : memref<2x16x300xf32, #tpu.memory_space<vmem>>, vector<1x16x300xf32>
    %3 = vector.shape_cast %2 : vector<1x16x300xf32> to vector<16x300xf32>
    %c0_4 = arith.constant 0 : index
    %c0_5 = arith.constant 0 : index
    %c0_6 = arith.constant 0 : index
    %4 = vector.load %arg1[%c0_4, %c0_5, %c0_6] : memref<2x300x192xf32, #tpu.memory_space<vmem>>, vector<1x300x192xf32>
    %5 = vector.shape_cast %4 : vector<1x300x192xf32> to vector<300x192xf32>
    %cst = arith.constant dense<0.000000e+00> : vector<16x192xf32>
    %6 = tpu.matmul %1, %5, %cst {dimension_numbers = #tpu.dot_dimension_numbers<[1], [0], [0], [1], [0, 0, 1, 1], [], []>} : vector<16x300xf32>, vector<300x192xf32>, vector<16x192xf32> -> vector<16x192xf32>
    %c1_7 = arith.constant 1 : index
    %c0_8 = arith.constant 0 : index
    %c0_9 = arith.constant 0 : index
    %7 = vector.load %arg1[%c1_7, %c0_8, %c0_9] : memref<2x300x192xf32, #tpu.memory_space<vmem>>, vector<1x300x192xf32>
    %8 = vector.shape_cast %7 : vector<1x300x192xf32> to vector<300x192xf32>
    %cst_10 = arith.constant dense<0.000000e+00> : vector<16x192xf32>
    %9 = tpu.matmul %3, %8, %cst_10 {dimension_numbers = #tpu.dot_dimension_numbers<[1], [0], [0], [1], [0, 0, 1, 1], [], []>} : vector<16x300xf32>, vector<300x192xf32>, vector<16x192xf32> -> vector<16x192xf32>
    %10 = arith.addf %6, %9 : vector<16x192xf32>
    %c0_11 = arith.constant 0 : index
    %c0_12 = arith.constant 0 : index
    %11 = vector.load %arg2[%c0_11, %c0_12] : memref<1x192xf32, #tpu.memory_space<vmem>>, vector<1x192xf32>
    %12 = vector.broadcast %11 : vector<1x192xf32> to vector<16x192xf32>
    %13 = arith.addf %10, %12 : vector<16x192xf32>
    %cst_13 = arith.constant 0.000000e+00 : f32
    %14 = vector.broadcast %cst_13 : f32 to vector<16x192xf32>
    %15 = arith.maximumf %13, %14 : vector<16x192xf32>
    %c0_14 = arith.constant 0 : index
    %c0_15 = arith.constant 0 : index
    %16 = vector.load %arg3[%c0_14, %c0_15] : memref<192x10xf32, #tpu.memory_space<vmem>>, vector<192x10xf32>
    %cst_16 = arith.constant dense<0.000000e+00> : vector<16x10xf32>
    %17 = tpu.matmul %15, %16, %cst_16 {dimension_numbers = #tpu.dot_dimension_numbers<[1], [0], [0], [1], [0, 0, 1, 1], [], []>} : vector<16x192xf32>, vector<192x10xf32>, vector<16x10xf32> -> vector<16x10xf32>
    %18 = vector.extract_strided_slice %17 {offsets = [0, 0], sizes = [2, 10], strides = [1, 1]} : vector<16x10xf32> to vector<2x10xf32>
    %19 = vector.extract_strided_slice %17 {offsets = [2, 0], sizes = [2, 10], strides = [1, 1]} : vector<16x10xf32> to vector<2x10xf32>
    %20 = arith.maximumf %18, %19 : vector<2x10xf32>
    %21 = vector.extract_strided_slice %17 {offsets = [4, 0], sizes = [2, 10], strides = [1, 1]} : vector<16x10xf32> to vector<2x10xf32>
    %22 = arith.maximumf %20, %21 : vector<2x10xf32>
    %23 = vector.extract_strided_slice %17 {offsets = [6, 0], sizes = [2, 10], strides = [1, 1]} : vector<16x10xf32> to vector<2x10xf32>
    %24 = arith.maximumf %22, %23 : vector<2x10xf32>
    %25 = vector.extract_strided_slice %17 {offsets = [8, 0], sizes = [2, 10], strides = [1, 1]} : vector<16x10xf32> to vector<2x10xf32>
    %26 = arith.maximumf %24, %25 : vector<2x10xf32>
    %27 = vector.extract_strided_slice %17 {offsets = [10, 0], sizes = [2, 10], strides = [1, 1]} : vector<16x10xf32> to vector<2x10xf32>
    %28 = arith.maximumf %26, %27 : vector<2x10xf32>
    %29 = vector.extract_strided_slice %17 {offsets = [12, 0], sizes = [2, 10], strides = [1, 1]} : vector<16x10xf32> to vector<2x10xf32>
    %30 = arith.maximumf %28, %29 : vector<2x10xf32>
    %31 = vector.extract_strided_slice %17 {offsets = [14, 0], sizes = [2, 10], strides = [1, 1]} : vector<16x10xf32> to vector<2x10xf32>
    %32 = arith.maximumf %30, %31 : vector<2x10xf32>
    %c0_17 = arith.constant 0 : index
    %c0_18 = arith.constant 0 : index
    %33 = vector.load %arg4[%c0_17, %c0_18] : memref<1x10xf32, #tpu.memory_space<vmem>>, vector<1x10xf32>
    %34 = vector.broadcast %33 : vector<1x10xf32> to vector<2x10xf32>
    %35 = arith.addf %32, %34 : vector<2x10xf32>
    %c0_19 = arith.constant 0 : index
    %c0_20 = arith.constant 0 : index
    %36 = vector.load %arg5[%c0_19, %c0_20] : memref<2x10xf32, #tpu.memory_space<vmem>>, vector<2x10xf32>
    tpu.vector_store %arg5[%c0_19, %c0_20], %35 {strides = array<i32>} : memref<2x10xf32, #tpu.memory_space<vmem>>, vector<2x10xf32>,
    return
  }
}

</mosaic_0001>

<bundles_post_ra>
// kernel: bilstm_forward.3
= control target key start
LH: loop header
LB: loop body
LE: loop exit
PB: predicated region body
PF: predicated region fallthrough
CT: control target
= control target key end

     0   :  { %s1498_s12 = smov 0   ;;  %s2095_s0 = inlined_call_operand.vmem [shape: f32[16,300], index: 0, kind: input, shape index: {}]   ;;  %s2096_s1 = inlined_call_operand.vmem [shape: f32[2,300,1200], index: 1, kind: input, shape index: {}]   ;;  %s2097_s2 = inlined_call_operand.vmem [shape: f32[2,1,1200], index: 2, kind: input, shape index: {}]   ;;  %s2098_s3 = inlined_call_operand.vmem [shape: f32[2,16,1200], index: 3, kind: output, shape index: {}]  }
   0x1 LB: > { %s1414_s13 = sadd.s32 4294967295, %s1476_s12   ;;  %p1418_p0 = scmp.ge.s32.totalorder %s1476_s12, 1  ;;  %s1476_s12 = sphi %s1498_s12, %s13_s12  }
   0x2   : > { %p146_p1 = scmp.lt.s32.totalorder %s1476_s12, 3 }
   0x4   : > { %p147_p2 = pnand %p1418_p0, %p146_p1 }
   0x5   : > { %p174_p3 = scmp.lt.s32.totalorder (!%p147_p2), %s1414_s13, 1 }
   0x6   : > { %150 = sbr.rel (%p147_p2) target bundleno = 380 (0x17c), region = 32 }
   0xb   : > { %s2100_s13 = smov (!%p174_p3, %s1414_s13), 1  ;;  %vm605_vm0 = vcmask 1043456   ;;  %vm598_vm1 = vcmask 359424   ;;  %vm1335_vm2 = vcmask 392192  }
   0xc   : > { %s1453_s14 = smul.u32 3040, %s2100_s13 }
   0xd   : > { %s1454_s30 = smul.u32 10, %s2100_s13 }
   0xe   : > { %s1512_s17 = scalar_lea.vmem %s2096_s1, %s1453_s14  ;;  %s1455_s7 = smul.u32 160, %s2100_s13 }
   0xf   : > { %v564_v0 = vld [vmem:[%s1512_s17 + $0xb90] sm:$0xf]  ;;  %v554_v2 = vld [vmem:[%s1512_s17 + $0xb40] sm:$0xff]  ;;  %v345_v4 = vld [vmem:[%s1512_s17 + $0x4b8] sm:$0xff]  ;;  %s1880_s6 = scalar_lea.vmem %s2097_s2, %s1454_s30 }
  0x10   : > { %v344_v1 = vld [vmem:[%s1512_s17 + $0x4b0] sm:$0xff]  ;;  %1421 = vmatpush.msk.msra.mxu2 %vm605_vm0, %v564_v0  ;;  %v334_v3 = vld [vmem:[%s1512_s17 + $0x460] sm:$0xff]  ;;  %705 = vmatpush.msra.mxu3 %v345_v4  ;;  %v335_v7 = vld [vmem:[%s1512_s17 + $0x468] sm:$0xff]  ;;  %s1920_s10 = scalar_lea.vmem %s2098_s3, %s1455_s7 }
  0x11   : > { %636 = vmatpush.msra.mxu0 %v344_v1  ;;  %v544_v5 = vld [vmem:[%s1512_s17 + $0xaf0] sm:$0xff]  ;;  %v534_v8 = vld [vmem:[%s1512_s17 + $0xaa0] sm:$0xff]  ;;  %v325_v11 = vld [vmem:[%s1512_s17 + $0x418] sm:$0xff] }
  0x12   : > { %v324_v6 = vld [vmem:[%s1512_s17 + $0x410] sm:$0xff]  ;;  %693 = vmatpush.msra.mxu2 %v554_v2  ;;  %706 = vmatpush.msra.mxu3 %v335_v7  ;;  %v314_v10 = vld [vmem:[%s1512_s17 + $0x3c0] sm:$0xff]  ;;  %v315_v13 = vld [vmem:[%s1512_s17 + $0x3c8] sm:$0xff] }
  0x13   : > { %637 = vmatpush.msra.mxu0 %v334_v3  ;;  %v504_v9 = vld [vmem:[%s1512_s17 + $0x9b0] sm:$0xff]  ;;  %v494_v12 = vld [vmem:[%s1512_s17 + $0x960] sm:$0xff]  ;;  %v305_v17 = vld [vmem:[%s1512_s17 + $0x378] sm:$0xff] }
  0x14   : > { %659 = vmatpush.msra.mxu1 %v504_v9  ;;  %694 = vmatpush.msra.mxu2 %v544_v5  ;;  %v524_v14 = vld [vmem:[%s1512_s17 + $0xa50] sm:$0xff]  ;;  %v474_v18 = vld [vmem:[%s1512_s17 + $0x8c0] sm:$0xff]  ;;  %v505_v21 = vld [vmem:[%s1512_s17 + $0x9b8] sm:$0xff] }
  0x15   : > { %638 = vmatpush.msra.mxu0 %v324_v6  ;;  %707 = vmatpush.msra.mxu3 %v325_v11  ;;  %v304_v15 = vld [vmem:[%s1512_s17 + $0x370] sm:$0xff]  ;;  %v514_v19 = vld [vmem:[%s1512_s17 + $0xa00] sm:$0xff]  ;;  %v295_v22 = vld [vmem:[%s1512_s17 + $0x328] sm:$0xff] }
  0x16   : > { %660 = vmatpush.msra.mxu1 %v494_v12  ;;  %v484_v16 = vld [vmem:[%s1512_s17 + $0x910] sm:$0xff]  ;;  %695 = vmatpush.msra.mxu2 %v534_v8  ;;  %v294_v20 = vld [vmem:[%s1512_s17 + $0x320] sm:$0xff]  ;;  %v495_v25 = vld [vmem:[%s1512_s17 + $0x968] sm:$0xff] }
  0x17   : > { %639 = vmatpush.msra.mxu0 %v314_v10  ;;  %708 = vmatpush.msra.mxu3 %v315_v13  ;;  %v284_v23 = vld [vmem:[%s1512_s17 + $0x2d0] sm:$0xff]  ;;  %v285_v26 = vld [vmem:[%s1512_s17 + $0x2d8] sm:$0xff]  ;;  %v274_v27 = vld [vmem:[%s1512_s17 + $0x280] sm:$0xff] }
  0x18   : > { %661 = vmatpush.msra.mxu1 %v484_v16  ;;  %696 = vmatpush.msra.mxu2 %v524_v14  ;;  %v464_v24 = vld [vmem:[%s1512_s17 + $0x870] sm:$0xff]  ;;  %v454_v28 = vld [vmem:[%s1512_s17 + $0x820] sm:$0xff]  ;;  %v485_v29 = vld [vmem:[%s1512_s17 + $0x918] sm:$0xff] }
  0x19   : > { %640 = vmatpush.msra.mxu0 %v304_v15  ;;  %709 = vmatpush.msra.mxu3 %v305_v17  ;;  %v275_v30 = vld [vmem:[%s1512_s17 + $0x288] sm:$0xff]  ;;  %v264_v31 = vld [vmem:[%s1512_s17 + $0x230] sm:$0xff]  ;;  %v265_v34 = vld [vmem:[%s1512_s17 + $0x238] sm:$0xff] }
  0x1a   : > { %662 = vmatpush.msra.mxu1 %v474_v18  ;;  %697 = vmatpush.msra.mxu2 %v514_v19  ;;  %v444_v32 = vld [vmem:[%s1512_s17 + $0x7d0] sm:$0xff]  ;;  %v475_v33 = vld [vmem:[%s1512_s17 + $0x8c8] sm:$0xff]  ;;  %v254_v35 = vld [vmem:[%s1512_s17 + $0x1e0] sm:$0xff] }
  0x1b   : > { %641 = vmatpush.msra.mxu0 %v294_v20  ;;  %710 = vmatpush.msra.mxu3 %v295_v22  ;;  %v434_v36 = vld [vmem:[%s1512_s17 + $0x780] sm:$0xff]  ;;  %v465_v37 = vld [vmem:[%s1512_s17 + $0x878] sm:$0xff]  ;;  %v255_v38 = vld [vmem:[%s1512_s17 + $0x1e8] sm:$0xff] }
  0x1c   : > { %728 = vmatpush.msrb.mxu2 %v505_v21  ;;  %663 = vmatpush.msra.mxu1 %v464_v24  ;;  %v244_v39 = vld [vmem:[%s1512_s17 + $0x190] sm:$0xff]  ;;  %v455_v41 = vld [vmem:[%s1512_s17 + $0x828] sm:$0xff]  ;;  %v245_v42 = vld [vmem:[%s1512_s17 + $0x198] sm:$0xff] }
  0x1d   : > { %642 = vmatpush.msra.mxu0 %v284_v23  ;;  %711 = vmatpush.msra.mxu3 %v285_v26  ;;  %v424_v40 = vld [vmem:[%s1512_s17 + $0x730] sm:$0xff]  ;;  %v234_v43 = vld [vmem:[%s1512_s17 + $0x140] sm:$0xff]  ;;  %v445_v45 = vld [vmem:[%s1512_s17 + $0x7d8] sm:$0xff] }
  0x1e   : > { %729 = vmatpush.msrb.mxu2 %v495_v25  ;;  %664 = vmatpush.msra.mxu1 %v454_v28  ;;  %v414_v44 = vld [vmem:[%s1512_s17 + $0x6e0] sm:$0xff]  ;;  %v235_v46 = vld [vmem:[%s1512_s17 + $0x148] sm:$0xff]  ;;  %v224_v47 = vld [vmem:[%s1512_s17 + $0xf0] sm:$0xff] }
  0x1f   : > { %643 = vmatpush.msra.mxu0 %v274_v27  ;;  %712 = vmatpush.msra.mxu3 %v275_v30  ;;  %v404_v48 = vld [vmem:[%s1512_s17 + $0x690] sm:$0xff]  ;;  %v435_v49 = vld [vmem:[%s1512_s17 + $0x788] sm:$0xff]  ;;  %v225_v50 = vld [vmem:[%s1512_s17 + $0xf8] sm:$0xff] }
  0x20   : > { %730 = vmatpush.msrb.mxu2 %v485_v29  ;;  %665 = vmatpush.msra.mxu1 %v444_v32  ;;  %v214_v51 = vld [vmem:[%s1512_s17 + $0xa0] sm:$0xff]  ;;  %v425_v53 = vld [vmem:[%s1512_s17 + $0x738] sm:$0xff]  ;;  %v215_v54 = vld [vmem:[%s1512_s17 + $0xa8] sm:$0xff] }
  0x21   : > { %644 = vmatpush.msra.mxu0 %v264_v31  ;;  %713 = vmatpush.msra.mxu3 %v265_v34  ;;  %v394_v52 = vld [vmem:[%s1512_s17 + $0x640] sm:$0xff]  ;;  %v204_v55 = vld [vmem:[%s1512_s17 + $0x50] sm:$0xff]  ;;  %v415_v57 = vld [vmem:[%s1512_s17 + $0x6e8] sm:$0xff] }
  0x22   : > { %731 = vmatpush.msrb.mxu2 %v475_v33  ;;  %666 = vmatpush.msra.mxu1 %v434_v36  ;;  %v384_v56 = vld [vmem:[%s1512_s17 + $0x5f0] sm:$0xff]  ;;  %v205_v58 = vld [vmem:[%s1512_s17 + $0x58] sm:$0xff]  ;;  %v194_v59 = vld [vmem:[%s1512_s17] sm:$0xff] }
  0x23   : > { %645 = vmatpush.msra.mxu0 %v254_v35  ;;  %714 = vmatpush.msra.mxu3 %v255_v38  ;;  %v374_v60 = vld [vmem:[%s1512_s17 + $0x5a0] sm:$0xff]  ;;  %v405_v61 = vld [vmem:[%s1512_s17 + $0x698] sm:$0xff]  ;;  %v195_v63 = vld [vmem:[%s1512_s17 + $0x8] sm:$0xff] }
  0x24   : > { %732 = vmatpush.msrb.mxu2 %v465_v37  ;;  %667 = vmatpush.msra.mxu1 %v424_v40  ;;  %v565_v62 = vld [vmem:[%s1512_s17 + $0xb98] sm:$0xf]  ;;  %v364_v0 = vld [vmem:[%s1512_s17 + $0x550] sm:$0xff]  ;;  %v395_v1 = vld [vmem:[%s1512_s17 + $0x648] sm:$0xff] }
  0x25   : > { %646 = vmatpush.msra.mxu0 %v244_v39  ;;  %715 = vmatpush.msra.mxu3 %v245_v42  ;;  %v555_v2 = vld [vmem:[%s1512_s17 + $0xb48] sm:$0xff]  ;;  %v506_v3 = vld [vmem:[%s1512_s17 + $0x9c0] sm:$0xff]  ;;  %v1587_v4 = vld [vmem:[%s2095_s0 + $0x10] sm:$0xff] }
  0x26   : > { %733 = vmatpush.msrb.mxu2 %v455_v41  ;;  %668 = vmatpush.msra.mxu1 %v414_v44  ;;  %v385_v5 = vld [vmem:[%s1512_s17 + $0x5f8] sm:$0xff]  ;;  %v496_v7 = vld [vmem:[%s1512_s17 + $0x970] sm:$0xff]  ;;  %v354_v8 = vld [vmem:[%s1512_s17 + $0x500] sm:$0xff] }
  0x27   : > { %647 = vmatpush.msra.mxu0 %v234_v43  ;;  %716 = vmatpush.msra.mxu3 %v235_v46  ;;  %v545_v6 = vld [vmem:[%s1512_s17 + $0xaf8] sm:$0xff]  ;;  %v375_v9 = vld [vmem:[%s1512_s17 + $0x5a8] sm:$0xff]  ;;  %v1600_v11 = vld [vmem:[%s2095_s0] sm:$0xff] }
  0x28   : > { %734 = vmatpush.msrb.mxu2 %v445_v45  ;;  %669 = vmatpush.msra.mxu1 %v404_v48  ;;  %v535_v10 = vld [vmem:[%s1512_s17 + $0xaa8] sm:$0xff]  ;;  %v346_v12 = vld [vmem:[%s1512_s17 + $0x4c0] sm:$0xff]  ;;  %v365_v13 = vld [vmem:[%s1512_s17 + $0x558] sm:$0xff] }
  0x29   : > { %648 = vmatpush.msra.mxu0 %v224_v47  ;;  %717 = vmatpush.msra.mxu3 %v225_v50  ;;  %v486_v14 = vld [vmem:[%s1512_s17 + $0x920] sm:$0xff]  ;;  %v525_v15 = vld [vmem:[%s1512_s17 + $0xa58] sm:$0xff]  ;;  %v1609_v16 = vld [vmem:[%s2095_s0 + $0x8] sm:$0xff] }
  0x2a   : > { %735 = vmatpush.msrb.mxu2 %v435_v49  ;;  %670 = vmatpush.msra.mxu1 %v394_v52  ;;  %v355_v17 = vld [vmem:[%s1512_s17 + $0x508] sm:$0xff]  ;;  %v336_v18 = vld [vmem:[%s1512_s17 + $0x470] sm:$0xff]  ;;  %v566_v21 = vld [vmem:[%s1512_s17 + $0xba0] sm:$0xf] }
  0x2b   : > { %649 = vmatpush.msra.mxu0 %v214_v51  ;;  %718 = vmatpush.msra.mxu3 %v215_v54  ;;  %v476_v19 = vld [vmem:[%s1512_s17 + $0x8d0] sm:$0xff]  ;;  %v515_v20 = vld [vmem:[%s1512_s17 + $0xa08] sm:$0xff]  ;;  %v326_v22 = vld [vmem:[%s1512_s17 + $0x420] sm:$0xff] }
  0x2c   : > { %736 = vmatpush.msrb.mxu2 %v425_v53  ;;  %671 = vmatpush.msra.mxu1 %v384_v56  ;;  %v466_v23 = vld [vmem:[%s1512_s17 + $0x880] sm:$0xff]  ;;  %v347_v24 = vld [vmem:[%s1512_s17 + $0x4c8] sm:$0xff]  ;;  %v316_v26 = vld [vmem:[%s1512_s17 + $0x3d0] sm:$0xff] }
  0x2d   : > { %650 = vmatpush.msra.mxu0 %v204_v55  ;;  %719 = vmatpush.msra.mxu3 %v205_v58  ;;  %v1624_v25 = vld [vmem:[%s2095_s0 + $0x28] sm:$0xff]  ;;  %v556_v27 = vld [vmem:[%s1512_s17 + $0xb50] sm:$0xff]  ;;  %v337_v29 = vld [vmem:[%s1512_s17 + $0x478] sm:$0xff] }
  0x2e   : > { %737 = vmatpush.msrb.mxu2 %v415_v57  ;;  %672 = vmatpush.msra.mxu1 %v374_v60  ;;  %v456_v28 = vld [vmem:[%s1512_s17 + $0x830] sm:$0xff]  ;;  %v306_v30 = vld [vmem:[%s1512_s17 + $0x380] sm:$0xff]  ;;  %v1638_v32 = vld [vmem:[%s2095_s0 + $0x18] sm:$0xff] }
  0x2f   : > { %651 = vmatpush.msra.mxu0 %v194_v59  ;;  %720 = vmatpush.msra.mxu3 %v195_v63  ;;  %v546_v31 = vld [vmem:[%s1512_s17 + $0xb00] sm:$0xff]  ;;  %v327_v34 = vld [vmem:[%s1512_s17 + $0x428] sm:$0xff]  ;;  %v536_v35 = vld [vmem:[%s1512_s17 + $0xab0] sm:$0xff] }
  0x30   : > { %738 = vmatpush.msrb.mxu2 %v405_v61  ;;  %673 = vmatpush.msra.mxu1 %v364_v0  ;;  %v446_v33 = vld [vmem:[%s1512_s17 + $0x7e0] sm:$0xff]  ;;  %v296_v37 = vld [vmem:[%s1512_s17 + $0x330] sm:$0xff]  ;;  %v317_v39 = vld [vmem:[%s1512_s17 + $0x3d8] sm:$0xff] }
  0x31   : > { %1424 = vmatpush.msk.msrb.mxu0 %vm605_vm0, %v565_v62  ;;  %797 = vmatpush.msrb.mxu3 %v506_v3  ;;  %v1646_v36 = vld [vmem:[%s2095_s0 + $0x20] sm:$0xff]  ;;  %v436_v38 = vld [vmem:[%s1512_s17 + $0x790] sm:$0xff]  ;;  %v307_v43 = vld [vmem:[%s1512_s17 + $0x388] sm:$0xff] }
  0x32   : > { %739 = vmatpush.msrb.mxu2 %v395_v1  ;;  %674 = vmatpush.msra.mxu1 %v354_v8  ;;  %v526_v40 = vld [vmem:[%s1512_s17 + $0xa60] sm:$0xff]  ;;  %v276_v44 = vld [vmem:[%s1512_s17 + $0x290] sm:$0xff]  ;;  %v297_v47 = vld [vmem:[%s1512_s17 + $0x338] sm:$0xff] }
  0x33   : > { %762 = vmatpush.msrb.mxu0 %v555_v2  ;;  %1422 = vmatmul.msk.f32.vlgmr.msra.gmra.mxu2 %vm598_vm1, %v1587_v4  ;;  %v286_v41 = vld [vmem:[%s1512_s17 + $0x2e0] sm:$0xff]  ;;  %v516_v45 = vld [vmem:[%s1512_s17 + $0xa10] sm:$0xff]  ;;  %v507_v48 = vld [vmem:[%s1512_s17 + $0x9c8] sm:$0xff] }
  0x34   : > { %740 = vmatpush.msrb.mxu2 %v385_v5  ;;  %798 = vmatpush.msrb.mxu3 %v496_v7  ;;  %v426_v42 = vld [vmem:[%s1512_s17 + $0x740] sm:$0xff]  ;;  %v416_v46 = vld [vmem:[%s1512_s17 + $0x6f0] sm:$0xff]  ;;  %v287_v51 = vld [vmem:[%s1512_s17 + $0x2e8] sm:$0xff] }
  0x35   : > { %763 = vmatpush.msrb.mxu0 %v545_v6  ;;  %774 = vmatpush.msrb.mxu1 %v346_v12  ;;  %v266_v49 = vld [vmem:[%s1512_s17 + $0x240] sm:$0xff]  ;;  %v497_v52 = vld [vmem:[%s1512_s17 + $0x978] sm:$0xff]  ;;  %v256_v53 = vld [vmem:[%s1512_s17 + $0x1f0] sm:$0xff] }
  0x36   : > { %741 = vmatpush.msrb.mxu2 %v375_v9  ;;  %652 = vmatmul.f32.vlgmr.msra.gmra.mxu0 %v1600_v11  ;;  %v406_v50 = vld [vmem:[%s1512_s17 + $0x6a0] sm:$0xff]  ;;  %v396_v54 = vld [vmem:[%s1512_s17 + $0x650] sm:$0xff]  ;;  %v277_v55 = vld [vmem:[%s1512_s17 + $0x298] sm:$0xff] }
  0x37   : > { %764 = vmatpush.msrb.mxu0 %v535_v10  ;;  %799 = vmatpush.msrb.mxu3 %v486_v14  ;;  %v487_v56 = vld [vmem:[%s1512_s17 + $0x928] sm:$0xff]  ;;  %v246_v57 = vld [vmem:[%s1512_s17 + $0x1a0] sm:$0xff]  ;;  %v477_v60 = vld [vmem:[%s1512_s17 + $0x8d8] sm:$0xff] }
  0x38   : > { %742 = vmatpush.msrb.mxu2 %v365_v13  ;;  %675 = vmatmul.f32.vlgmr.msra.gmra.mxu1 %v1609_v16  ;;  %v386_v58 = vld [vmem:[%s1512_s17 + $0x600] sm:$0xff]  ;;  %v267_v59 = vld [vmem:[%s1512_s17 + $0x248] sm:$0xff]  ;;  %v236_v61 = vld [vmem:[%s1512_s17 + $0x150] sm:$0xff] }
  0x39   : > { %765 = vmatpush.msrb.mxu0 %v525_v15  ;;  %775 = vmatpush.msrb.mxu1 %v336_v18  ;;  %v376_v62 = vld [vmem:[%s1512_s17 + $0x5b0] sm:$0xff]  ;;  %v257_v63 = vld [vmem:[%s1512_s17 + $0x1f8] sm:$0xff]  ;;  %v467_v0 = vld [vmem:[%s1512_s17 + $0x888] sm:$0xff] }
  0x3a   : > { %743 = vmatpush.msrb.mxu2 %v355_v17  ;;  %800 = vmatpush.msrb.mxu3 %v476_v19  ;;  %v226_v1 = vld [vmem:[%s1512_s17 + $0x100] sm:$0xff]  ;;  %v247_v3 = vld [vmem:[%s1512_s17 + $0x1a8] sm:$0xff]  ;;  %v457_v5 = vld [vmem:[%s1512_s17 + $0x838] sm:$0xff] }
  0x3b   : > { %766 = vmatpush.msrb.mxu0 %v515_v20  ;;  %776 = vmatpush.msrb.mxu1 %v326_v22  ;;  %v366_v2 = vld [vmem:[%s1512_s17 + $0x560] sm:$0xff]  ;;  %v216_v6 = vld [vmem:[%s1512_s17 + $0xb0] sm:$0xff]  ;;  %v237_v8 = vld [vmem:[%s1512_s17 + $0x158] sm:$0xff] }
  0x3c   : > { %1427 = vmatpush.msk.msra.mxu2 %vm605_vm0, %v566_v21  ;;  %801 = vmatpush.msrb.mxu3 %v466_v23  ;;  %v356_v7 = vld [vmem:[%s1512_s17 + $0x510] sm:$0xff]  ;;  %v447_v9 = vld [vmem:[%s1512_s17 + $0x7e8] sm:$0xff]  ;;  %v206_v12 = vld [vmem:[%s1512_s17 + $0x60] sm:$0xff] }
  0x3d   : > { %843 = vmatpush.msra.mxu0 %v347_v24  ;;  %1423 = vmatmul.msk.f32.gmra.mxu2 %vm598_vm1, %v1624_v25  ;;  %v348_v10 = vld [vmem:[%s1512_s17 + $0x4d0] sm:$0xff]  ;;  %v227_v13 = vld [vmem:[%s1512_s17 + $0x108] sm:$0xff]  ;;  %v437_v14 = vld [vmem:[%s1512_s17 + $0x798] sm:$0xff] }
  0x3e   : > { %777 = vmatpush.msrb.mxu1 %v316_v26  ;;  %831 = vmatpush.msra.mxu2 %v556_v27  ;;  %v338_v15 = vld [vmem:[%s1512_s17 + $0x480] sm:$0xff]  ;;  %v196_v17 = vld [vmem:[%s1512_s17 + $0x10] sm:$0xff]  ;;  %v217_v18 = vld [vmem:[%s1512_s17 + $0xb8] sm:$0xff] }
  0x3f   : > { %802 = vmatpush.msrb.mxu3 %v456_v28  ;;  %844 = vmatpush.msra.mxu0 %v337_v29  ;;  %v427_v19 = vld [vmem:[%s1512_s17 + $0x748] sm:$0xff]  ;;  %v328_v21 = vld [vmem:[%s1512_s17 + $0x430] sm:$0xff]  ;;  %v417_v23 = vld [vmem:[%s1512_s17 + $0x6f8] sm:$0xff] }
  0x40   : > { %778 = vmatpush.msrb.mxu1 %v306_v30  ;;  %832 = vmatpush.msra.mxu2 %v546_v31  ;;  %v567_v20 = vld [vmem:[%s1512_s17 + $0xba8] sm:$0xf]  ;;  %v557_v24 = vld [vmem:[%s1512_s17 + $0xb58] sm:$0xff]  ;;  %v318_v26 = vld [vmem:[%s1512_s17 + $0x3e0] sm:$0xff] }
  0x41   : > { %655 = vmatmul.f32.gmra.mxu0 %v1638_v32  ;;  %803 = vmatpush.msrb.mxu3 %v446_v33  ;;  %v207_v22 = vld [vmem:[%s1512_s17 + $0x68] sm:$0xff]  ;;  %v197_v27 = vld [vmem:[%s1512_s17 + $0x18] sm:$0xff]  ;;  %v308_v30 = vld [vmem:[%s1512_s17 + $0x390] sm:$0xff] }
  0x42   : > { %845 = vmatpush.msra.mxu0 %v327_v34  ;;  %833 = vmatpush.msra.mxu2 %v536_v35  ;;  %v407_v28 = vld [vmem:[%s1512_s17 + $0x6a8] sm:$0xff]  ;;  %v508_v31 = vld [vmem:[%s1512_s17 + $0x9d0] sm:$0xff]  ;;  %v397_v33 = vld [vmem:[%s1512_s17 + $0x658] sm:$0xff] }
  0x43   : > { %678 = vmatmul.f32.gmra.mxu1 %v1646_v36  ;;  %804 = vmatpush.msrb.mxu3 %v436_v38  ;;  %v547_v29 = vld [vmem:[%s1512_s17 + $0xb08] sm:$0xff]  ;;  %v537_v34 = vld [vmem:[%s1512_s17 + $0xab8] sm:$0xff]  ;;  %v298_v35 = vld [vmem:[%s1512_s17 + $0x340] sm:$0xff] }
  0x44   : > { %779 = vmatpush.msrb.mxu1 %v296_v37  ;;  %846 = vmatpush.msra.mxu0 %v317_v39  ;;  %v498_v37 = vld [vmem:[%s1512_s17 + $0x980] sm:$0xff]  ;;  %v387_v38 = vld [vmem:[%s1512_s17 + $0x608] sm:$0xff] }
  0x45   : > { %834 = vmatpush.msra.mxu2 %v526_v40  ;;  %721 = vmatmul.f32.vlgmr.msra.gmra.mxu3 %v1600_v11  ;;  %v527_v39 = vld [vmem:[%s1512_s17 + $0xa68] sm:$0xff]  ;;  %v288_v40 = vld [vmem:[%s1512_s17 + $0x2f0] sm:$0xff] }
  0x46   : > { %780 = vmatpush.msrb.mxu1 %v286_v41  ;;  %805 = vmatpush.msrb.mxu3 %v426_v42  ;;  %v488_v41 = vld [vmem:[%s1512_s17 + $0x930] sm:$0xff]  ;;  %v377_v42 = vld [vmem:[%s1512_s17 + $0x5b8] sm:$0xff] }
  0x47   : > { %847 = vmatpush.msra.mxu0 %v307_v43  ;;  %744 = vmatmul.f32.vlgmr.msrb.gmra.mxu2 %v1609_v16  ;;  %v517_v43 = vld [vmem:[%s1512_s17 + $0xa18] sm:$0xff] }
  0x48   : > { %781 = vmatpush.msrb.mxu1 %v276_v44  ;;  %835 = vmatpush.msra.mxu2 %v516_v45  ;;  %v278_v44 = vld [vmem:[%s1512_s17 + $0x2a0] sm:$0xff] }
  0x49   : > { %806 = vmatpush.msrb.mxu3 %v416_v46  ;;  %848 = vmatpush.msra.mxu0 %v297_v47  ;;  %v478_v45 = vld [vmem:[%s1512_s17 + $0x8e0] sm:$0xff]  ;;  %v367_v46 = vld [vmem:[%s1512_s17 + $0x568] sm:$0xff]  ;;  %v568_v47 = vld [vmem:[%s1512_s17 + $0xbb0] sm:$0xf] }
  0x4a   : > { %866 = vmatpush.msrb.mxu2 %v507_v48  ;;  %782 = vmatpush.msrb.mxu1 %v266_v49  ;;  %v268_v48 = vld [vmem:[%s1512_s17 + $0x250] sm:$0xff] }
  0x4b   : > { %807 = vmatpush.msrb.mxu3 %v406_v50  ;;  %849 = vmatpush.msra.mxu0 %v287_v51  ;;  %v468_v49 = vld [vmem:[%s1512_s17 + $0x890] sm:$0xff]  ;;  %v357_v50 = vld [vmem:[%s1512_s17 + $0x518] sm:$0xff]  ;;  %v558_v51 = vld [vmem:[%s1512_s17 + $0xb60] sm:$0xff] }
  0x4c   : > { %867 = vmatpush.msrb.mxu2 %v497_v52  ;;  %783 = vmatpush.msrb.mxu1 %v256_v53  ;;  %v258_v52 = vld [vmem:[%s1512_s17 + $0x200] sm:$0xff] }
  0x4d   : > { %808 = vmatpush.msrb.mxu3 %v396_v54  ;;  %850 = vmatpush.msra.mxu0 %v277_v55  ;;  %v458_v53 = vld [vmem:[%s1512_s17 + $0x840] sm:$0xff]  ;;  %v349_v54 = vld [vmem:[%s1512_s17 + $0x4d8] sm:$0xff]  ;;  %v548_v55 = vld [vmem:[%s1512_s17 + $0xb10] sm:$0xff] }
  0x4e   : > { %868 = vmatpush.msrb.mxu2 %v487_v56  ;;  %784 = vmatpush.msrb.mxu1 %v246_v57  ;;  %v248_v56 = vld [vmem:[%s1512_s17 + $0x1b0] sm:$0xff] }
  0x4f   : > { %809 = vmatpush.msrb.mxu3 %v386_v58  ;;  %851 = vmatpush.msra.mxu0 %v267_v59  ;;  %v448_v57 = vld [vmem:[%s1512_s17 + $0x7f0] sm:$0xff]  ;;  %v339_v58 = vld [vmem:[%s1512_s17 + $0x488] sm:$0xff]  ;;  %v538_v59 = vld [vmem:[%s1512_s17 + $0xac0] sm:$0xff] }
  0x50   : > { %869 = vmatpush.msrb.mxu2 %v477_v60  ;;  %1425 = vmatmul.msk.f32.vlgmr.msrb.gmra.mxu0 %vm598_vm1, %v1587_v4  ;;  %v238_v60 = vld [vmem:[%s1512_s17 + $0x160] sm:$0xff] }
  0x51   : > { %747 = vmatmul.f32.gmra.mxu2 %v1646_v36  ;;  %785 = vmatpush.msrb.mxu1 %v236_v61  ;;  %v438_v61 = vld [vmem:[%s1512_s17 + $0x7a0] sm:$0xff] }
  0x52   : > { %810 = vmatpush.msrb.mxu3 %v376_v62  ;;  %852 = vmatpush.msra.mxu0 %v257_v63  ;;  %v329_v62 = vld [vmem:[%s1512_s17 + $0x438] sm:$0xff]  ;;  %v528_v63 = vld [vmem:[%s1512_s17 + $0xa70] sm:$0xff] }
  0x53   : > { %870 = vmatpush.msrb.mxu2 %v467_v0  ;;  %786 = vmatpush.msrb.mxu1 %v226_v1  ;;  %v228_v0 = vld [vmem:[%s1512_s17 + $0x110] sm:$0xff] }
  0x54   : > { %811 = vmatpush.msrb.mxu3 %v366_v2  ;;  %853 = vmatpush.msra.mxu0 %v247_v3  ;;  %v428_v1 = vld [vmem:[%s1512_s17 + $0x750] sm:$0xff]  ;;  %v319_v2 = vld [vmem:[%s1512_s17 + $0x3e8] sm:$0xff]  ;;  %v518_v3 = vld [vmem:[%s1512_s17 + $0xa20] sm:$0xff] }
  0x55   : > { %871 = vmatpush.msrb.mxu2 %v457_v5  ;;  %724 = vmatmul.f32.gmra.mxu3 %v1638_v32  ;;  %v218_v5 = vld [vmem:[%s1512_s17 + $0xc0] sm:$0xff] }
  0x56   : > { %787 = vmatpush.msrb.mxu1 %v216_v6  ;;  %812 = vmatpush.msrb.mxu3 %v356_v7  ;;  %v418_v6 = vld [vmem:[%s1512_s17 + $0x700] sm:$0xff]  ;;  %v309_v7 = vld [vmem:[%s1512_s17 + $0x398] sm:$0xff] }
  0x57   : > { %854 = vmatpush.msra.mxu0 %v237_v8  ;;  %872 = vmatpush.msrb.mxu2 %v447_v9  ;;  %v509_v8 = vld [vmem:[%s1512_s17 + $0x9d8] sm:$0xff]  ;;  %v208_v9 = vld [vmem:[%s1512_s17 + $0x70] sm:$0xff] }
  0x58   : > { %912 = vmatpush.msra.mxu3 %v348_v10  ;;  %788 = vmatpush.msrb.mxu1 %v206_v12  ;;  %v408_v10 = vld [vmem:[%s1512_s17 + $0x6b0] sm:$0xff]  ;;  %v299_v12 = vld [vmem:[%s1512_s17 + $0x348] sm:$0xff] }
  0x59   : > { %855 = vmatpush.msra.mxu0 %v227_v13  ;;  %873 = vmatpush.msrb.mxu2 %v437_v14  ;;  %v499_v13 = vld [vmem:[%s1512_s17 + $0x988] sm:$0xff]  ;;  %v198_v14 = vld [vmem:[%s1512_s17 + $0x20] sm:$0xff] }
  0x5a   : > { %913 = vmatpush.msra.mxu3 %v338_v15  ;;  %1428 = vmatmul.msk.f32.vlgmr.msra.gmra.mxu2 %vm598_vm1, %v1587_v4  ;;  %v398_v15 = vld [vmem:[%s1512_s17 + $0x660] sm:$0xff] }
  0x5b   : > { %789 = vmatpush.msrb.mxu1 %v196_v17  ;;  %856 = vmatpush.msra.mxu0 %v217_v18  ;;  %v289_v17 = vld [vmem:[%s1512_s17 + $0x2f8] sm:$0xff] }
  0x5c   : > { %874 = vmatpush.msrb.mxu2 %v427_v19  ;;  %914 = vmatpush.msra.mxu3 %v328_v21  ;;  %v489_v18 = vld [vmem:[%s1512_s17 + $0x938] sm:$0xff]  ;;  %v279_v21 = vld [vmem:[%s1512_s17 + $0x2a8] sm:$0xff] }
  0x5d   : > { %1430 = vmatpush.msk.msra.mxu1 %vm605_vm0, %v567_v20  ;;  %857 = vmatpush.msra.mxu0 %v207_v22  ;;  %v569_v19 = vld [vmem:[%s1512_s17 + $0xbb8] sm:$0xf]  ;;  %v388_v20 = vld [vmem:[%s1512_s17 + $0x610] sm:$0xff]  ;;  %v479_v22 = vld [vmem:[%s1512_s17 + $0x8e8] sm:$0xff] }
  0x5e   : > { %875 = vmatpush.msrb.mxu2 %v417_v23  ;;  %813 = vmatmul.f32.vlgmr.msrb.gmra.mxu3 %v1609_v16  ;;  %v559_v23 = vld [vmem:[%s1512_s17 + $0xb68] sm:$0xff] }
  0x5f   : > { %900 = vmatpush.msra.mxu1 %v557_v24  ;;  %915 = vmatpush.msra.mxu3 %v318_v26  ;;  %v378_v24 = vld [vmem:[%s1512_s17 + $0x5c0] sm:$0xff]  ;;  %v269_v26 = vld [vmem:[%s1512_s17 + $0x258] sm:$0xff] }
  0x60   : > { %858 = vmatpush.msra.mxu0 %v197_v27  ;;  %876 = vmatpush.msrb.mxu2 %v407_v28  ;;  %v469_v27 = vld [vmem:[%s1512_s17 + $0x898] sm:$0xff] }
  0x61   : > { %901 = vmatpush.msra.mxu1 %v547_v29  ;;  %916 = vmatpush.msra.mxu3 %v308_v30  ;;  %v549_v28 = vld [vmem:[%s1512_s17 + $0xb18] sm:$0xff]  ;;  %v368_v29 = vld [vmem:[%s1512_s17 + $0x570] sm:$0xff]  ;;  %v259_v30 = vld [vmem:[%s1512_s17 + $0x208] sm:$0xff] }
  0x62   : > { %935 = vmatpush.msrb.mxu0 %v508_v31  ;;  %877 = vmatpush.msrb.mxu2 %v397_v33  ;;  %v459_v31 = vld [vmem:[%s1512_s17 + $0x848] sm:$0xff] }
  0x63   : > { %790 = vmatmul.f32.vlgmr.msrb.gmra.mxu1 %v1600_v11  ;;  %1429 = vmatmul.msk.f32.gmra.mxu2 %vm598_vm1, %v1624_v25  ;;  %v539_v33 = vld [vmem:[%s1512_s17 + $0xac8] sm:$0xff] }
  0x64   : > { %902 = vmatpush.msra.mxu1 %v537_v34  ;;  %917 = vmatpush.msra.mxu3 %v298_v35  ;;  %v358_v34 = vld [vmem:[%s1512_s17 + $0x520] sm:$0xff]  ;;  %v249_v35 = vld [vmem:[%s1512_s17 + $0x1b8] sm:$0xff] }
  0x65   : > { %936 = vmatpush.msrb.mxu0 %v498_v37  ;;  %878 = vmatpush.msrb.mxu2 %v387_v38  ;;  %v449_v37 = vld [vmem:[%s1512_s17 + $0x7f8] sm:$0xff] }
  0x66   : > { %903 = vmatpush.msra.mxu1 %v527_v39  ;;  %918 = vmatpush.msra.mxu3 %v288_v40  ;;  %v529_v38 = vld [vmem:[%s1512_s17 + $0xa78] sm:$0xff]  ;;  %v350_v39 = vld [vmem:[%s1512_s17 + $0x4e0] sm:$0xff]  ;;  %v239_v40 = vld [vmem:[%s1512_s17 + $0x168] sm:$0xff] }
  0x67   : > { %937 = vmatpush.msrb.mxu0 %v488_v41  ;;  %879 = vmatpush.msrb.mxu2 %v377_v42  ;;  %v439_v41 = vld [vmem:[%s1512_s17 + $0x7a8] sm:$0xff] }
  0x68   : > { %1426 = vmatmul.msk.f32.gmra.mxu0 %vm598_vm1, %v1624_v25  ;;  %816 = vmatmul.f32.gmra.mxu3 %v1646_v36  ;;  %v519_v42 = vld [vmem:[%s1512_s17 + $0xa28] sm:$0xff] }
  0x69   : > { %904 = vmatpush.msra.mxu1 %v517_v43  ;;  %919 = vmatpush.msra.mxu3 %v278_v44  ;;  %v340_v43 = vld [vmem:[%s1512_s17 + $0x490] sm:$0xff]  ;;  %v229_v44 = vld [vmem:[%s1512_s17 + $0x118] sm:$0xff] }
  0x6a   : > { %938 = vmatpush.msrb.mxu0 %v478_v45  ;;  %880 = vmatpush.msrb.mxu2 %v367_v46  ;;  %v429_v45 = vld [vmem:[%s1512_s17 + $0x758] sm:$0xff]  ;;  %v510_v46 = vld [vmem:[%s1512_s17 + $0x9e0] sm:$0xff] }
  0x6b   : > { %1433 = vmatpush.msk.msrb.mxu1 %vm605_vm0, %v568_v47  ;;  %920 = vmatpush.msra.mxu3 %v268_v48  ;;  %v330_v47 = vld [vmem:[%s1512_s17 + $0x440] sm:$0xff]  ;;  %v219_v48 = vld [vmem:[%s1512_s17 + $0xc8] sm:$0xff] }
  0x6c   : > { %939 = vmatpush.msrb.mxu0 %v468_v49  ;;  %881 = vmatpush.msrb.mxu2 %v357_v50  ;;  %v419_v49 = vld [vmem:[%s1512_s17 + $0x708] sm:$0xff]  ;;  %v500_v50 = vld [vmem:[%s1512_s17 + $0x990] sm:$0xff] }
  0x6d   : > { %969 = vmatpush.msrb.mxu1 %v558_v51  ;;  %882 = vmatmul.f32.vlgmr.msrb.gmra.mxu2 %v1609_v16  ;;  %v209_v51 = vld [vmem:[%s1512_s17 + $0x78] sm:$0xff] }
  0x6e   : > { %793 = vmatmul.f32.gmra.mxu1 %v1638_v32  ;;  %921 = vmatpush.msra.mxu3 %v258_v52  ;;  %v320_v52 = vld [vmem:[%s1512_s17 + $0x3f0] sm:$0xff] }
  0x6f   : > { %940 = vmatpush.msrb.mxu0 %v458_v53  ;;  %981 = vmatpush.msra.mxu2 %v349_v54  ;;  %v409_v53 = vld [vmem:[%s1512_s17 + $0x6b8] sm:$0xff]  ;;  %v490_v54 = vld [vmem:[%s1512_s17 + $0x940] sm:$0xff] }
  0x70   : > { %970 = vmatpush.msrb.mxu1 %v548_v55  ;;  %922 = vmatpush.msra.mxu3 %v248_v56  ;;  %v199_v55 = vld [vmem:[%s1512_s17 + $0x28] sm:$0xff]  ;;  %v310_v56 = vld [vmem:[%s1512_s17 + $0x3a0] sm:$0xff] }
  0x71   : > { %941 = vmatpush.msrb.mxu0 %v448_v57  ;;  %982 = vmatpush.msra.mxu2 %v339_v58  ;;  %v399_v57 = vld [vmem:[%s1512_s17 + $0x668] sm:$0xff]  ;;  %v480_v58 = vld [vmem:[%s1512_s17 + $0x8f0] sm:$0xff] }
  0x72   : > { %971 = vmatpush.msrb.mxu1 %v538_v59  ;;  %859 = vmatmul.f32.vlgmr.msra.gmra.mxu0 %v1600_v11  ;;  %v570_v59 = vld [vmem:[%s1512_s17 + $0xbc0] sm:$0xf] }
  0x73   : > { %923 = vmatpush.msra.mxu3 %v238_v60  ;;  %942 = vmatpush.msrb.mxu0 %v438_v61  ;;  %v300_v60 = vld [vmem:[%s1512_s17 + $0x350] sm:$0xff]  ;;  %v389_v61 = vld [vmem:[%s1512_s17 + $0x618] sm:$0xff] }
  0x74   : > { %983 = vmatpush.msra.mxu2 %v329_v62  ;;  %972 = vmatpush.msrb.mxu1 %v528_v63  ;;  %v470_v62 = vld [vmem:[%s1512_s17 + $0x8a0] sm:$0xff]  ;;  %v560_v63 = vld [vmem:[%s1512_s17 + $0xb70] sm:$0xff] }
  0x75   : > { %924 = vmatpush.msra.mxu3 %v228_v0  ;;  %943 = vmatpush.msrb.mxu0 %v428_v1  ;;  %v290_v0 = vld [vmem:[%s1512_s17 + $0x300] sm:$0xff]  ;;  %v379_v1 = vld [vmem:[%s1512_s17 + $0x5c8] sm:$0xff] }
  0x76   : > { %984 = vmatpush.msra.mxu2 %v319_v2  ;;  %973 = vmatpush.msrb.mxu1 %v518_v3  ;;  %v460_v2 = vld [vmem:[%s1512_s17 + $0x850] sm:$0xff] }
  0x77   : > { %925 = vmatpush.msra.mxu3 %v218_v5  ;;  %1431 = vmatmul.msk.f32.vlgmr.msra.gmra.mxu1 %vm598_vm1, %v1587_v4  ;;  %v280_v3 = vld [vmem:[%s1512_s17 + $0x2b0] sm:$0xff]  ;;  %v550_v5 = vld [vmem:[%s1512_s17 + $0xb20] sm:$0xff] }
  0x78   : > { %944 = vmatpush.msrb.mxu0 %v418_v6  ;;  %985 = vmatpush.msra.mxu2 %v309_v7  ;;  %v369_v6 = vld [vmem:[%s1512_s17 + $0x578] sm:$0xff]  ;;  %v450_v7 = vld [vmem:[%s1512_s17 + $0x800] sm:$0xff] }
  0x79   : > { %1004 = vmatpush.msra.mxu1 %v509_v8  ;;  %926 = vmatpush.msra.mxu3 %v208_v9  ;;  %v540_v8 = vld [vmem:[%s1512_s17 + $0xad0] sm:$0xff]  ;;  %v270_v9 = vld [vmem:[%s1512_s17 + $0x260] sm:$0xff] }
  0x7a   : > { %945 = vmatpush.msrb.mxu0 %v408_v10  ;;  %986 = vmatpush.msra.mxu2 %v299_v12  ;;  %v359_v10 = vld [vmem:[%s1512_s17 + $0x528] sm:$0xff]  ;;  %v440_v12 = vld [vmem:[%s1512_s17 + $0x7b0] sm:$0xff] }
  0x7b   : > { %1005 = vmatpush.msra.mxu1 %v499_v13  ;;  %927 = vmatpush.msra.mxu3 %v198_v14  ;;  %v260_v13 = vld [vmem:[%s1512_s17 + $0x210] sm:$0xff]  ;;  %v530_v14 = vld [vmem:[%s1512_s17 + $0xa80] sm:$0xff] }
  0x7c   : > { %946 = vmatpush.msrb.mxu0 %v398_v15  ;;  %987 = vmatpush.msra.mxu2 %v289_v17  ;;  %v351_v15 = vld [vmem:[%s1512_s17 + $0x4e8] sm:$0xff]  ;;  %v430_v17 = vld [vmem:[%s1512_s17 + $0x760] sm:$0xff] }
  0x7d   : > { %1006 = vmatpush.msra.mxu1 %v489_v18  ;;  %1436 = vmatpush.msk.msrb.mxu3 %vm605_vm0, %v569_v19  ;;  %v250_v18 = vld [vmem:[%s1512_s17 + $0x1c0] sm:$0xff]  ;;  %v520_v19 = vld [vmem:[%s1512_s17 + $0xa30] sm:$0xff] }
  0x7e   : > { %947 = vmatpush.msrb.mxu0 %v388_v20  ;;  %988 = vmatpush.msra.mxu2 %v279_v21  ;;  %v341_v20 = vld [vmem:[%s1512_s17 + $0x498] sm:$0xff]  ;;  %v420_v21 = vld [vmem:[%s1512_s17 + $0x710] sm:$0xff] }
  0x7f   : > { %1007 = vmatpush.msra.mxu1 %v479_v22  ;;  %1038 = vmatpush.msrb.mxu3 %v559_v23  ;;  %v511_v22 = vld [vmem:[%s1512_s17 + $0x9e8] sm:$0xff]  ;;  %v240_v23 = vld [vmem:[%s1512_s17 + $0x170] sm:$0xff] }
  0x80   : > { %948 = vmatpush.msrb.mxu0 %v378_v24  ;;  %989 = vmatpush.msra.mxu2 %v269_v26  ;;  %v331_v24 = vld [vmem:[%s1512_s17 + $0x448] sm:$0xff]  ;;  %v410_v26 = vld [vmem:[%s1512_s17 + $0x6c0] sm:$0xff] }
  0x81   : > { %1008 = vmatpush.msra.mxu1 %v469_v27  ;;  %1039 = vmatpush.msrb.mxu3 %v549_v28  ;;  %v501_v27 = vld [vmem:[%s1512_s17 + $0x998] sm:$0xff]  ;;  %v230_v28 = vld [vmem:[%s1512_s17 + $0x120] sm:$0xff] }
  0x82   : > { %949 = vmatpush.msrb.mxu0 %v368_v29  ;;  %990 = vmatpush.msra.mxu2 %v259_v30  ;;  %v321_v29 = vld [vmem:[%s1512_s17 + $0x3f8] sm:$0xff]  ;;  %v400_v30 = vld [vmem:[%s1512_s17 + $0x670] sm:$0xff] }
  0x83   : > { %1009 = vmatpush.msra.mxu1 %v459_v31  ;;  %1040 = vmatpush.msrb.mxu3 %v539_v33  ;;  %v491_v31 = vld [vmem:[%s1512_s17 + $0x948] sm:$0xff]  ;;  %v220_v33 = vld [vmem:[%s1512_s17 + $0xd0] sm:$0xff] }
  0x84   : > { %950 = vmatpush.msrb.mxu0 %v358_v34  ;;  %991 = vmatpush.msra.mxu2 %v249_v35  ;;  %v311_v34 = vld [vmem:[%s1512_s17 + $0x3a8] sm:$0xff]  ;;  %v390_v35 = vld [vmem:[%s1512_s17 + $0x620] sm:$0xff] }
  0x85   : > { %1010 = vmatpush.msra.mxu1 %v449_v37  ;;  %1041 = vmatpush.msrb.mxu3 %v529_v38  ;;  %v481_v37 = vld [vmem:[%s1512_s17 + $0x8f8] sm:$0xff]  ;;  %v210_v38 = vld [vmem:[%s1512_s17 + $0x80] sm:$0xff] }
  0x86   : > { %1050 = vmatpush.msra.mxu0 %v350_v39  ;;  %992 = vmatpush.msra.mxu2 %v239_v40  ;;  %v301_v39 = vld [vmem:[%s1512_s17 + $0x358] sm:$0xff]  ;;  %v380_v40 = vld [vmem:[%s1512_s17 + $0x5d0] sm:$0xff] }
  0x87   : > { %1011 = vmatpush.msra.mxu1 %v439_v41  ;;  %885 = vmatmul.f32.gmra.mxu2 %v1646_v36  ;;  %v471_v41 = vld [vmem:[%s1512_s17 + $0x8a8] sm:$0xff] }
  0x88   : > { %1042 = vmatpush.msrb.mxu3 %v519_v42  ;;  %1051 = vmatpush.msra.mxu0 %v340_v43  ;;  %v200_v42 = vld [vmem:[%s1512_s17 + $0x30] sm:$0xff]  ;;  %v291_v43 = vld [vmem:[%s1512_s17 + $0x308] sm:$0xff] }
  0x89   : > { %928 = vmatmul.f32.vlgmr.msra.gmra.mxu3 %v1600_v11  ;;  %993 = vmatpush.msra.mxu2 %v229_v44  ;;  %v370_v44 = vld [vmem:[%s1512_s17 + $0x580] sm:$0xff] }
  0x8a   : > { %1012 = vmatpush.msra.mxu1 %v429_v45  ;;  %1073 = vmatpush.msra.mxu3 %v510_v46  ;;  %v461_v45 = vld [vmem:[%s1512_s17 + $0x858] sm:$0xff]  ;;  %v571_v46 = vld [vmem:[%s1512_s17 + $0xbc8] sm:$0xf] }
  0x8b   : > { %1052 = vmatpush.msra.mxu0 %v330_v47  ;;  %1432 = vmatmul.msk.f32.gmra.mxu1 %vm598_vm1, %v1624_v25  ;;  %v281_v47 = vld [vmem:[%s1512_s17 + $0x2b8] sm:$0xff] }
  0x8c   : > { %994 = vmatpush.msra.mxu2 %v219_v48  ;;  %1013 = vmatpush.msra.mxu1 %v419_v49  ;;  %v360_v48 = vld [vmem:[%s1512_s17 + $0x530] sm:$0xff]  ;;  %v561_v49 = vld [vmem:[%s1512_s17 + $0xb78] sm:$0xff] }
  0x8d   : > { %1074 = vmatpush.msra.mxu3 %v500_v50  ;;  %862 = vmatmul.f32.gmra.mxu0 %v1638_v32  ;;  %v271_v50 = vld [vmem:[%s1512_s17 + $0x268] sm:$0xff] }
  0x8e   : > { %995 = vmatpush.msra.mxu2 %v209_v51  ;;  %1053 = vmatpush.msra.mxu0 %v320_v52  ;;  %v352_v51 = vld [vmem:[%s1512_s17 + $0x4f0] sm:$0xff]  ;;  %v441_v52 = vld [vmem:[%s1512_s17 + $0x7b8] sm:$0xff] }
  0x8f   : > { %1014 = vmatpush.msra.mxu1 %v409_v53  ;;  %1075 = vmatpush.msra.mxu3 %v490_v54  ;;  %v551_v53 = vld [vmem:[%s1512_s17 + $0xb28] sm:$0xff]  ;;  %v1891_v54 = vld [vmem:[%s1880_s6] sm:$0xff] }
  0x90   : > { %996 = vmatpush.msra.mxu2 %v199_v55  ;;  %1054 = vmatpush.msra.mxu0 %v310_v56  ;;  %v261_v55 = vld [vmem:[%s1512_s17 + $0x218] sm:$0xff]  ;;  %v342_v56 = vld [vmem:[%s1512_s17 + $0x4a0] sm:$0xff] }
  0x91   : > { %1015 = vmatpush.msra.mxu1 %v399_v57  ;;  %1076 = vmatpush.msra.mxu3 %v480_v58  ;;  %v431_v57 = vld [vmem:[%s1512_s17 + $0x768] sm:$0xff]  ;;  %v541_v58 = vld [vmem:[%s1512_s17 + $0xad8] sm:$0xff] }
  0x92   : > { %1439 = vmatpush.msk.msrb.mxu2 %vm605_vm0, %v570_v59  ;;  %1055 = vmatpush.msra.mxu0 %v300_v60  ;;  %v251_v59 = vld [vmem:[%s1512_s17 + $0x1c8] sm:$0xff]  ;;  %v332_v60 = vld [vmem:[%s1512_s17 + $0x450] sm:$0xff] }
  0x93   : > { %1016 = vmatpush.msra.mxu1 %v389_v61  ;;  %1077 = vmatpush.msra.mxu3 %v470_v62  ;;  %v578_v61 = vperm.slane %v1891_v54, 0  ;;  %v531_v62 = vld [vmem:[%s1512_s17 + $0xa88] sm:$0xff] }
  0x94   : > { %1107 = vmatpush.msrb.mxu2 %v560_v63  ;;  %1056 = vmatpush.msra.mxu0 %v290_v0  ;;  %v421_v63 = vld [vmem:[%s1512_s17 + $0x718] sm:$0xff] }
  0x95   : > { %1434 = vmatmul.msk.f32.vlgmr.msrb.gmra.mxu1 %vm598_vm1, %v1587_v4  ;;  %1078 = vmatpush.msra.mxu3 %v460_v2  ;;  %v241_v0 = vld [vmem:[%s1512_s17 + $0x178] sm:$0xff] }
  0x96   : > { %1017 = vmatpush.msra.mxu1 %v379_v1  ;;  %1057 = vmatpush.msra.mxu0 %v280_v3  ;;  %v322_v1 = vld [vmem:[%s1512_s17 + $0x400] sm:$0xff]  ;;  %v411_v3 = vld [vmem:[%s1512_s17 + $0x6c8] sm:$0xff] }
  0x97   : > { %1108 = vmatpush.msrb.mxu2 %v550_v5  ;;  %1079 = vmatpush.msra.mxu3 %v450_v7  ;;  %v231_v7 = vld [vmem:[%s1512_s17 + $0x128] sm:$0xff] }
  0x98   : > { %1018 = vmatpush.msra.mxu1 %v369_v6  ;;  %951 = vmatmul.f32.vlgmr.msrb.gmra.mxu0 %v1609_v16  ;;  %v521_v6 = vld [vmem:[%s1512_s17 + $0xa38] sm:$0xff] }
  0x99   : > { %1109 = vmatpush.msrb.mxu2 %v540_v8  ;;  %1058 = vmatpush.msra.mxu0 %v270_v9 }
  0x9a   : > { %931 = vmatmul.f32.gmra.mxu3 %v1638_v32  ;;  %1019 = vmatpush.msra.mxu1 %v359_v10  ;;  %v312_v10 = vld [vmem:[%s1512_s17 + $0x3b0] sm:$0xff] }
  0x9b   : > { %1080 = vmatpush.msra.mxu3 %v440_v12  ;;  %1059 = vmatpush.msra.mxu0 %v260_v13  ;;  %v401_v13 = vld [vmem:[%s1512_s17 + $0x678] sm:$0xff] }
  0x9c   : > { %1110 = vmatpush.msrb.mxu2 %v530_v14  ;;  %1119 = vmatpush.msrb.mxu1 %v351_v15  ;;  %v221_v14 = vld [vmem:[%s1512_s17 + $0xd8] sm:$0xff]  ;;  %v502_v15 = vld [vmem:[%s1512_s17 + $0x9a0] sm:$0xff] }
  0x9d   : > { %1081 = vmatpush.msra.mxu3 %v430_v17  ;;  %1060 = vmatpush.msra.mxu0 %v250_v18  ;;  %v391_v18 = vld [vmem:[%s1512_s17 + $0x628] sm:$0xff] }
  0x9e   : > { %1111 = vmatpush.msrb.mxu2 %v520_v19  ;;  %1120 = vmatpush.msrb.mxu1 %v341_v20  ;;  %v211_v19 = vld [vmem:[%s1512_s17 + $0x88] sm:$0xff]  ;;  %v292_v20 = vld [vmem:[%s1512_s17 + $0x310] sm:$0xff] }
  0x9f   : > { %997 = vmatmul.f32.vlgmr.msra.gmra.mxu2 %v1600_v11  ;;  %1435 = vmatmul.msk.f32.gmra.mxu1 %vm598_vm1, %v1624_v25 }
  0xa0   : > { %1082 = vmatpush.msra.mxu3 %v420_v21  ;;  %1142 = vmatpush.msra.mxu2 %v511_v22  ;;  %v492_v21 = vld [vmem:[%s1512_s17 + $0x950] sm:$0xff]  ;;  %v201_v22 = vld [vmem:[%s1512_s17 + $0x38] sm:$0xff] }
  0xa1   : > { %1061 = vmatpush.msra.mxu0 %v240_v23  ;;  %1121 = vmatpush.msrb.mxu1 %v331_v24  ;;  %v381_v23 = vld [vmem:[%s1512_s17 + $0x5d8] sm:$0xff]  ;;  %v282_v24 = vld [vmem:[%s1512_s17 + $0x2c0] sm:$0xff] }
  0xa2   : > { %1083 = vmatpush.msra.mxu3 %v410_v26  ;;  %1143 = vmatpush.msra.mxu2 %v501_v27  ;;  %v482_v26 = vld [vmem:[%s1512_s17 + $0x900] sm:$0xff] }
  0xa3   : > { %1062 = vmatpush.msra.mxu0 %v230_v28  ;;  %1122 = vmatpush.msrb.mxu1 %v321_v29  ;;  %v371_v28 = vld [vmem:[%s1512_s17 + $0x588] sm:$0xff] }
  0xa4   : > { %1437 = vmatmul.msk.f32.vlgmr.msrb.gmra.mxu3 %vm598_vm1, %v1587_v4  ;;  %1144 = vmatpush.msra.mxu2 %v491_v31  ;;  %v272_v31 = vld [vmem:[%s1512_s17 + $0x270] sm:$0xff] }
  0xa5   : > { %1084 = vmatpush.msra.mxu3 %v400_v30  ;;  %1063 = vmatpush.msra.mxu0 %v220_v33  ;;  %v572_v30 = vld [vmem:[%s1512_s17 + $0xbd0] sm:$0xf] }
  0xa6   : > { %1123 = vmatpush.msrb.mxu1 %v311_v34  ;;  %1145 = vmatpush.msra.mxu2 %v481_v37  ;;  %v1941_v34 = vld [vmem:[%s2095_s0 + $0x8] sm:$0xff] }
  0xa7   : > { %1085 = vmatpush.msra.mxu3 %v390_v35  ;;  %1064 = vmatpush.msra.mxu0 %v210_v38  ;;  %v361_v38 = vld [vmem:[%s1512_s17 + $0x538] sm:$0xff] }
  0xa8   : > { %1124 = vmatpush.msrb.mxu1 %v301_v39  ;;  %1146 = vmatpush.msra.mxu2 %v471_v41  ;;  %v562_v39 = vld [vmem:[%s1512_s17 + $0xb80] sm:$0xff] }
  0xa9   : > { %1020 = vmatmul.f32.vlgmr.msra.gmra.mxu1 %v1609_v16  ;;  %1086 = vmatpush.msra.mxu3 %v380_v40  ;;  %v451_v16 = vld [vmem:[%s1512_s17 + $0x808] sm:$0xff]  ;;  %v262_v40 = vld [vmem:[%s1512_s17 + $0x220] sm:$0xff] }
  0xaa   : > { %1065 = vmatpush.msra.mxu0 %v200_v42  ;;  %1125 = vmatpush.msrb.mxu1 %v291_v43  ;;  %v462_v41 = vld [vmem:[%s1512_s17 + $0x860] sm:$0xff]  ;;  %v353_v43 = vld [vmem:[%s1512_s17 + $0x4f8] sm:$0xff] }
  0xab   : > { %1000 = vmatmul.f32.gmra.mxu2 %v1638_v32  ;;  %1087 = vmatpush.msra.mxu3 %v370_v44  ;;  %v552_v44 = vld [vmem:[%s1512_s17 + $0xb30] sm:$0xff] }
  0xac   : > { %1147 = vmatpush.msra.mxu2 %v461_v45  ;;  %1442 = vmatpush.msk.msrb.mxu0 %vm605_vm0, %v571_v46  ;;  %v452_v45 = vld [vmem:[%s1512_s17 + $0x810] sm:$0xff]  ;;  %v343_v46 = vld [vmem:[%s1512_s17 + $0x4a8] sm:$0xff] }
  0xad   : > { %1126 = vmatpush.msrb.mxu1 %v281_v47  ;;  %954 = vmatmul.f32.gmra.mxu0 %v1646_v36  ;;  %v542_v47 = vld [vmem:[%s1512_s17 + $0xae0] sm:$0xff] }
  0xae   : > { %1088 = vmatpush.msra.mxu3 %v360_v48  ;;  %1148 = vmatpush.msra.mxu2 %v451_v16  ;;  %v579_v48 = vperm.slane %v1891_v54, 1  ;;  %v442_v16 = vld [vmem:[%s1512_s17 + $0x7c0] sm:$0xff] }
  0xaf   : > { %1176 = vmatpush.msrb.mxu0 %v561_v49  ;;  %1127 = vmatpush.msrb.mxu1 %v271_v50  ;;  %v333_v49 = vld [vmem:[%s1512_s17 + $0x458] sm:$0xff] }
  0xb0   : > { %1188 = vmatpush.msrb.mxu3 %v352_v51  ;;  %1149 = vmatpush.msra.mxu2 %v441_v52  ;;  %v532_v51 = vld [vmem:[%s1512_s17 + $0xa90] sm:$0xff] }
  0xb1   : > { %1177 = vmatpush.msrb.mxu0 %v551_v53  ;;  %1128 = vmatpush.msrb.mxu1 %v261_v55  ;;  %v232_v52 = vld [vmem:[%s1512_s17 + $0x130] sm:$0xff] }
  0xb2   : > { %1189 = vmatpush.msrb.mxu3 %v342_v56  ;;  %1150 = vmatpush.msra.mxu2 %v431_v57  ;;  %v432_v55 = vld [vmem:[%s1512_s17 + $0x770] sm:$0xff]  ;;  %v323_v56 = vld [vmem:[%s1512_s17 + $0x408] sm:$0xff] }
  0xb3   : > { %1178 = vmatpush.msrb.mxu0 %v541_v58  ;;  %1129 = vmatpush.msrb.mxu1 %v251_v59  ;;  %v653_v2 = vpop.f32.mrf.mxu0  ;;  %v1973_v58 = vld [vmem:[%s2095_s0 + $0x20] sm:$0xff]  ;;  %v1979_v59 = vld [vmem:[%s2095_s0 + $0x10] sm:$0xff] }
  0xb4   : > { %1190 = vmatpush.msrb.mxu3 %v332_v60  ;;  %1440 = vmatmul.msk.f32.vlgmr.msrb.gmra.mxu2 %vm598_vm1, %v1587_v4  ;;  %v654_v5 = vadd.f32 %v653_v2, %v578_v61  ;;  %v512_v4 = vld [vmem:[%s1512_s17 + $0x9f0] sm:$0xff]  ;;  %v222_v60 = vld [vmem:[%s1512_s17 + $0xe0] sm:$0xff] }
  0xb5   : > { %1179 = vmatpush.msrb.mxu0 %v531_v62  ;;  %1151 = vmatpush.msra.mxu2 %v421_v63  ;;  %v676_v8 = vpop.f32.mrf.mxu1  ;;  %v522_v62 = vld [vmem:[%s1512_s17 + $0xa40] sm:$0xff] }
  0xb6   : > { %1130 = vmatpush.msrb.mxu1 %v241_v0  ;;  %v699_v9 = vpop.f32.mrf.mxu2  ;;  %1191 = vmatpush.msrb.mxu3 %v322_v1  ;;  %v677_v12 = vadd.f32 %v676_v8, %v654_v5  ;;  %v422_v63 = vld [vmem:[%s1512_s17 + $0x720] sm:$0xff]  ;;  %v313_v0 = vld [vmem:[%s1512_s17 + $0x3b8] sm:$0xff]  ;;  %v212_v5 = vld [vmem:[%s1512_s17 + $0x90] sm:$0xff] }
  0xb7   : > { %1066 = vmatmul.f32.vlgmr.msra.gmra.mxu0 %v1600_v11  ;;  %1438 = vmatmul.msk.f32.gmra.mxu3 %vm598_vm1, %v1624_v25  ;;  %v302_v11 = vld [vmem:[%s1512_s17 + $0x360] sm:$0xff]  ;;  %v513_v1 = vld [vmem:[%s1512_s17 + $0x9f8] sm:$0xff]  ;;  %v303_v8 = vld [vmem:[%s1512_s17 + $0x368] sm:$0xff] }
  0xb8   : > { %1152 = vmatpush.msra.mxu2 %v411_v3  ;;  %1180 = vmatpush.msrb.mxu0 %v521_v6  ;;  %v700_v17 = vadd.f32 %v699_v9, %v677_v12  ;;  %v1991_v3 = vld [vmem:[%s2095_s0] sm:$0xff]  ;;  %v412_v6 = vld [vmem:[%s1512_s17 + $0x6d0] sm:$0xff]  ;;  %v503_v9 = vld [vmem:[%s1512_s17 + $0x9a8] sm:$0xff] }
  0xb9   : > { %1131 = vmatpush.msrb.mxu1 %v231_v7  ;;  %1192 = vmatpush.msrb.mxu3 %v312_v10  ;;  %v202_v10 = vld [vmem:[%s1512_s17 + $0x40] sm:$0xff]  ;;  %v293_v12 = vld [vmem:[%s1512_s17 + $0x318] sm:$0xff] }
  0xba   : > { %1211 = vmatpush.msra.mxu0 %v512_v4  ;;  %1153 = vmatpush.msra.mxu2 %v401_v13  ;;  %1326 = vst [vmem:[%s1920_s10] sm:$0xff] %v700_v17  ;;  %v402_v4 = vld [vmem:[%s1512_s17 + $0x680] sm:$0xff]  ;;  %v493_v13 = vld [vmem:[%s1512_s17 + $0x958] sm:$0xff]  ;;  %v483_v17 = vld [vmem:[%s1512_s17 + $0x908] sm:$0xff] }
  0xbb   : > { %1132 = vmatpush.msrb.mxu1 %v221_v14  ;;  %1193 = vmatpush.msrb.mxu3 %v302_v11  ;;  %v392_v14 = vld [vmem:[%s1512_s17 + $0x630] sm:$0xff] }
  0xbc   : > { %1212 = vmatpush.msra.mxu0 %v502_v15  ;;  %1154 = vmatpush.msra.mxu2 %v391_v18  ;;  %v283_v15 = vld [vmem:[%s1512_s17 + $0x2c8] sm:$0xff] }
  0xbd   : > { %1133 = vmatpush.msrb.mxu1 %v211_v19  ;;  %1194 = vmatpush.msrb.mxu3 %v292_v20  ;;  %v2010_v18 = vld [vmem:[%s2095_s0 + $0x28] sm:$0xff]  ;;  %v382_v19 = vld [vmem:[%s1512_s17 + $0x5e0] sm:$0xff]  ;;  %v273_v20 = vld [vmem:[%s1512_s17 + $0x278] sm:$0xff] }
  0xbe   : > { %1213 = vmatpush.msra.mxu0 %v492_v21  ;;  %v656_v27 = vpop.f32.mrf.mxu0  ;;  %1441 = vmatmul.msk.f32.gmra.mxu2 %vm598_vm1, %v1624_v25  ;;  %v472_v25 = vld [vmem:[%s1512_s17 + $0x8b0] sm:$0xff]  ;;  %v473_v21 = vld [vmem:[%s1512_s17 + $0x8b8] sm:$0xff] }
  0xbf   : > { %1134 = vmatpush.msrb.mxu1 %v201_v22  ;;  %v657_v29 = vadd.f32 %v656_v27, %v578_v61  ;;  %1155 = vmatpush.msra.mxu2 %v381_v23  ;;  %v372_v22 = vld [vmem:[%s1512_s17 + $0x590] sm:$0xff]  ;;  %v573_v23 = vld [vmem:[%s1512_s17 + $0xbd8] sm:$0xf]  ;;  %v463_v27 = vld [vmem:[%s1512_s17 + $0x868] sm:$0xff] }
  0xc0   : > { %1195 = vmatpush.msrb.mxu3 %v282_v24  ;;  %v679_v33 = vpop.f32.mrf.mxu1  ;;  %1214 = vmatpush.msra.mxu0 %v482_v26  ;;  %v702_v37 = vpop.f32.mrf.mxu2  ;;  %v2023_v24 = vld [vmem:[%s2095_s0 + $0x18] sm:$0xff]  ;;  %v263_v26 = vld [vmem:[%s1512_s17 + $0x228] sm:$0xff] }
  0xc1   : > { %1089 = vmatmul.f32.vlgmr.msra.gmra.mxu3 %v1941_v34  ;;  %v680_v35 = vadd.f32 %v679_v33, %v657_v29  ;;  %1069 = vmatmul.f32.gmra.mxu0 %v1638_v32  ;;  %v252_v32 = vld [vmem:[%s1512_s17 + $0x1d0] sm:$0xff]  ;;  %v362_v29 = vld [vmem:[%s1512_s17 + $0x540] sm:$0xff]  ;;  %v453_v33 = vld [vmem:[%s1512_s17 + $0x818] sm:$0xff] }
  0xc2   : > { %1156 = vmatpush.msra.mxu2 %v371_v28  ;;  %1445 = vmatpush.msk.msra.mxu1 %vm605_vm0, %v572_v30  ;;  %v563_v30 = vld [vmem:[%s1512_s17 + $0xb88] sm:$0xff] }
  0xc3   : > { %1196 = vmatpush.msrb.mxu3 %v272_v31  ;;  %v703_v42 = vadd.f32 %v702_v37, %v680_v35  ;;  %1215 = vmatpush.msra.mxu0 %v472_v25  ;;  %v253_v31 = vld [vmem:[%s1512_s17 + $0x1d8] sm:$0xff]  ;;  %v243_v25 = vld [vmem:[%s1512_s17 + $0x188] sm:$0xff]  ;;  %v580_v37 = vperm.slane %v1891_v54, 2 }
  0xc4   : > { %1023 = vmatmul.f32.gmra.mxu1 %v1646_v36  ;;  %1157 = vmatpush.msra.mxu2 %v361_v38  ;;  %v242_v36 = vld [vmem:[%s1512_s17 + $0x180] sm:$0xff]  ;;  %v443_v35 = vld [vmem:[%s1512_s17 + $0x7c8] sm:$0xff]  ;;  %v553_v38 = vld [vmem:[%s1512_s17 + $0xb38] sm:$0xff] }
  0xc5   : > { %1245 = vmatpush.msra.mxu1 %v562_v39  ;;  %1337 = vst [vmem:[%s1920_s10 + $0x50] sm:$0xff] %v703_v42  ;;  %1197 = vmatpush.msrb.mxu3 %v262_v40  ;;  %v433_v42 = vld [vmem:[%s1512_s17 + $0x778] sm:$0xff] }
  0xc6   : > { %1216 = vmatpush.msra.mxu0 %v462_v41  ;;  %1257 = vmatpush.msrb.mxu2 %v353_v43  ;;  %v233_v41 = vld [vmem:[%s1512_s17 + $0x138] sm:$0xff]  ;;  %v543_v43 = vld [vmem:[%s1512_s17 + $0xae8] sm:$0xff] }
  0xc7   : > { %1246 = vmatpush.msra.mxu1 %v552_v44  ;;  %1198 = vmatpush.msrb.mxu3 %v252_v32  ;;  %v223_v32 = vld [vmem:[%s1512_s17 + $0xe8] sm:$0xff] }
  0xc8   : > { %1217 = vmatpush.msra.mxu0 %v452_v45  ;;  %1258 = vmatpush.msrb.mxu2 %v343_v46  ;;  %v722_v50 = vpop.f32.mrf.mxu3  ;;  %v423_v45 = vld [vmem:[%s1512_s17 + $0x728] sm:$0xff] }
  0xc9   : > { %1247 = vmatpush.msra.mxu1 %v542_v47  ;;  %1158 = vmatmul.f32.vlgmr.msra.gmra.mxu2 %v1941_v34  ;;  %v723_v53 = vadd.f32 %v722_v50, %v579_v48  ;;  %v533_v47 = vld [vmem:[%s1512_s17 + $0xa98] sm:$0xff] }
  0xca   : > { %1199 = vmatpush.msrb.mxu3 %v242_v36  ;;  %1218 = vmatpush.msra.mxu0 %v442_v16  ;;  %v745_v57 = vpop.f32.mrf.mxu2  ;;  %v213_v16 = vld [vmem:[%s1512_s17 + $0x98] sm:$0xff] }
  0xcb   : > { %1259 = vmatpush.msrb.mxu2 %v333_v49  ;;  %1092 = vmatmul.f32.gmra.mxu3 %v1973_v58  ;;  %v746_v61 = vadd.f32 %v745_v57, %v723_v53  ;;  %v413_v49 = vld [vmem:[%s1512_s17 + $0x6d8] sm:$0xff]  ;;  %v403_v53 = vld [vmem:[%s1512_s17 + $0x688] sm:$0xff] }
  0xcc   : > { %1443 = vmatmul.msk.f32.vlgmr.msrb.gmra.mxu0 %vm598_vm1, %v1979_v59  ;;  %1248 = vmatpush.msra.mxu1 %v532_v51  ;;  %v523_v51 = vld [vmem:[%s1512_s17 + $0xa48] sm:$0xff] }
  0xcd   : > { %1200 = vmatpush.msrb.mxu3 %v232_v52  ;;  %1219 = vmatpush.msra.mxu0 %v432_v55  ;;  %v768_v2 = vpop.f32.mrf.mxu0  ;;  %v203_v52 = vld [vmem:[%s1512_s17 + $0x48] sm:$0xff] }
  0xce   : > { %1260 = vmatpush.msrb.mxu2 %v323_v56  ;;  %1135 = vmatmul.f32.vlgmr.msrb.gmra.mxu1 %v1991_v3  ;;  %v769_v7 = vadd.f32 %v768_v2, %v746_v61 }
  0xcf   : > { %1201 = vmatpush.msrb.mxu3 %v222_v60  ;;  %1249 = vmatpush.msra.mxu1 %v522_v62  ;;  %v393_v60 = vld [vmem:[%s1512_s17 + $0x638] sm:$0xff]  ;;  %v383_v62 = vld [vmem:[%s1512_s17 + $0x5e8] sm:$0xff] }
  0xd0   : > { %1220 = vmatpush.msra.mxu0 %v422_v63  ;;  %1261 = vmatpush.msrb.mxu2 %v313_v0  ;;  %1327 = vst [vmem:[%s1920_s10 + $0x8] sm:$0xff] %v769_v7  ;;  %v373_v63 = vld [vmem:[%s1512_s17 + $0x598] sm:$0xff] }
  0xd1   : > { %1280 = vmatpush.msrb.mxu1 %v513_v1  ;;  %1202 = vmatpush.msrb.mxu3 %v212_v5  ;;  %v363_v5 = vld [vmem:[%s1512_s17 + $0x548] sm:$0xff] }
  0xd2   : > { %1221 = vmatpush.msra.mxu0 %v412_v6  ;;  %1262 = vmatpush.msrb.mxu2 %v303_v8  ;;  %v581_v6 = vperm.slane %v1891_v54, 3 }
  0xd3   : > { %1281 = vmatpush.msrb.mxu1 %v503_v9  ;;  %1161 = vmatmul.f32.gmra.mxu2 %v1973_v58 }
  0xd4   : > { %1203 = vmatpush.msrb.mxu3 %v202_v10  ;;  %v748_v11 = vpop.f32.mrf.mxu2  ;;  %1222 = vmatpush.msra.mxu0 %v402_v4 }
  0xd5   : > { %1263 = vmatpush.msrb.mxu2 %v293_v12  ;;  %1282 = vmatpush.msrb.mxu1 %v493_v13 }
  0xd6   : > { %1444 = vmatmul.msk.f32.gmra.mxu0 %vm598_vm1, %v2010_v18  ;;  %1204 = vmatmul.f32.vlgmr.msrb.gmra.mxu3 %v1991_v3 }
  0xd7   : > { %1223 = vmatpush.msra.mxu0 %v392_v14  ;;  %1264 = vmatpush.msrb.mxu2 %v283_v15 }
  0xd8   : > { %1283 = vmatpush.msrb.mxu1 %v483_v17  ;;  %v725_v28 = vpop.f32.mrf.mxu3  ;;  %1448 = vmatpush.msk.msra.mxu3 %vm605_vm0, %v573_v23 }
  0xd9   : > { %1138 = vmatmul.f32.gmra.mxu1 %v2023_v24  ;;  %1224 = vmatpush.msra.mxu0 %v382_v19  ;;  %v726_v39 = vadd.f32 %v725_v28, %v579_v48 }
  0xda   : > { %1265 = vmatpush.msrb.mxu2 %v273_v20  ;;  %1284 = vmatpush.msrb.mxu1 %v473_v21 }
  0xdb   : > { %1225 = vmatpush.msra.mxu0 %v372_v22  ;;  %1314 = vmatpush.msra.mxu3 %v563_v30  ;;  %v749_v36 = vadd.f32 %v748_v11, %v726_v39 }
  0xdc   : > { %1266 = vmatpush.msrb.mxu2 %v263_v26  ;;  %1285 = vmatpush.msrb.mxu1 %v463_v27  ;;  %v583_v27 = vperm.slane %v1891_v54, 5 }
  0xdd   : > { %1226 = vmatpush.msra.mxu0 %v362_v29  ;;  %v837_v40 = vpop.f32.mrf.mxu2  ;;  %1315 = vmatpush.msra.mxu3 %v553_v38 }
  0xde   : > { %1267 = vmatpush.msrb.mxu2 %v253_v31  ;;  %1286 = vmatpush.msrb.mxu1 %v453_v33 }
  0xdf   : > { %1207 = vmatmul.f32.gmra.mxu3 %v2023_v24  ;;  %1227 = vmatmul.f32.vlgmr.msra.gmra.mxu0 %v1941_v34 }
  0xe0   : > { %1268 = vmatpush.msrb.mxu2 %v243_v25  ;;  %1287 = vmatpush.msrb.mxu1 %v443_v35  ;;  %v791_v44 = vpop.f32.mrf.mxu1 }
  0xe1   : > { %1446 = vmatmul.msk.f32.vlgmr.msra.gmra.mxu1 %vm598_vm1, %v1979_v59  ;;  %v792_v46 = vadd.f32 %v791_v44, %v580_v37  ;;  %v814_v48 = vpop.f32.mrf.mxu3  ;;  %1316 = vmatpush.msra.mxu3 %v543_v43  ;;  %v584_v44 = vperm.slane %v1891_v54, 6 }
  0xe2   : > { %1269 = vmatpush.msrb.mxu2 %v233_v41  ;;  %1288 = vmatpush.msrb.mxu1 %v433_v42 }
  0xe3   : > { %v815_v50 = vadd.f32 %v814_v48, %v792_v46  ;;  %1317 = vmatpush.msra.mxu3 %v533_v47 }
  0xe4   : > { %1270 = vmatpush.msrb.mxu2 %v223_v32  ;;  %1289 = vmatpush.msrb.mxu1 %v423_v45 }
  0xe5   : > { %v838_v55 = vadd.f32 %v837_v40, %v815_v50  ;;  %v771_v56 = vpop.f32.mrf.mxu0  ;;  %1318 = vmatpush.msra.mxu3 %v523_v51 }
  0xe6   : > { %1271 = vmatpush.msrb.mxu2 %v213_v16  ;;  %1290 = vmatpush.msrb.mxu1 %v413_v49  ;;  %v772_v57 = vadd.f32 %v771_v56, %v749_v36  ;;  %v840_v61 = vpop.f32.mrf.mxu2 }
  0xe7   : > { %1230 = vmatmul.f32.gmra.mxu0 %v1973_v58  ;;  %1328 = vst [vmem:[%s1920_s10 + $0x10] sm:$0xff] %v838_v55  ;;  %1449 = vmatmul.msk.f32.vlgmr.msra.gmra.mxu3 %vm598_vm1, %v1979_v59 }
  0xe8   : > { %1272 = vmatpush.msrb.mxu2 %v203_v52  ;;  %1291 = vmatpush.msrb.mxu1 %v403_v53  ;;  %1338 = vst [vmem:[%s1920_s10 + $0x58] sm:$0xff] %v772_v57  ;;  %v585_v53 = vperm.slane %v1891_v54, 7 }
  0xe9   : > { %1447 = vmatmul.msk.f32.gmra.mxu1 %vm598_vm1, %v2010_v18  ;;  %1273 = vmatmul.f32.vlgmr.msrb.gmra.mxu2 %v1991_v3 }
  0xea   : > { %1292 = vmatpush.msrb.mxu1 %v393_v60 }
  0xeb   : > { %v794_v0 = vpop.f32.mrf.mxu1  ;;  %v817_v2 = vpop.f32.mrf.mxu3 }
  0xec   : > { %1293 = vmatpush.msrb.mxu1 %v383_v62  ;;  %v795_v1 = vadd.f32 %v794_v0, %v580_v37 }
  0xee   : > { %1294 = vmatpush.msrb.mxu1 %v373_v63  ;;  %v818_v7 = vadd.f32 %v817_v2, %v795_v1 }
  0xef   : > { %v860_v3 = vpop.f32.mrf.mxu0  ;;  %1450 = vmatmul.msk.f32.gmra.mxu3 %vm598_vm1, %v2010_v18 }
  0xf0   : > { %1295 = vmatpush.msrb.mxu1 %v363_v5  ;;  %v841_v8 = vadd.f32 %v840_v61, %v818_v7  ;;  %v861_v59 = vadd.f32 %v860_v3, %v581_v6  ;;  %v883_v9 = vpop.f32.mrf.mxu2  ;;  %v575_v5 = vld [vmem:[%s1880_s6 + $0x8] sm:$0x3] }
  0xf1   : > { %1276 = vmatmul.f32.gmra.mxu2 %v2023_v24  ;;  %1296 = vmatmul.f32.vlgmr.msrb.gmra.mxu1 %v1941_v34  ;;  %v582_v34 = vperm.slane %v1891_v54, 4  ;;  %v586_v3 = vperm.slane %v575_v5, 0 }
  0xf2   : > { %1339 = vst [vmem:[%s1920_s10 + $0x60] sm:$0xff] %v841_v8  ;;  %v884_v10 = vadd.f32 %v883_v9, %v861_v59 }
  0xf4   : > { %v906_v4 = vpop.f32.mrf.mxu1 }
  0xf5   : > { %v907_v12 = vadd.f32 %v906_v4, %v884_v10 }
  0xf7   : > { %1329 = vst [vmem:[%s1920_s10 + $0x18] sm:$0xff] %v907_v12 }
  0xf9   : > { %1299 = vmatmul.f32.gmra.mxu1 %v1973_v58 }
 0x108   : > { %v909_v13 = vpop.f32.mrf.mxu1 }
 0x10a   : > { %v863_v14 = vpop.f32.mrf.mxu0  ;;  %v886_v11 = vpop.f32.mrf.mxu2 }
 0x10b   : > { %v864_v15 = vadd.f32 %v863_v14, %v581_v6 }
 0x10c   : > { %v929_v20 = vpop.f32.mrf.mxu3 }
 0x10d   : > { %v887_v17 = vadd.f32 %v886_v11, %v864_v15  ;;  %v930_v18 = vadd.f32 %v929_v20, %v582_v34 }
 0x10f   : > { %v910_v19 = vadd.f32 %v909_v13, %v887_v17 }
 0x111   : > { %1340 = vst [vmem:[%s1920_s10 + $0x68] sm:$0xff] %v910_v19 }
 0x112   : > { %v975_v21 = vpop.f32.mrf.mxu1 }
 0x115   : > { %v952_v22 = vpop.f32.mrf.mxu0 }
 0x116   : > { %v953_v23 = vadd.f32 %v952_v22, %v930_v18 }
 0x118   : > { %v976_v24 = vadd.f32 %v975_v21, %v953_v23  ;;  %v587_v21 = vperm.slane %v575_v5, 1 }
 0x11a   : > { %1330 = vst [vmem:[%s1920_s10 + $0x20] sm:$0xff] %v976_v24 }
 0x11c   : > { %v978_v26 = vpop.f32.mrf.mxu1 }
 0x11d   : > { %v932_v58 = vpop.f32.mrf.mxu3 }
 0x11e   : > { %v933_v25 = vadd.f32 %v932_v58, %v582_v34 }
 0x122   : > { %v998_v28 = vpop.f32.mrf.mxu2 }
 0x123   : > { %v999_v29 = vadd.f32 %v998_v28, %v583_v27 }
 0x126   : > { %v1021_v30 = vpop.f32.mrf.mxu1 }
 0x127   : > { %v1022_v31 = vadd.f32 %v1021_v30, %v999_v29  ;;  %v1044_v33 = vpop.f32.mrf.mxu3 }
 0x129   : > { %v1045_v35 = vadd.f32 %v1044_v33, %v1022_v31 }
 0x12a   : > { %v955_v37 = vpop.f32.mrf.mxu0 }
 0x12b   : > { %1331 = vst [vmem:[%s1920_s10 + $0x28] sm:$0xff] %v1045_v35  ;;  %v956_v38 = vadd.f32 %v955_v37, %v933_v25 }
 0x12d   : > { %v979_v39 = vadd.f32 %v978_v26, %v956_v38 }
 0x12e   : > { %v1001_v40 = vpop.f32.mrf.mxu2 }
 0x12f   : > { %1341 = vst [vmem:[%s1920_s10 + $0x70] sm:$0xff] %v979_v39  ;;  %v1002_v32 = vadd.f32 %v1001_v40, %v583_v27 }
 0x134   : > { %v1067_v41 = vpop.f32.mrf.mxu0 }
 0x135   : > { %v1068_v46 = vadd.f32 %v1067_v41, %v584_v44 }
 0x137   : > { %v1113_v42 = vpop.f32.mrf.mxu2 }
 0x13a   : > { %v1047_v43 = vpop.f32.mrf.mxu3 }
 0x13e   : > { %v1070_v45 = vpop.f32.mrf.mxu0 }
 0x13f   : > { %v1071_v55 = vadd.f32 %v1070_v45, %v584_v44 }
 0x141   : > { %v1024_v47 = vpop.f32.mrf.mxu1  ;;  %v1116_v36 = vpop.f32.mrf.mxu2 }
 0x142   : > { %v1025_v48 = vadd.f32 %v1024_v47, %v1002_v32 }
 0x144   : > { %v1048_v16 = vadd.f32 %v1047_v43, %v1025_v48  ;;  %v1090_v49 = vpop.f32.mrf.mxu3 }
 0x145   : > { %v1091_v50 = vadd.f32 %v1090_v49, %v1068_v46 }
 0x146   : > { %1342 = vst [vmem:[%s1920_s10 + $0x78] sm:$0xff] %v1048_v16 }
 0x147   : > { %v1114_v51 = vadd.f32 %v1113_v42, %v1091_v50 }
 0x149   : > { %1332 = vst [vmem:[%s1920_s10 + $0x30] sm:$0xff] %v1114_v51  ;;  %v1182_v52 = vpop.f32.mrf.mxu0 }
 0x14b   : > { %v1136_v56 = vpop.f32.mrf.mxu1 }
 0x14c   : > { %v1137_v57 = vadd.f32 %v1136_v56, %v585_v53  ;;  %v1159_v60 = vpop.f32.mrf.mxu2 }
 0x14e   : > { %v1160_v61 = vadd.f32 %v1159_v60, %v1137_v57  ;;  %v1093_v62 = vpop.f32.mrf.mxu3 }
 0x14f   : > { %v1094_v63 = vadd.f32 %v1093_v62, %v1071_v55 }
 0x150   : > { %v1183_v0 = vadd.f32 %v1182_v52, %v1160_v61 }
 0x151   : > { %v1117_v1 = vadd.f32 %v1116_v36, %v1094_v63 }
 0x152   : > { %1333 = vst [vmem:[%s1920_s10 + $0x38] sm:$0xff] %v1183_v0 }
 0x153   : > { %v1185_v2 = vpop.f32.mrf.mxu0  ;;  %1343 = vst [vmem:[%s1920_s10 + $0x80] sm:$0xff] %v1117_v1 }
 0x156   : > { %v1139_v6 = vpop.f32.mrf.mxu1  ;;  %v1162_v8 = vpop.f32.mrf.mxu2 }
 0x157   : > { %v1140_v7 = vadd.f32 %v1139_v6, %v585_v53 }
 0x159   : > { %v1163_v54 = vadd.f32 %v1162_v8, %v1140_v7  ;;  %v1205_v59 = vpop.f32.mrf.mxu3 }
 0x15a   : > { %v1206_v10 = vadd.f32 %v1205_v59, %v586_v3 }
 0x15b   : > { %v1186_v9 = vadd.f32 %v1185_v2, %v1163_v54 }
 0x15c   : > { %v1228_v4 = vpop.f32.mrf.mxu0 }
 0x15d   : > { %1344 = vst [vmem:[%s1920_s10 + $0x88] sm:$0xff] %v1186_v9  ;;  %v1229_v12 = vadd.f32 %v1228_v4, %v1206_v10 }
 0x15e   : > { %v1251_v13 = vpop.f32.mrf.mxu1 }
 0x15f   : > { %v1252_v14 = vadd.f32 %v1251_v13, %v1229_v12 }
 0x161   : > { %1334 = vst [vmem:[%s1920_s10 + $0x40] sm:$0xff] %v1252_v14 }
 0x162   : > { %v1208_v11 = vpop.f32.mrf.mxu3 }
 0x163   : > { %v1209_v15 = vadd.f32 %v1208_v11, %v586_v3 }
 0x164   : > { %v1231_v17 = vpop.f32.mrf.mxu0 }
 0x165   : > { %v1232_v34 = vadd.f32 %v1231_v17, %v1209_v15 }
 0x166   : > { %v1254_v19 = vpop.f32.mrf.mxu1 }
 0x167   : > { %v1255_v20 = vadd.f32 %v1254_v19, %v1232_v34 }
 0x169   : > { %1345 = vst [vmem:[%s1920_s10 + $0x90] sm:$0xff] %v1255_v20 }
 0x16a   : > { %v1320_v23 = vpop.f32.mrf.mxu3 }
 0x16c   : > { %v1274_v18 = vpop.f32.mrf.mxu2 }
 0x16d   : > { %v1275_v22 = vadd.f32 %v1274_v18, %v587_v21 }
 0x16e   : > { %v1297_v24 = vpop.f32.mrf.mxu1 }
 0x16f   : > { %v1298_v26 = vadd.f32 %v1297_v24, %v1275_v22 }
 0x171   : > { %v1321_v58 = vadd.f32 %v1320_v23, %v1298_v26 }
 0x172   : > { %v1323_v30 = vpop.f32.mrf.mxu3 }
 0x173   : > { %1336 = vst.msk [vmem:[%s1920_s10 + $0x48] sm:$0xff] %vm1335_vm2, %v1321_v58 }
 0x174   : > { %v1277_v27 = vpop.f32.mrf.mxu2 }
 0x175   : > { %v1278_v28 = vadd.f32 %v1277_v27, %v587_v21 }
 0x176   : > { %v1300_v29 = vpop.f32.mrf.mxu1 }
 0x177   : > { %v1301_v31 = vadd.f32 %v1300_v29, %v1278_v28 }
 0x179   : > { %v1324_v33 = vadd.f32 %v1323_v30, %v1301_v31 }
 0x17b   : > { %1346 = vst.msk [vmem:[%s1920_s10 + $0x98] sm:$0xff] %vm1335_vm2, %v1324_v33 }
 0x17c PF: > { %s13_s12 = sadd.s32 1, %s1476_s12  }
 0x17d   : > { %p10_p4 = scmp.ge.s32.totalorder %s13_s12, 4  }
 0x17f   :  { %12 = sbr.rel (!%p10_p4) target bundleno = 1 (0x1), region = 65 }

// kernel: bilstm_forward.4
= control target key start
LH: loop header
LB: loop body
LE: loop exit
PB: predicated region body
PF: predicated region fallthrough
CT: control target
= control target key end

     0   :  { %s1707_s9 = smov 0   ;;  %s1709_s10 = smov 0   ;;  %s2242_s0 = inlined_call_operand.vmem [shape: f32[2,8,2,1200], index: 0, kind: input, shape index: {}]   ;;  %s2243_s1 = inlined_call_operand.vmem [shape: f32[2,300,1200], index: 1, kind: input, shape index: {}]   ;;  %s2244_s2 = inlined_call_operand.vmem [shape: f32[2,8,2,300], index: 2, kind: output, shape index: {}]  }
   0x1   :  { %s1711_s11 = smov 0   ;;  %s1713_s12 = smov 0  }
   0x2   :  { %s1715_s13 = smov 0  }
   0x3 LB: > { %s21_s14 = sadd.s32 1, %s1678_s11  ;;  %s24_s15 = sadd.s32 1, %s1682_s12  ;;  %s1686_s13 = sphi %s1715_s13, %s12_s13   ;;  %s1682_s12 = sphi %s1713_s12, %s2252_s12   ;;  %s1678_s11 = sphi %s1711_s11, %s2251_s11   ;;  %s1674_s10 = sphi %s1709_s10, %s2250_s10   ;;  %s1670_s9 = sphi %s1707_s9, %s2249_s9  }
   0x4   : > { %p22_p0 = scmp.ge.s32.totalorder %s21_s14, 8  ;;  %p1548_p1 = scmp.ge.s32.totalorder %s1686_s13, 1 }
   0x5   : > { %p166_p2 = scmp.lt.s32.totalorder %s1686_s13, 17 }
   0x6   : > { %s2254_s14 = smov (%p22_p0, %s21_s14), 0  ;;  %s2256_s15 = smov (!%p22_p0, %s24_s15), %s1682_s12 }
   0x7   : > { %p167_p3 = pnand %p1548_p1, %p166_p2  ;;  %p26_p4 = scmp.ge.s32.totalorder %s2256_s15, 2 }
   0x8   : > { %s1549_s16 = sshll.u32 (!%p167_p3), %s1670_s9, 1  ;;  %p213_p5 = scmp.lt.s32.totalorder (!%p167_p3), %s1674_s10, 1 }
   0x9   : > { %s2258_s15 = smov (%p26_p4, %s2256_s15), 0  ;;  %170 = sbr.rel (%p167_p3) target bundleno = 526 (0x20e), region = 28 }
   0xa   : > { %s210_s17 = ssub.s32 (!%p167_p3), 7, %s1549_s16  ;;  %p1554_p7 = scmp.ne.s32.totalorder (!%p167_p3), %s1670_s9, 0 }
   0xb   : > { %s211_s18 = smul.u32 (!%p167_p3), %s1674_s10, %s210_s17 }
   0xd   : > { %s212_s19 = sadd.s32 (!%p167_p3), %s1670_s9, %s211_s18 }
   0xe   : > { %s2260_s10 = smov (!%p213_p5, %s1674_s10), 1  ;;  %p215_p6 = scmp.lt.s32.totalorder %s212_s19, 7 }
   0xf   : > { %s1581_s20 = smul.u32 80, %s2260_s10 }
  0x10   : > { %s1582_s21 = smul.u32 3040, %s2260_s10  ;;  %s2262_s19 = smov (!%p215_p6, %s212_s19), 7 }
  0x11   : > { %s1584_s25 = smul.u32 24, %s2260_s10 }
  0x12   : > { %s1744_s24 = scalar_lea.vmem %s2243_s1, %s1582_s21  ;;  %s1580_s26 = smul.u32 10, %s2262_s19 }
  0x13   : > { %s1583_s27 = smul.u32 3, %s2262_s19 }
  0x14   : > { %s219_s28 = sadd.s32 %s1581_s20, %s1580_s26  ;;  %251 = sbr.rel (%p1554_p7) target bundleno = 30 (0x1e), region = 32 }
  0x15   : > { %s1550_s29 = sshll.u32 %s219_s28, 1  ;;  %s241_s30 = sadd.s32 %s1584_s25, %s1583_s27 }
  0x16   : > { %s1749_s5 = scalar_lea.vmem %s2242_s0, %s1550_s29  ;;  %s1553_s6 = sshll.u32 %s241_s30, 1 }
  0x17   : > { %s1754_s16 = scalar_lea.vmem %s2244_s2, %s1553_s6 }
  0x19   : > { %vm252_vm0 = vcmask 1041408   ;;  %vm253_vm1 = vcmask 1043458   ;;  %vm255_vm2 = vcmask 357380   ;;  %v1688_v0 = vmov 0.0  }
  0x1a   : > { %vm254_vm3 = vmor %vm253_vm1, %vm252_vm0 }
  0x1b   : > { %vm256_vm4 = vmor %vm255_vm2, %vm254_vm3 }
  0x1c   : > { %257 = vst.msk [vmem:[#allocation2] sm:$0x3f] %vm256_vm4, %v1688_v0 }
  0x1d   : > { %258 = vst.msk [vmem:[#allocation3] sm:$0x3f] %vm256_vm4, %v1688_v0 }
  0x1e PF: > { %v413_v1 = vld [vmem:[%s1744_s24 + $0x4b0] sm:$0xff]  ;;  %vm653_vm5 = vcmask 1043456   ;;  %v403_v3 = vld [vmem:[%s1744_s24 + $0x460] sm:$0xff]  ;;  %v414_v12 = vld [vmem:[%s1744_s24 + $0x4b8] sm:$0xff]  ;;  %vm650_vm6 = vcmask 359424   ;;  %vm1301_vm7 = vcmask 1041408  }
  0x1f   : > { %v633_v2 = vld [vmem:[%s1744_s24 + $0xb90] sm:$0xf]  ;;  %684 = vmatpush.msra.mxu0 %v413_v1  ;;  %v623_v4 = vld [vmem:[%s1744_s24 + $0xb40] sm:$0xff]  ;;  %744 = vmatpush.msra.mxu3 %v414_v12  ;;  %v404_v15 = vld [vmem:[%s1744_s24 + $0x468] sm:$0xff]  ;;  %vm1303_vm8 = vcmask 1045508   ;;  %s1689_s9 = smov 84  }
  0x20   : > { %1555 = vmatpush.msk.msra.mxu2 %vm653_vm5, %v633_v2  ;;  %v393_v5 = vld [vmem:[%s1744_s24 + $0x410] sm:$0xff]  ;;  %v563_v8 = vld [vmem:[%s1744_s24 + $0x960] sm:$0xff]  ;;  %v394_v17 = vld [vmem:[%s1744_s24 + $0x418] sm:$0xff]  ;;  %s1690_s10 = smov 124   ;;  %s1691_s17 = smov 40   ;;  %vm1347_vm9 = vcmask 687104  }
  0x21   : > { %v613_v6 = vld [vmem:[%s1744_s24 + $0xaf0] sm:$0xff]  ;;  %685 = vmatpush.msra.mxu0 %v403_v3  ;;  %v383_v9 = vld [vmem:[%s1744_s24 + $0x3c0] sm:$0xff]  ;;  %745 = vmatpush.msra.mxu3 %v404_v15  ;;  %v574_v20 = vld [vmem:[%s1744_s24 + $0x9b8] sm:$0xff]  ;;  %vm1406_vm12 = vcmask 326656   ;;  %vm1413_vm14 = vcmask 1043458   ;;  %vm1415_vm3 = vcmask 357380  }
  0x22   : > { %v573_v7 = vld [vmem:[%s1744_s24 + $0x9b0] sm:$0xff]  ;;  %735 = vmatpush.msra.mxu2 %v623_v4  ;;  %v603_v10 = vld [vmem:[%s1744_s24 + $0xaa0] sm:$0xff]  ;;  %v384_v23 = vld [vmem:[%s1744_s24 + $0x3c8] sm:$0xff] }
  0x23   : > { %704 = vmatpush.msra.mxu1 %v573_v7  ;;  %686 = vmatpush.msra.mxu0 %v393_v5  ;;  %v553_v11 = vld [vmem:[%s1744_s24 + $0x910] sm:$0xff]  ;;  %v543_v16 = vld [vmem:[%s1744_s24 + $0x8c0] sm:$0xff]  ;;  %v564_v24 = vld [vmem:[%s1744_s24 + $0x968] sm:$0xff] }
  0x24   : > { %736 = vmatpush.msra.mxu2 %v613_v6  ;;  %v373_v13 = vld [vmem:[%s1744_s24 + $0x370] sm:$0xff]  ;;  %v363_v18 = vld [vmem:[%s1744_s24 + $0x320] sm:$0xff]  ;;  %746 = vmatpush.msra.mxu3 %v394_v17  ;;  %v374_v27 = vld [vmem:[%s1744_s24 + $0x378] sm:$0xff] }
  0x25   : > { %v593_v14 = vld [vmem:[%s1744_s24 + $0xa50] sm:$0xff]  ;;  %705 = vmatpush.msra.mxu1 %v563_v8  ;;  %687 = vmatpush.msra.mxu0 %v383_v9  ;;  %v583_v19 = vld [vmem:[%s1744_s24 + $0xa00] sm:$0xff]  ;;  %v554_v28 = vld [vmem:[%s1744_s24 + $0x918] sm:$0xff] }
  0x26   : > { %737 = vmatpush.msra.mxu2 %v603_v10  ;;  %v533_v21 = vld [vmem:[%s1744_s24 + $0x870] sm:$0xff]  ;;  %v523_v25 = vld [vmem:[%s1744_s24 + $0x820] sm:$0xff]  ;;  %747 = vmatpush.msra.mxu3 %v384_v23  ;;  %v364_v31 = vld [vmem:[%s1744_s24 + $0x328] sm:$0xff] }
  0x27   : > { %706 = vmatpush.msra.mxu1 %v553_v11  ;;  %688 = vmatpush.msra.mxu0 %v373_v13  ;;  %v353_v22 = vld [vmem:[%s1744_s24 + $0x2d0] sm:$0xff]  ;;  %v343_v26 = vld [vmem:[%s1744_s24 + $0x280] sm:$0xff]  ;;  %v544_v32 = vld [vmem:[%s1744_s24 + $0x8c8] sm:$0xff] }
  0x28   : > { %738 = vmatpush.msra.mxu2 %v593_v14  ;;  %v513_v29 = vld [vmem:[%s1744_s24 + $0x7d0] sm:$0xff]  ;;  %748 = vmatpush.msra.mxu3 %v374_v27  ;;  %v503_v33 = vld [vmem:[%s1744_s24 + $0x780] sm:$0xff]  ;;  %v354_v35 = vld [vmem:[%s1744_s24 + $0x2d8] sm:$0xff] }
  0x29   : > { %707 = vmatpush.msra.mxu1 %v543_v16  ;;  %689 = vmatpush.msra.mxu0 %v363_v18  ;;  %v333_v30 = vld [vmem:[%s1744_s24 + $0x230] sm:$0xff]  ;;  %v323_v34 = vld [vmem:[%s1744_s24 + $0x1e0] sm:$0xff]  ;;  %v534_v36 = vld [vmem:[%s1744_s24 + $0x878] sm:$0xff] }
  0x2a   : > { %739 = vmatpush.msra.mxu2 %v583_v19  ;;  %749 = vmatpush.msra.mxu3 %v364_v31  ;;  %v493_v37 = vld [vmem:[%s1744_s24 + $0x730] sm:$0xff]  ;;  %v344_v39 = vld [vmem:[%s1744_s24 + $0x288] sm:$0xff]  ;;  %v483_v41 = vld [vmem:[%s1744_s24 + $0x6e0] sm:$0xff] }
  0x2b   : > { %708 = vmatpush.msra.mxu1 %v533_v21  ;;  %690 = vmatpush.msra.mxu0 %v353_v22  ;;  %v313_v38 = vld [vmem:[%s1744_s24 + $0x190] sm:$0xff]  ;;  %v524_v40 = vld [vmem:[%s1744_s24 + $0x828] sm:$0xff]  ;;  %v303_v42 = vld [vmem:[%s1744_s24 + $0x140] sm:$0xff] }
  0x2c   : > { %764 = vmatpush.msrb.mxu2 %v574_v20  ;;  %750 = vmatpush.msra.mxu3 %v354_v35  ;;  %v334_v43 = vld [vmem:[%s1744_s24 + $0x238] sm:$0xff]  ;;  %v262_v44 = vld [vmem:[#allocation2] sm:$0x3f]  ;;  %v473_v46 = vld [vmem:[%s1744_s24 + $0x690] sm:$0xff] }
  0x2d   : > { %709 = vmatpush.msra.mxu1 %v523_v25  ;;  %691 = vmatpush.msra.mxu0 %v343_v26  ;;  %v514_v45 = vld [vmem:[%s1744_s24 + $0x7d8] sm:$0xff]  ;;  %644 = vst [vmem:[#allocation1] ss:$4 sm:$0xff] %v262_v44  ;;  %v293_v47 = vld [vmem:[%s1744_s24 + $0xf0] sm:$0xff]  ;;  %v324_v48 = vld [vmem:[%s1744_s24 + $0x1e8] sm:$0xff] }
  0x2e   : > { %765 = vmatpush.msrb.mxu2 %v564_v24  ;;  %751 = vmatpush.msra.mxu3 %v344_v39  ;;  %v504_v49 = vld [vmem:[%s1744_s24 + $0x788] sm:$0xff]  ;;  %v463_v50 = vld [vmem:[%s1744_s24 + $0x640] sm:$0xff]  ;;  %v314_v52 = vld [vmem:[%s1744_s24 + $0x198] sm:$0xff] }
  0x2f   : > { %710 = vmatpush.msra.mxu1 %v513_v29  ;;  %692 = vmatpush.msra.mxu0 %v333_v30  ;;  %v283_v51 = vld [vmem:[%s1744_s24 + $0xa0] sm:$0xff]  ;;  %v494_v53 = vld [vmem:[%s1744_s24 + $0x738] sm:$0xff]  ;;  %v453_v54 = vld [vmem:[%s1744_s24 + $0x5f0] sm:$0xff] }
  0x30   : > { %766 = vmatpush.msrb.mxu2 %v554_v28  ;;  %752 = vmatpush.msra.mxu3 %v334_v43  ;;  %v273_v55 = vld [vmem:[%s1744_s24 + $0x50] sm:$0xff]  ;;  %v304_v56 = vld [vmem:[%s1744_s24 + $0x148] sm:$0xff]  ;;  %v443_v58 = vld [vmem:[%s1744_s24 + $0x5a0] sm:$0xff] }
  0x31   : > { %711 = vmatpush.msra.mxu1 %v503_v33  ;;  %693 = vmatpush.msra.mxu0 %v323_v34  ;;  %v484_v57 = vld [vmem:[%s1744_s24 + $0x6e8] sm:$0xff]  ;;  %v263_v59 = vld [vmem:[%s1744_s24] sm:$0xff]  ;;  %v474_v61 = vld [vmem:[%s1744_s24 + $0x698] sm:$0xff] }
  0x32   : > { %767 = vmatpush.msrb.mxu2 %v544_v32  ;;  %753 = vmatpush.msra.mxu3 %v324_v48  ;;  %v634_v62 = vld [vmem:[%s1744_s24 + $0xb98] sm:$0xf]  ;;  %v433_v63 = vld [vmem:[%s1744_s24 + $0x550] sm:$0xff]  ;;  %v464_v1 = vld [vmem:[%s1744_s24 + $0x648] sm:$0xff] }
  0x33   : > { %712 = vmatpush.msra.mxu1 %v493_v37  ;;  %694 = vmatpush.msra.mxu0 %v313_v38  ;;  %v294_v0 = vld [vmem:[%s1744_s24 + $0xf8] sm:$0xff]  ;;  %v624_v2 = vld [vmem:[%s1744_s24 + $0xb48] sm:$0xff]  ;;  %v423_v3 = vld [vmem:[%s1744_s24 + $0x500] sm:$0xff] }
  0x34   : > { %768 = vmatpush.msrb.mxu2 %v534_v36  ;;  %754 = vmatpush.msra.mxu3 %v314_v52  ;;  %v1816_v60 = vld.sshfl [vmem:[#allocation1 + $0x10] sm:$0xff pattern:$0x73625140]  ;;  %v284_v4 = vld [vmem:[%s1744_s24 + $0xa8] sm:$0xff]  ;;  %v454_v5 = vld [vmem:[%s1744_s24 + $0x5f8] sm:$0xff] }
  0x35   : > { %713 = vmatpush.msra.mxu1 %v483_v41  ;;  %695 = vmatpush.msra.mxu0 %v303_v42  ;;  %v614_v6 = vld [vmem:[%s1744_s24 + $0xaf8] sm:$0xff]  ;;  %v415_v7 = vld [vmem:[%s1744_s24 + $0x4c0] sm:$0xff]  ;;  %v444_v9 = vld [vmem:[%s1744_s24 + $0x5a8] sm:$0xff] }
  0x36   : > { %769 = vmatpush.msrb.mxu2 %v524_v40  ;;  %755 = vmatpush.msra.mxu3 %v304_v56  ;;  %v274_v8 = vld [vmem:[%s1744_s24 + $0x58] sm:$0xff]  ;;  %v604_v10 = vld [vmem:[%s1744_s24 + $0xaa8] sm:$0xff]  ;;  %v405_v11 = vld [vmem:[%s1744_s24 + $0x470] sm:$0xff] }
  0x37   : > { %714 = vmatpush.msra.mxu1 %v473_v46  ;;  %696 = vmatpush.msra.mxu0 %v293_v47  ;;  %v264_v12 = vld [vmem:[%s1744_s24 + $0x8] sm:$0xff]  ;;  %v434_v13 = vld [vmem:[%s1744_s24 + $0x558] sm:$0xff]  ;;  %v1839_v15 = vld.sshfl [vmem:[#allocation1] sm:$0xff pattern:$0x73625140] }
  0x38   : > { %770 = vmatpush.msrb.mxu2 %v514_v45  ;;  %756 = vmatpush.msra.mxu3 %v294_v0  ;;  %v594_v14 = vld [vmem:[%s1744_s24 + $0xa58] sm:$0xff]  ;;  %v424_v16 = vld [vmem:[%s1744_s24 + $0x508] sm:$0xff]  ;;  %v395_v19 = vld [vmem:[%s1744_s24 + $0x420] sm:$0xff] }
  0x39   : > { %715 = vmatpush.msra.mxu1 %v463_v50  ;;  %697 = vmatpush.msra.mxu0 %v283_v51  ;;  %v584_v17 = vld [vmem:[%s1744_s24 + $0xa08] sm:$0xff]  ;;  %v635_v20 = vld [vmem:[%s1744_s24 + $0xba0] sm:$0xf]  ;;  %v385_v23 = vld [vmem:[%s1744_s24 + $0x3d0] sm:$0xff] }
  0x3a   : > { %771 = vmatpush.msrb.mxu2 %v504_v49  ;;  %757 = vmatpush.msra.mxu3 %v284_v4  ;;  %v1843_v18 = vld.sshfl [vmem:[#allocation1 + $0x8] sm:$0xff pattern:$0x73625140]  ;;  %v575_v22 = vld [vmem:[%s1744_s24 + $0x9c0] sm:$0xff]  ;;  %v625_v24 = vld [vmem:[%s1744_s24 + $0xb50] sm:$0xff] }
  0x3b   : > { %716 = vmatpush.msra.mxu1 %v453_v54  ;;  %698 = vmatpush.msra.mxu0 %v273_v55  ;;  %v416_v21 = vld [vmem:[%s1744_s24 + $0x4c8] sm:$0xff]  ;;  %v406_v25 = vld [vmem:[%s1744_s24 + $0x478] sm:$0xff]  ;;  %v565_v26 = vld [vmem:[%s1744_s24 + $0x970] sm:$0xff] }
  0x3c   : > { %772 = vmatpush.msrb.mxu2 %v494_v53  ;;  %758 = vmatpush.msra.mxu3 %v274_v8  ;;  %v375_v27 = vld [vmem:[%s1744_s24 + $0x380] sm:$0xff]  ;;  %v396_v29 = vld [vmem:[%s1744_s24 + $0x428] sm:$0xff]  ;;  %v365_v31 = vld [vmem:[%s1744_s24 + $0x330] sm:$0xff] }
  0x3d   : > { %717 = vmatpush.msra.mxu1 %v443_v58  ;;  %699 = vmatpush.msra.mxu0 %v263_v59  ;;  %v615_v28 = vld [vmem:[%s1744_s24 + $0xb00] sm:$0xff]  ;;  %v605_v32 = vld [vmem:[%s1744_s24 + $0xab0] sm:$0xff]  ;;  %v386_v33 = vld [vmem:[%s1744_s24 + $0x3d8] sm:$0xff] }
  0x3e   : > { %773 = vmatpush.msrb.mxu2 %v484_v57  ;;  %759 = vmatpush.msra.mxu3 %v264_v12  ;;  %v555_v30 = vld [vmem:[%s1744_s24 + $0x920] sm:$0xff]  ;;  %v545_v34 = vld [vmem:[%s1744_s24 + $0x8d0] sm:$0xff]  ;;  %v376_v37 = vld [vmem:[%s1744_s24 + $0x388] sm:$0xff] }
  0x3f   : > { %1556 = vmatmul.msk.f32.vlgmr.msra.gmra.mxu2 %vm650_vm6, %v1816_v60  ;;  %1557 = vmatpush.msk.msrb.mxu0 %vm653_vm5, %v634_v62  ;;  %v355_v35 = vld [vmem:[%s1744_s24 + $0x2e0] sm:$0xff]  ;;  %v345_v39 = vld [vmem:[%s1744_s24 + $0x290] sm:$0xff]  ;;  %v366_v41 = vld [vmem:[%s1744_s24 + $0x338] sm:$0xff] }
  0x40   : > { %774 = vmatpush.msrb.mxu2 %v474_v61  ;;  %718 = vmatpush.msra.mxu1 %v433_v63  ;;  %v595_v36 = vld [vmem:[%s1744_s24 + $0xa60] sm:$0xff]  ;;  %v585_v40 = vld [vmem:[%s1744_s24 + $0xa10] sm:$0xff]  ;;  %v576_v43 = vld [vmem:[%s1744_s24 + $0x9c8] sm:$0xff] }
  0x41   : > { %795 = vmatpush.msrb.mxu0 %v624_v2  ;;  %760 = vmatmul.f32.vlgmr.msra.gmra.mxu3 %v1839_v15  ;;  %v535_v38 = vld [vmem:[%s1744_s24 + $0x880] sm:$0xff]  ;;  %v525_v42 = vld [vmem:[%s1744_s24 + $0x830] sm:$0xff]  ;;  %v356_v45 = vld [vmem:[%s1744_s24 + $0x2e8] sm:$0xff] }
  0x42   : > { %775 = vmatpush.msrb.mxu2 %v464_v1  ;;  %719 = vmatpush.msra.mxu1 %v423_v3  ;;  %v335_v44 = vld [vmem:[%s1744_s24 + $0x240] sm:$0xff]  ;;  %v566_v47 = vld [vmem:[%s1744_s24 + $0x978] sm:$0xff]  ;;  %v325_v48 = vld [vmem:[%s1744_s24 + $0x1f0] sm:$0xff] }
  0x43   : > { %796 = vmatpush.msrb.mxu0 %v614_v6  ;;  %824 = vmatpush.msrb.mxu3 %v575_v22  ;;  %v515_v46 = vld [vmem:[%s1744_s24 + $0x7e0] sm:$0xff]  ;;  %v346_v49 = vld [vmem:[%s1744_s24 + $0x298] sm:$0xff]  ;;  %v505_v50 = vld [vmem:[%s1744_s24 + $0x790] sm:$0xff] }
  0x44   : > { %776 = vmatpush.msrb.mxu2 %v454_v5  ;;  %804 = vmatpush.msrb.mxu1 %v415_v7  ;;  %v556_v51 = vld [vmem:[%s1744_s24 + $0x928] sm:$0xff]  ;;  %v315_v52 = vld [vmem:[%s1744_s24 + $0x1a0] sm:$0xff]  ;;  %v546_v55 = vld [vmem:[%s1744_s24 + $0x8d8] sm:$0xff] }
  0x45   : > { %797 = vmatpush.msrb.mxu0 %v604_v10  ;;  %825 = vmatpush.msrb.mxu3 %v565_v26  ;;  %v336_v53 = vld [vmem:[%s1744_s24 + $0x248] sm:$0xff]  ;;  %v495_v54 = vld [vmem:[%s1744_s24 + $0x740] sm:$0xff]  ;;  %v305_v56 = vld [vmem:[%s1744_s24 + $0x150] sm:$0xff] }
  0x46   : > { %777 = vmatpush.msrb.mxu2 %v444_v9  ;;  %805 = vmatpush.msrb.mxu1 %v405_v11  ;;  %v326_v57 = vld [vmem:[%s1744_s24 + $0x1f8] sm:$0xff]  ;;  %v485_v58 = vld [vmem:[%s1744_s24 + $0x6f0] sm:$0xff]  ;;  %v536_v59 = vld [vmem:[%s1744_s24 + $0x888] sm:$0xff] }
  0x47   : > { %798 = vmatpush.msrb.mxu0 %v594_v14  ;;  %720 = vmatmul.f32.vlgmr.msra.gmra.mxu1 %v1843_v18  ;;  %v295_v61 = vld [vmem:[%s1744_s24 + $0x100] sm:$0xff]  ;;  %v316_v62 = vld [vmem:[%s1744_s24 + $0x1a8] sm:$0xff]  ;;  %v526_v0 = vld [vmem:[%s1744_s24 + $0x838] sm:$0xff] }
  0x48   : > { %778 = vmatpush.msrb.mxu2 %v434_v13  ;;  %700 = vmatmul.f32.vlgmr.msra.gmra.mxu0 %v1839_v15  ;;  %v475_v63 = vld [vmem:[%s1744_s24 + $0x6a0] sm:$0xff]  ;;  %v285_v1 = vld [vmem:[%s1744_s24 + $0xb0] sm:$0xff]  ;;  %v306_v2 = vld [vmem:[%s1744_s24 + $0x158] sm:$0xff] }
  0x49   : > { %799 = vmatpush.msrb.mxu0 %v584_v17  ;;  %806 = vmatpush.msrb.mxu1 %v395_v19  ;;  %v465_v3 = vld [vmem:[%s1744_s24 + $0x650] sm:$0xff]  ;;  %v516_v4 = vld [vmem:[%s1744_s24 + $0x7e8] sm:$0xff]  ;;  %v275_v5 = vld [vmem:[%s1744_s24 + $0x60] sm:$0xff] }
  0x4a   : > { %779 = vmatpush.msrb.mxu2 %v424_v16  ;;  %826 = vmatpush.msrb.mxu3 %v555_v30  ;;  %v296_v6 = vld [vmem:[%s1744_s24 + $0x108] sm:$0xff]  ;;  %v455_v7 = vld [vmem:[%s1744_s24 + $0x600] sm:$0xff]  ;;  %v506_v8 = vld [vmem:[%s1744_s24 + $0x798] sm:$0xff] }
  0x4b   : > { %780 = vmatmul.f32.vlgmr.msrb.gmra.mxu2 %v1843_v18  ;;  %1559 = vmatpush.msk.msra.mxu0 %vm653_vm5, %v635_v20  ;;  %v265_v9 = vld [vmem:[%s1744_s24 + $0x10] sm:$0xff]  ;;  %v286_v10 = vld [vmem:[%s1744_s24 + $0xb8] sm:$0xff]  ;;  %v496_v12 = vld [vmem:[%s1744_s24 + $0x748] sm:$0xff] }
  0x4c   : > { %864 = vmatpush.msra.mxu2 %v416_v21  ;;  %807 = vmatpush.msrb.mxu1 %v385_v23  ;;  %v445_v11 = vld [vmem:[%s1744_s24 + $0x5b0] sm:$0xff]  ;;  %v636_v13 = vld [vmem:[%s1744_s24 + $0xba8] sm:$0xf]  ;;  %v435_v16 = vld [vmem:[%s1744_s24 + $0x560] sm:$0xff] }
  0x4d   : > { %855 = vmatpush.msra.mxu0 %v625_v24  ;;  %827 = vmatpush.msrb.mxu3 %v545_v34  ;;  %v276_v14 = vld [vmem:[%s1744_s24 + $0x68] sm:$0xff]  ;;  %v486_v17 = vld [vmem:[%s1744_s24 + $0x6f8] sm:$0xff]  ;;  %v425_v21 = vld [vmem:[%s1744_s24 + $0x510] sm:$0xff] }
  0x4e   : > { %865 = vmatpush.msra.mxu2 %v406_v25  ;;  %808 = vmatpush.msrb.mxu1 %v375_v27  ;;  %v626_v19 = vld [vmem:[%s1744_s24 + $0xb58] sm:$0xff]  ;;  %v476_v22 = vld [vmem:[%s1744_s24 + $0x6a8] sm:$0xff]  ;;  %v637_v24 = vld [vmem:[%s1744_s24 + $0xbb0] sm:$0xf] }
  0x4f   : > { %856 = vmatpush.msra.mxu0 %v615_v28  ;;  %828 = vmatpush.msrb.mxu3 %v535_v38  ;;  %v266_v20 = vld [vmem:[%s1744_s24 + $0x18] sm:$0xff]  ;;  %v616_v23 = vld [vmem:[%s1744_s24 + $0xb08] sm:$0xff]  ;;  %v417_v25 = vld [vmem:[%s1744_s24 + $0x4d0] sm:$0xff] }
  0x50   : > { %866 = vmatpush.msra.mxu2 %v396_v29  ;;  %809 = vmatpush.msrb.mxu1 %v365_v31  ;;  %v466_v26 = vld [vmem:[%s1744_s24 + $0x658] sm:$0xff]  ;;  %v627_v28 = vld [vmem:[%s1744_s24 + $0xb60] sm:$0xff]  ;;  %v456_v30 = vld [vmem:[%s1744_s24 + $0x608] sm:$0xff] }
  0x51   : > { %857 = vmatpush.msra.mxu0 %v605_v32  ;;  %829 = vmatpush.msrb.mxu3 %v525_v42  ;;  %v606_v27 = vld [vmem:[%s1744_s24 + $0xab8] sm:$0xff]  ;;  %v407_v29 = vld [vmem:[%s1744_s24 + $0x480] sm:$0xff]  ;;  %v596_v31 = vld [vmem:[%s1744_s24 + $0xa68] sm:$0xff] }
  0x52   : > { %867 = vmatpush.msra.mxu2 %v386_v33  ;;  %1558 = vmatmul.msk.f32.vlgmr.msrb.gmra.mxu0 %vm650_vm6, %v1816_v60  ;;  %v617_v32 = vld [vmem:[%s1744_s24 + $0xb10] sm:$0xff]  ;;  %v446_v34 = vld [vmem:[%s1744_s24 + $0x5b8] sm:$0xff]  ;;  %v567_v42 = vld [vmem:[%s1744_s24 + $0x980] sm:$0xff] }
  0x53   : > { %810 = vmatpush.msrb.mxu1 %v355_v35  ;;  %858 = vmatpush.msra.mxu0 %v595_v36  ;;  %v397_v33 = vld [vmem:[%s1744_s24 + $0x430] sm:$0xff]  ;;  %v586_v35 = vld [vmem:[%s1744_s24 + $0xa18] sm:$0xff]  ;;  %v607_v36 = vld [vmem:[%s1744_s24 + $0xac0] sm:$0xff] }
  0x54   : > { %868 = vmatpush.msra.mxu2 %v376_v37  ;;  %830 = vmatpush.msrb.mxu3 %v515_v46  ;;  %v387_v37 = vld [vmem:[%s1744_s24 + $0x3e0] sm:$0xff]  ;;  %v577_v38 = vld [vmem:[%s1744_s24 + $0x9d0] sm:$0xff]  ;;  %vm1414_vm2 = vmor %vm1413_vm14, %vm1301_vm7 }
  0x55   : > { %811 = vmatpush.msrb.mxu1 %v345_v39  ;;  %859 = vmatpush.msra.mxu0 %v585_v40  ;;  %v436_v39 = vld [vmem:[%s1744_s24 + $0x568] sm:$0xff]  ;;  %v597_v40 = vld [vmem:[%s1744_s24 + $0xa70] sm:$0xff] }
  0x56   : > { %869 = vmatpush.msra.mxu2 %v366_v41  ;;  %831 = vmatpush.msrb.mxu3 %v505_v50  ;;  %v377_v41 = vld [vmem:[%s1744_s24 + $0x390] sm:$0xff]  ;;  %v547_v50 = vld [vmem:[%s1744_s24 + $0x8e0] sm:$0xff] }
  0x57   : > { %884 = vmatpush.msrb.mxu0 %v576_v43  ;;  %812 = vmatpush.msrb.mxu1 %v335_v44  ;;  %v426_v43 = vld [vmem:[%s1744_s24 + $0x518] sm:$0xff]  ;;  %v587_v44 = vld [vmem:[%s1744_s24 + $0xa20] sm:$0xff]  ;;  %v557_v46 = vld [vmem:[%s1744_s24 + $0x930] sm:$0xff] }
  0x58   : > { %870 = vmatpush.msra.mxu2 %v356_v45  ;;  %832 = vmatpush.msrb.mxu3 %v495_v54  ;;  %v367_v45 = vld [vmem:[%s1744_s24 + $0x340] sm:$0xff]  ;;  %v537_v54 = vld [vmem:[%s1744_s24 + $0x890] sm:$0xff] }
  0x59   : > { %885 = vmatpush.msrb.mxu0 %v566_v47  ;;  %813 = vmatpush.msrb.mxu1 %v325_v48  ;;  %v418_v47 = vld [vmem:[%s1744_s24 + $0x4d8] sm:$0xff] }
  0x5a   : > { %871 = vmatpush.msra.mxu2 %v346_v49  ;;  %833 = vmatpush.msrb.mxu3 %v485_v58  ;;  %v578_v48 = vld [vmem:[%s1744_s24 + $0x9d8] sm:$0xff]  ;;  %v357_v49 = vld [vmem:[%s1744_s24 + $0x2f0] sm:$0xff]  ;;  %v527_v58 = vld [vmem:[%s1744_s24 + $0x840] sm:$0xff] }
  0x5b   : > { %886 = vmatpush.msrb.mxu0 %v556_v51  ;;  %814 = vmatpush.msrb.mxu1 %v315_v52  ;;  %v408_v51 = vld [vmem:[%s1744_s24 + $0x488] sm:$0xff] }
  0x5c   : > { %872 = vmatpush.msra.mxu2 %v336_v53  ;;  %834 = vmatpush.msrb.mxu3 %v475_v63  ;;  %v568_v52 = vld [vmem:[%s1744_s24 + $0x988] sm:$0xff]  ;;  %v347_v53 = vld [vmem:[%s1744_s24 + $0x2a0] sm:$0xff]  ;;  %v517_v63 = vld [vmem:[%s1744_s24 + $0x7f0] sm:$0xff] }
  0x5d   : > { %887 = vmatpush.msrb.mxu0 %v546_v55  ;;  %815 = vmatpush.msrb.mxu1 %v305_v56  ;;  %v398_v55 = vld [vmem:[%s1744_s24 + $0x438] sm:$0xff] }
  0x5e   : > { %873 = vmatpush.msra.mxu2 %v326_v57  ;;  %835 = vmatpush.msrb.mxu3 %v465_v3  ;;  %v558_v56 = vld [vmem:[%s1744_s24 + $0x938] sm:$0xff]  ;;  %v337_v57 = vld [vmem:[%s1744_s24 + $0x250] sm:$0xff]  ;;  %v507_v3 = vld [vmem:[%s1744_s24 + $0x7a0] sm:$0xff] }
  0x5f   : > { %888 = vmatpush.msrb.mxu0 %v536_v59  ;;  %816 = vmatpush.msrb.mxu1 %v295_v61  ;;  %v388_v59 = vld [vmem:[%s1744_s24 + $0x3e8] sm:$0xff] }
  0x60   : > { %874 = vmatpush.msra.mxu2 %v316_v62  ;;  %836 = vmatpush.msrb.mxu3 %v455_v7  ;;  %v548_v61 = vld [vmem:[%s1744_s24 + $0x8e8] sm:$0xff]  ;;  %v327_v62 = vld [vmem:[%s1744_s24 + $0x200] sm:$0xff]  ;;  %v497_v7 = vld [vmem:[%s1744_s24 + $0x750] sm:$0xff] }
  0x61   : > { %889 = vmatpush.msrb.mxu0 %v526_v0  ;;  %817 = vmatpush.msrb.mxu1 %v285_v1  ;;  %v378_v0 = vld [vmem:[%s1744_s24 + $0x398] sm:$0xff] }
  0x62   : > { %875 = vmatpush.msra.mxu2 %v306_v2  ;;  %837 = vmatpush.msrb.mxu3 %v445_v11  ;;  %v538_v1 = vld [vmem:[%s1744_s24 + $0x898] sm:$0xff]  ;;  %v317_v2 = vld [vmem:[%s1744_s24 + $0x1b0] sm:$0xff]  ;;  %v487_v11 = vld [vmem:[%s1744_s24 + $0x700] sm:$0xff] }
  0x63   : > { %890 = vmatpush.msrb.mxu0 %v516_v4  ;;  %818 = vmatpush.msrb.mxu1 %v275_v5  ;;  %v368_v4 = vld [vmem:[%s1744_s24 + $0x348] sm:$0xff] }
  0x64   : > { %876 = vmatpush.msra.mxu2 %v296_v6  ;;  %838 = vmatpush.msrb.mxu3 %v435_v16  ;;  %v528_v5 = vld [vmem:[%s1744_s24 + $0x848] sm:$0xff]  ;;  %v307_v6 = vld [vmem:[%s1744_s24 + $0x160] sm:$0xff]  ;;  %v477_v16 = vld [vmem:[%s1744_s24 + $0x6b0] sm:$0xff] }
  0x65   : > { %891 = vmatpush.msrb.mxu0 %v506_v8  ;;  %819 = vmatpush.msrb.mxu1 %v265_v9  ;;  %v358_v8 = vld [vmem:[%s1744_s24 + $0x2f8] sm:$0xff] }
  0x66   : > { %877 = vmatpush.msra.mxu2 %v286_v10  ;;  %839 = vmatpush.msrb.mxu3 %v425_v21  ;;  %v518_v9 = vld [vmem:[%s1744_s24 + $0x7f8] sm:$0xff]  ;;  %v297_v10 = vld [vmem:[%s1744_s24 + $0x110] sm:$0xff]  ;;  %v467_v21 = vld [vmem:[%s1744_s24 + $0x660] sm:$0xff] }
  0x67   : > { %892 = vmatpush.msrb.mxu0 %v496_v12  ;;  %1561 = vmatpush.msk.msra.mxu1 %vm653_vm5, %v636_v13  ;;  %v348_v12 = vld [vmem:[%s1744_s24 + $0x2a8] sm:$0xff] }
  0x68   : > { %878 = vmatpush.msra.mxu2 %v276_v14  ;;  %924 = vmatpush.msra.mxu3 %v417_v25  ;;  %v508_v13 = vld [vmem:[%s1744_s24 + $0x7a8] sm:$0xff]  ;;  %v287_v14 = vld [vmem:[%s1744_s24 + $0xc0] sm:$0xff]  ;;  %v457_v25 = vld [vmem:[%s1744_s24 + $0x610] sm:$0xff] }
  0x69   : > { %893 = vmatpush.msrb.mxu0 %v486_v17  ;;  %915 = vmatpush.msra.mxu1 %v626_v19  ;;  %v338_v17 = vld [vmem:[%s1744_s24 + $0x258] sm:$0xff] }
  0x6a   : > { %879 = vmatpush.msra.mxu2 %v266_v20  ;;  %1560 = vmatmul.msk.f32.vlgmr.msra.gmra.mxu0 %vm650_vm6, %v1816_v60  ;;  %v498_v19 = vld [vmem:[%s1744_s24 + $0x758] sm:$0xff]  ;;  %v277_v20 = vld [vmem:[%s1744_s24 + $0x70] sm:$0xff] }
  0x6b   : > { %894 = vmatpush.msrb.mxu0 %v476_v22  ;;  %916 = vmatpush.msra.mxu1 %v616_v23  ;;  %v328_v22 = vld [vmem:[%s1744_s24 + $0x208] sm:$0xff] }
  0x6c   : > { %1563 = vmatpush.msk.msrb.mxu2 %vm653_vm5, %v637_v24  ;;  %925 = vmatpush.msra.mxu3 %v407_v29  ;;  %v488_v23 = vld [vmem:[%s1744_s24 + $0x708] sm:$0xff]  ;;  %v267_v24 = vld [vmem:[%s1744_s24 + $0x20] sm:$0xff] }
  0x6d   : > { %895 = vmatpush.msrb.mxu0 %v466_v26  ;;  %917 = vmatpush.msra.mxu1 %v606_v27  ;;  %v318_v26 = vld [vmem:[%s1744_s24 + $0x1b8] sm:$0xff]  ;;  %v447_v29 = vld [vmem:[%s1744_s24 + $0x5c0] sm:$0xff] }
  0x6e   : > { %975 = vmatpush.msrb.mxu2 %v627_v28  ;;  %820 = vmatmul.f32.vlgmr.msrb.gmra.mxu1 %v1839_v15  ;;  %v478_v27 = vld [vmem:[%s1744_s24 + $0x6b8] sm:$0xff] }
  0x6f   : > { %896 = vmatpush.msrb.mxu0 %v456_v30  ;;  %918 = vmatpush.msra.mxu1 %v596_v31  ;;  %v638_v28 = vld [vmem:[%s1744_s24 + $0xbb8] sm:$0xf]  ;;  %v308_v30 = vld [vmem:[%s1744_s24 + $0x168] sm:$0xff] }
  0x70   : > { %976 = vmatpush.msrb.mxu2 %v617_v32  ;;  %840 = vmatmul.f32.vlgmr.msrb.gmra.mxu3 %v1843_v18  ;;  %v468_v31 = vld [vmem:[%s1744_s24 + $0x668] sm:$0xff] }
  0x71   : > { %880 = vmatmul.f32.vlgmr.msra.gmra.mxu2 %v1839_v15  ;;  %926 = vmatpush.msra.mxu3 %v397_v33  ;;  %v628_v32 = vld [vmem:[%s1744_s24 + $0xb68] sm:$0xff]  ;;  %v437_v33 = vld [vmem:[%s1744_s24 + $0x570] sm:$0xff] }
  0x72   : > { %897 = vmatpush.msrb.mxu0 %v446_v34  ;;  %919 = vmatpush.msra.mxu1 %v586_v35  ;;  %v298_v34 = vld [vmem:[%s1744_s24 + $0x118] sm:$0xff] }
  0x73   : > { %977 = vmatpush.msrb.mxu2 %v607_v36  ;;  %927 = vmatpush.msra.mxu3 %v387_v37  ;;  %v458_v35 = vld [vmem:[%s1744_s24 + $0x618] sm:$0xff]  ;;  %v427_v37 = vld [vmem:[%s1744_s24 + $0x520] sm:$0xff] }
  0x74   : > { %944 = vmatpush.msrb.mxu1 %v577_v38  ;;  %898 = vmatpush.msrb.mxu0 %v436_v39  ;;  %v618_v36 = vld [vmem:[%s1744_s24 + $0xb18] sm:$0xff]  ;;  %v288_v38 = vld [vmem:[%s1744_s24 + $0xc8] sm:$0xff] }
  0x75   : > { %978 = vmatpush.msrb.mxu2 %v597_v40  ;;  %928 = vmatpush.msra.mxu3 %v377_v41  ;;  %v448_v39 = vld [vmem:[%s1744_s24 + $0x5c8] sm:$0xff]  ;;  %v419_v41 = vld [vmem:[%s1744_s24 + $0x4e0] sm:$0xff] }
  0x76   : > { %945 = vmatpush.msrb.mxu1 %v567_v42  ;;  %899 = vmatpush.msrb.mxu0 %v426_v43  ;;  %v608_v40 = vld [vmem:[%s1744_s24 + $0xac8] sm:$0xff]  ;;  %v278_v42 = vld [vmem:[%s1744_s24 + $0x78] sm:$0xff] }
  0x77   : > { %979 = vmatpush.msrb.mxu2 %v587_v44  ;;  %900 = vmatmul.f32.vlgmr.msrb.gmra.mxu0 %v1843_v18  ;;  %v438_v43 = vld [vmem:[%s1744_s24 + $0x578] sm:$0xff] }
  0x78   : > { %929 = vmatpush.msra.mxu3 %v367_v45  ;;  %946 = vmatpush.msrb.mxu1 %v557_v46  ;;  %v598_v44 = vld [vmem:[%s1744_s24 + $0xa78] sm:$0xff]  ;;  %v409_v45 = vld [vmem:[%s1744_s24 + $0x490] sm:$0xff]  ;;  %v268_v46 = vld [vmem:[%s1744_s24 + $0x28] sm:$0xff] }
  0x79   : > { %984 = vmatpush.msra.mxu0 %v418_v47  ;;  %1004 = vmatpush.msra.mxu2 %v578_v48  ;;  %v428_v47 = vld [vmem:[%s1744_s24 + $0x528] sm:$0xff] }
  0x7a   : > { %1562 = vmatmul.msk.f32.vlgmr.msra.gmra.mxu1 %vm650_vm6, %v1816_v60  ;;  %930 = vmatpush.msra.mxu3 %v357_v49  ;;  %v588_v48 = vld [vmem:[%s1744_s24 + $0xa28] sm:$0xff]  ;;  %v399_v49 = vld [vmem:[%s1744_s24 + $0x440] sm:$0xff] }
  0x7b   : > { %947 = vmatpush.msrb.mxu1 %v547_v50  ;;  %985 = vmatpush.msra.mxu0 %v408_v51  ;;  %v639_v50 = vld [vmem:[%s1744_s24 + $0xbc0] sm:$0xf]  ;;  %v420_v51 = vld [vmem:[%s1744_s24 + $0x4e8] sm:$0xff] }
  0x7c   : > { %1005 = vmatpush.msra.mxu2 %v568_v52  ;;  %931 = vmatpush.msra.mxu3 %v347_v53  ;;  %v579_v52 = vld [vmem:[%s1744_s24 + $0x9e0] sm:$0xff]  ;;  %v389_v53 = vld [vmem:[%s1744_s24 + $0x3f0] sm:$0xff] }
  0x7d   : > { %948 = vmatpush.msrb.mxu1 %v537_v54  ;;  %986 = vmatpush.msra.mxu0 %v398_v55  ;;  %v629_v54 = vld [vmem:[%s1744_s24 + $0xb70] sm:$0xff]  ;;  %v410_v55 = vld [vmem:[%s1744_s24 + $0x498] sm:$0xff] }
  0x7e   : > { %1006 = vmatpush.msra.mxu2 %v558_v56  ;;  %932 = vmatpush.msra.mxu3 %v337_v57  ;;  %v569_v56 = vld [vmem:[%s1744_s24 + $0x990] sm:$0xff]  ;;  %v379_v57 = vld [vmem:[%s1744_s24 + $0x3a0] sm:$0xff] }
  0x7f   : > { %949 = vmatpush.msrb.mxu1 %v527_v58  ;;  %987 = vmatpush.msra.mxu0 %v388_v59  ;;  %v619_v58 = vld [vmem:[%s1744_s24 + $0xb20] sm:$0xff]  ;;  %v400_v59 = vld [vmem:[%s1744_s24 + $0x448] sm:$0xff] }
  0x80   : > { %1007 = vmatpush.msra.mxu2 %v548_v61  ;;  %933 = vmatpush.msra.mxu3 %v327_v62  ;;  %v559_v61 = vld [vmem:[%s1744_s24 + $0x940] sm:$0xff]  ;;  %v369_v62 = vld [vmem:[%s1744_s24 + $0x350] sm:$0xff] }
  0x81   : > { %950 = vmatpush.msrb.mxu1 %v517_v63  ;;  %988 = vmatpush.msra.mxu0 %v378_v0  ;;  %v390_v63 = vld [vmem:[%s1744_s24 + $0x3f8] sm:$0xff]  ;;  %v549_v0 = vld [vmem:[%s1744_s24 + $0x8f0] sm:$0xff] }
  0x82   : > { %1008 = vmatpush.msra.mxu2 %v538_v1  ;;  %934 = vmatpush.msra.mxu3 %v317_v2  ;;  %v359_v1 = vld [vmem:[%s1744_s24 + $0x300] sm:$0xff] }
  0x83   : > { %951 = vmatpush.msrb.mxu1 %v507_v3  ;;  %989 = vmatpush.msra.mxu0 %v368_v4  ;;  %v599_v2 = vld [vmem:[%s1744_s24 + $0xa80] sm:$0xff]  ;;  %v380_v3 = vld [vmem:[%s1744_s24 + $0x3a8] sm:$0xff] }
  0x84   : > { %1009 = vmatpush.msra.mxu2 %v528_v5  ;;  %935 = vmatpush.msra.mxu3 %v307_v6  ;;  %v539_v4 = vld [vmem:[%s1744_s24 + $0x8a0] sm:$0xff]  ;;  %v349_v5 = vld [vmem:[%s1744_s24 + $0x2b0] sm:$0xff] }
  0x85   : > { %952 = vmatpush.msrb.mxu1 %v497_v7  ;;  %990 = vmatpush.msra.mxu0 %v358_v8  ;;  %v589_v6 = vld [vmem:[%s1744_s24 + $0xa30] sm:$0xff]  ;;  %v370_v7 = vld [vmem:[%s1744_s24 + $0x358] sm:$0xff] }
  0x86   : > { %1010 = vmatpush.msra.mxu2 %v518_v9  ;;  %936 = vmatpush.msra.mxu3 %v297_v10  ;;  %v529_v8 = vld [vmem:[%s1744_s24 + $0x850] sm:$0xff]  ;;  %v580_v9 = vld [vmem:[%s1744_s24 + $0x9e8] sm:$0xff]  ;;  %v339_v10 = vld [vmem:[%s1744_s24 + $0x260] sm:$0xff] }
  0x87   : > { %953 = vmatpush.msrb.mxu1 %v487_v11  ;;  %991 = vmatpush.msra.mxu0 %v348_v12  ;;  %v360_v11 = vld [vmem:[%s1744_s24 + $0x308] sm:$0xff]  ;;  %v519_v12 = vld [vmem:[%s1744_s24 + $0x800] sm:$0xff] }
  0x88   : > { %1011 = vmatpush.msra.mxu2 %v508_v13  ;;  %937 = vmatpush.msra.mxu3 %v287_v14  ;;  %v570_v13 = vld [vmem:[%s1744_s24 + $0x998] sm:$0xff]  ;;  %v329_v14 = vld [vmem:[%s1744_s24 + $0x210] sm:$0xff] }
  0x89   : > { %954 = vmatpush.msrb.mxu1 %v477_v16  ;;  %992 = vmatpush.msra.mxu0 %v338_v17  ;;  %v350_v16 = vld [vmem:[%s1744_s24 + $0x2b8] sm:$0xff]  ;;  %v509_v17 = vld [vmem:[%s1744_s24 + $0x7b0] sm:$0xff] }
  0x8a   : > { %1012 = vmatpush.msra.mxu2 %v498_v19  ;;  %938 = vmatpush.msra.mxu3 %v277_v20  ;;  %v560_v19 = vld [vmem:[%s1744_s24 + $0x948] sm:$0xff]  ;;  %v319_v20 = vld [vmem:[%s1744_s24 + $0x1c0] sm:$0xff] }
  0x8b   : > { %955 = vmatpush.msrb.mxu1 %v467_v21  ;;  %993 = vmatpush.msra.mxu0 %v328_v22  ;;  %v340_v21 = vld [vmem:[%s1744_s24 + $0x268] sm:$0xff]  ;;  %v499_v22 = vld [vmem:[%s1744_s24 + $0x760] sm:$0xff] }
  0x8c   : > { %1013 = vmatpush.msra.mxu2 %v488_v23  ;;  %939 = vmatpush.msra.mxu3 %v267_v24  ;;  %v550_v23 = vld [vmem:[%s1744_s24 + $0x8f8] sm:$0xff]  ;;  %v309_v24 = vld [vmem:[%s1744_s24 + $0x170] sm:$0xff] }
  0x8d   : > { %956 = vmatpush.msrb.mxu1 %v457_v25  ;;  %994 = vmatpush.msra.mxu0 %v318_v26  ;;  %v330_v25 = vld [vmem:[%s1744_s24 + $0x218] sm:$0xff]  ;;  %v489_v26 = vld [vmem:[%s1744_s24 + $0x710] sm:$0xff] }
  0x8e   : > { %1014 = vmatpush.msra.mxu2 %v478_v27  ;;  %1565 = vmatpush.msk.msrb.mxu3 %vm653_vm5, %v638_v28  ;;  %v540_v27 = vld [vmem:[%s1744_s24 + $0x8a8] sm:$0xff]  ;;  %v299_v28 = vld [vmem:[%s1744_s24 + $0x120] sm:$0xff] }
  0x8f   : > { %957 = vmatpush.msrb.mxu1 %v447_v29  ;;  %995 = vmatpush.msra.mxu0 %v308_v30  ;;  %v320_v29 = vld [vmem:[%s1744_s24 + $0x1c8] sm:$0xff]  ;;  %v479_v30 = vld [vmem:[%s1744_s24 + $0x6c0] sm:$0xff] }
  0x90   : > { %1015 = vmatpush.msra.mxu2 %v468_v31  ;;  %1035 = vmatpush.msrb.mxu3 %v628_v32  ;;  %v530_v31 = vld [vmem:[%s1744_s24 + $0x858] sm:$0xff]  ;;  %v289_v32 = vld [vmem:[%s1744_s24 + $0xd0] sm:$0xff] }
  0x91   : > { %1564 = vmatmul.msk.f32.vlgmr.msrb.gmra.mxu2 %vm650_vm6, %v1816_v60  ;;  %958 = vmatpush.msrb.mxu1 %v437_v33  ;;  %v310_v33 = vld [vmem:[%s1744_s24 + $0x178] sm:$0xff] }
  0x92   : > { %996 = vmatpush.msra.mxu0 %v298_v34  ;;  %1016 = vmatpush.msra.mxu2 %v458_v35  ;;  %v469_v34 = vld [vmem:[%s1744_s24 + $0x670] sm:$0xff]  ;;  %v520_v35 = vld [vmem:[%s1744_s24 + $0x808] sm:$0xff] }
  0x93   : > { %940 = vmatmul.f32.vlgmr.msra.gmra.mxu3 %v1839_v15  ;;  %959 = vmatpush.msrb.mxu1 %v427_v37  ;;  %v300_v37 = vld [vmem:[%s1744_s24 + $0x128] sm:$0xff] }
  0x94   : > { %1036 = vmatpush.msrb.mxu3 %v618_v36  ;;  %997 = vmatpush.msra.mxu0 %v288_v38  ;;  %v279_v36 = vld [vmem:[%s1744_s24 + $0x80] sm:$0xff] }
  0x95   : > { %1017 = vmatpush.msra.mxu2 %v448_v39  ;;  %1044 = vmatpush.msra.mxu1 %v419_v41  ;;  %v459_v38 = vld [vmem:[%s1744_s24 + $0x620] sm:$0xff]  ;;  %v510_v39 = vld [vmem:[%s1744_s24 + $0x7b8] sm:$0xff] }
  0x96   : > { %1037 = vmatpush.msrb.mxu3 %v608_v40  ;;  %998 = vmatpush.msra.mxu0 %v278_v42  ;;  %v269_v40 = vld [vmem:[%s1744_s24 + $0x30] sm:$0xff]  ;;  %v290_v41 = vld [vmem:[%s1744_s24 + $0xd8] sm:$0xff] }
  0x97   : > { %1018 = vmatpush.msra.mxu2 %v438_v43  ;;  %1045 = vmatpush.msra.mxu1 %v409_v45  ;;  %v449_v42 = vld [vmem:[%s1744_s24 + $0x5d0] sm:$0xff]  ;;  %v500_v43 = vld [vmem:[%s1744_s24 + $0x768] sm:$0xff] }
  0x98   : > { %1038 = vmatpush.msrb.mxu3 %v598_v44  ;;  %999 = vmatpush.msra.mxu0 %v268_v46  ;;  %v640_v44 = vld [vmem:[%s1744_s24 + $0xbc8] sm:$0xf]  ;;  %v439_v46 = vld [vmem:[%s1744_s24 + $0x580] sm:$0xff] }
  0x99   : > { %1019 = vmatpush.msra.mxu2 %v428_v47  ;;  %1046 = vmatpush.msra.mxu1 %v399_v49  ;;  %v280_v45 = vld [vmem:[%s1744_s24 + $0x88] sm:$0xff]  ;;  %v490_v47 = vld [vmem:[%s1744_s24 + $0x718] sm:$0xff] }
  0x9a   : > { %1020 = vmatmul.f32.vlgmr.msra.gmra.mxu2 %v1843_v18  ;;  %1039 = vmatpush.msrb.mxu3 %v588_v48  ;;  %v630_v48 = vld [vmem:[%s1744_s24 + $0xb78] sm:$0xff] }
  0x9b   : > { %1567 = vmatpush.msk.msrb.mxu0 %vm653_vm5, %v639_v50  ;;  %1104 = vmatpush.msrb.mxu2 %v420_v51  ;;  %v270_v49 = vld [vmem:[%s1744_s24 + $0x38] sm:$0xff]  ;;  %v429_v50 = vld [vmem:[%s1744_s24 + $0x530] sm:$0xff]  ;;  %v480_v51 = vld [vmem:[%s1744_s24 + $0x6c8] sm:$0xff] }
  0x9c   : > { %1064 = vmatpush.msra.mxu3 %v579_v52  ;;  %1047 = vmatpush.msra.mxu1 %v389_v53  ;;  %v620_v52 = vld [vmem:[%s1744_s24 + $0xb28] sm:$0xff]  ;;  %v641_v53 = vld [vmem:[%s1744_s24 + $0xbd0] sm:$0xf] }
  0x9d   : > { %1566 = vmatmul.msk.f32.vlgmr.msrb.gmra.mxu3 %vm650_vm6, %v1816_v60  ;;  %1095 = vmatpush.msrb.mxu0 %v629_v54  ;;  %v609_v60 = vld [vmem:[%s1744_s24 + $0xad0] sm:$0xff] }
  0x9e   : > { %1105 = vmatpush.msrb.mxu2 %v410_v55  ;;  %1065 = vmatpush.msra.mxu3 %v569_v56  ;;  %v421_v54 = vld [vmem:[%s1744_s24 + $0x4f0] sm:$0xff]  ;;  %v470_v55 = vld [vmem:[%s1744_s24 + $0x678] sm:$0xff] }
  0x9f   : > { %960 = vmatmul.f32.vlgmr.msrb.gmra.mxu1 %v1843_v18  ;;  %1096 = vmatpush.msrb.mxu0 %v619_v58  ;;  %v610_v56 = vld [vmem:[%s1744_s24 + $0xad8] sm:$0xff]  ;;  %v411_v58 = vld [vmem:[%s1744_s24 + $0x4a0] sm:$0xff] }
  0xa0   : > { %1048 = vmatpush.msra.mxu1 %v379_v57  ;;  %1106 = vmatpush.msrb.mxu2 %v400_v59  ;;  %v631_v57 = vld [vmem:[%s1744_s24 + $0xb80] sm:$0xff]  ;;  %v460_v59 = vld [vmem:[%s1744_s24 + $0x628] sm:$0xff] }
  0xa1   : > { %1066 = vmatpush.msra.mxu3 %v559_v61  ;;  %1000 = vmatmul.f32.vlgmr.msra.gmra.mxu0 %v1839_v15  ;;  %v600_v61 = vld [vmem:[%s1744_s24 + $0xa88] sm:$0xff] }
  0xa2   : > { %1049 = vmatpush.msra.mxu1 %v369_v62  ;;  %1097 = vmatpush.msrb.mxu0 %v609_v60  ;;  %v621_v62 = vld [vmem:[%s1744_s24 + $0xb30] sm:$0xff] }
  0xa3   : > { %1107 = vmatpush.msrb.mxu2 %v390_v63  ;;  %1067 = vmatpush.msra.mxu3 %v549_v0  ;;  %v2101_v60 = vld.sshfl [vmem:[#allocation1 + $0x10] sm:$0xff pattern:$0x73625140]  ;;  %v450_v0 = vld [vmem:[%s1744_s24 + $0x5d8] sm:$0xff] }
  0xa4   : > { %1050 = vmatpush.msra.mxu1 %v359_v1  ;;  %1098 = vmatpush.msrb.mxu0 %v599_v2  ;;  %v401_v63 = vld [vmem:[%s1744_s24 + $0x450] sm:$0xff]  ;;  %v590_v1 = vld [vmem:[%s1744_s24 + $0xa38] sm:$0xff]  ;;  %v611_v2 = vld [vmem:[%s1744_s24 + $0xae0] sm:$0xff] }
  0xa5   : > { %1108 = vmatpush.msrb.mxu2 %v380_v3  ;;  %1068 = vmatpush.msra.mxu3 %v539_v4  ;;  %v391_v3 = vld [vmem:[%s1744_s24 + $0x400] sm:$0xff]  ;;  %v581_v4 = vld [vmem:[%s1744_s24 + $0x9f0] sm:$0xff] }
  0xa6   : > { %1051 = vmatpush.msra.mxu1 %v349_v5  ;;  %1099 = vmatpush.msrb.mxu0 %v589_v6  ;;  %v440_v5 = vld [vmem:[%s1744_s24 + $0x588] sm:$0xff]  ;;  %v601_v6 = vld [vmem:[%s1744_s24 + $0xa90] sm:$0xff] }
  0xa7   : > { %1109 = vmatpush.msrb.mxu2 %v370_v7  ;;  %1069 = vmatpush.msra.mxu3 %v529_v8  ;;  %v381_v7 = vld [vmem:[%s1744_s24 + $0x3b0] sm:$0xff]  ;;  %v571_v8 = vld [vmem:[%s1744_s24 + $0x9a0] sm:$0xff] }
  0xa8   : > { %1124 = vmatpush.msra.mxu0 %v580_v9  ;;  %1052 = vmatpush.msra.mxu1 %v339_v10  ;;  %v430_v9 = vld [vmem:[%s1744_s24 + $0x538] sm:$0xff]  ;;  %v371_v10 = vld [vmem:[%s1744_s24 + $0x360] sm:$0xff] }
  0xa9   : > { %1110 = vmatpush.msrb.mxu2 %v360_v11  ;;  %1070 = vmatpush.msra.mxu3 %v519_v12  ;;  %v561_v11 = vld [vmem:[%s1744_s24 + $0x950] sm:$0xff]  ;;  %v582_v12 = vld [vmem:[%s1744_s24 + $0x9f8] sm:$0xff] }
  0xaa   : > { %1125 = vmatpush.msra.mxu0 %v570_v13  ;;  %1053 = vmatpush.msra.mxu1 %v329_v14  ;;  %v361_v13 = vld [vmem:[%s1744_s24 + $0x310] sm:$0xff]  ;;  %v551_v14 = vld [vmem:[%s1744_s24 + $0x900] sm:$0xff] }
  0xab   : > { %1111 = vmatpush.msrb.mxu2 %v350_v16  ;;  %1071 = vmatpush.msra.mxu3 %v509_v17  ;;  %v572_v16 = vld [vmem:[%s1744_s24 + $0x9a8] sm:$0xff]  ;;  %v351_v17 = vld [vmem:[%s1744_s24 + $0x2c0] sm:$0xff] }
  0xac   : > { %1126 = vmatpush.msra.mxu0 %v560_v19  ;;  %1054 = vmatpush.msra.mxu1 %v319_v20  ;;  %v422_v19 = vld [vmem:[%s1744_s24 + $0x4f8] sm:$0xff]  ;;  %v541_v20 = vld [vmem:[%s1744_s24 + $0x8b0] sm:$0xff] }
  0xad   : > { %1112 = vmatpush.msrb.mxu2 %v340_v21  ;;  %1072 = vmatpush.msra.mxu3 %v499_v22  ;;  %v562_v21 = vld [vmem:[%s1744_s24 + $0x958] sm:$0xff]  ;;  %v412_v22 = vld [vmem:[%s1744_s24 + $0x4a8] sm:$0xff] }
  0xae   : > { %1127 = vmatpush.msra.mxu0 %v550_v23  ;;  %1055 = vmatpush.msra.mxu1 %v309_v24  ;;  %v531_v23 = vld [vmem:[%s1744_s24 + $0x860] sm:$0xff]  ;;  %v552_v24 = vld [vmem:[%s1744_s24 + $0x908] sm:$0xff] }
  0xaf   : > { %1113 = vmatpush.msrb.mxu2 %v330_v25  ;;  %1073 = vmatpush.msra.mxu3 %v489_v26  ;;  %v331_v25 = vld [vmem:[%s1744_s24 + $0x220] sm:$0xff]  ;;  %v402_v26 = vld [vmem:[%s1744_s24 + $0x458] sm:$0xff] }
  0xb0   : > { %1128 = vmatpush.msra.mxu0 %v540_v27  ;;  %1056 = vmatpush.msra.mxu1 %v299_v28  ;;  %v521_v27 = vld [vmem:[%s1744_s24 + $0x810] sm:$0xff]  ;;  %v542_v28 = vld [vmem:[%s1744_s24 + $0x8b8] sm:$0xff] }
  0xb1   : > { %1114 = vmatpush.msrb.mxu2 %v320_v29  ;;  %1074 = vmatpush.msra.mxu3 %v479_v30  ;;  %v321_v29 = vld [vmem:[%s1744_s24 + $0x1d0] sm:$0xff]  ;;  %v392_v30 = vld [vmem:[%s1744_s24 + $0x408] sm:$0xff] }
  0xb2   : > { %1129 = vmatpush.msra.mxu0 %v530_v31  ;;  %1057 = vmatpush.msra.mxu1 %v289_v32  ;;  %v511_v31 = vld [vmem:[%s1744_s24 + $0x7c0] sm:$0xff]  ;;  %v532_v32 = vld [vmem:[%s1744_s24 + $0x868] sm:$0xff] }
  0xb3   : > { %1115 = vmatpush.msrb.mxu2 %v310_v33  ;;  %1075 = vmatpush.msra.mxu3 %v469_v34  ;;  %v311_v33 = vld [vmem:[%s1744_s24 + $0x180] sm:$0xff]  ;;  %v382_v34 = vld [vmem:[%s1744_s24 + $0x3b8] sm:$0xff] }
  0xb4   : > { %1130 = vmatpush.msra.mxu0 %v520_v35  ;;  %1058 = vmatpush.msra.mxu1 %v279_v36  ;;  %v501_v35 = vld [vmem:[%s1744_s24 + $0x770] sm:$0xff]  ;;  %v522_v36 = vld [vmem:[%s1744_s24 + $0x818] sm:$0xff] }
  0xb5   : > { %1116 = vmatpush.msrb.mxu2 %v300_v37  ;;  %1076 = vmatpush.msra.mxu3 %v459_v38  ;;  %v301_v37 = vld [vmem:[%s1744_s24 + $0x130] sm:$0xff]  ;;  %v372_v38 = vld [vmem:[%s1744_s24 + $0x368] sm:$0xff] }
  0xb6   : > { %1131 = vmatpush.msra.mxu0 %v510_v39  ;;  %1059 = vmatpush.msra.mxu1 %v269_v40  ;;  %v491_v39 = vld [vmem:[%s1744_s24 + $0x720] sm:$0xff]  ;;  %v512_v40 = vld [vmem:[%s1744_s24 + $0x7c8] sm:$0xff] }
  0xb7   : > { %1117 = vmatpush.msrb.mxu2 %v290_v41  ;;  %1077 = vmatpush.msra.mxu3 %v449_v42  ;;  %v291_v41 = vld [vmem:[%s1744_s24 + $0xe0] sm:$0xff]  ;;  %v362_v42 = vld [vmem:[%s1744_s24 + $0x318] sm:$0xff] }
  0xb8   : > { %1132 = vmatpush.msra.mxu0 %v500_v43  ;;  %1569 = vmatpush.msk.msrb.mxu1 %vm653_vm5, %v640_v44  ;;  %v481_v43 = vld [vmem:[%s1744_s24 + $0x6d0] sm:$0xff]  ;;  %v502_v44 = vld [vmem:[%s1744_s24 + $0x778] sm:$0xff] }
  0xb9   : > { %1118 = vmatpush.msrb.mxu2 %v280_v45  ;;  %1078 = vmatpush.msra.mxu3 %v439_v46  ;;  %v281_v46 = vld [vmem:[%s1744_s24 + $0x90] sm:$0xff] }
  0xba   : > { %1133 = vmatpush.msra.mxu0 %v490_v47  ;;  %1155 = vmatpush.msrb.mxu1 %v630_v48  ;;  %v352_v47 = vld [vmem:[%s1744_s24 + $0x2c8] sm:$0xff]  ;;  %v471_v48 = vld [vmem:[%s1744_s24 + $0x680] sm:$0xff] }
  0xbb   : > { %1119 = vmatpush.msrb.mxu2 %v270_v49  ;;  %1079 = vmatpush.msra.mxu3 %v429_v50  ;;  %v492_v49 = vld [vmem:[%s1744_s24 + $0x728] sm:$0xff]  ;;  %v271_v50 = vld [vmem:[%s1744_s24 + $0x40] sm:$0xff] }
  0xbc   : > { %1134 = vmatpush.msra.mxu0 %v480_v51  ;;  %1156 = vmatpush.msrb.mxu1 %v620_v52  ;;  %v342_v51 = vld [vmem:[%s1744_s24 + $0x278] sm:$0xff]  ;;  %v461_v52 = vld [vmem:[%s1744_s24 + $0x630] sm:$0xff] }
  0xbd   : > { %1571 = vmatpush.msk.msra.mxu2 %vm653_vm5, %v641_v53  ;;  %1164 = vmatpush.msrb.mxu3 %v421_v54  ;;  %v482_v53 = vld [vmem:[%s1744_s24 + $0x6d8] sm:$0xff]  ;;  %v451_v54 = vld [vmem:[%s1744_s24 + $0x5e0] sm:$0xff] }
  0xbe   : > { %1135 = vmatpush.msra.mxu0 %v470_v55  ;;  %1157 = vmatpush.msrb.mxu1 %v610_v56  ;;  %v472_v55 = vld [vmem:[%s1744_s24 + $0x688] sm:$0xff]  ;;  %v642_v56 = vld [vmem:[%s1744_s24 + $0xbd8] sm:$0xf] }
  0xbf   : > { %1215 = vmatpush.msra.mxu2 %v631_v57  ;;  %1568 = vmatmul.msk.f32.vlgmr.msrb.gmra.mxu0 %vm650_vm6, %v2101_v60  ;;  %v332_v57 = vld [vmem:[%s1744_s24 + $0x228] sm:$0xff] }
  0xc0   : > { %1165 = vmatpush.msrb.mxu3 %v411_v58  ;;  %1136 = vmatpush.msra.mxu0 %v460_v59  ;;  %v1646_v58 = vld.sshfl [vmem:[#allocation1] sm:$0xff pattern:$0x73625140]  ;;  %v441_v59 = vld [vmem:[%s1744_s24 + $0x590] sm:$0xff] }
  0xc1   : > { %1158 = vmatpush.msrb.mxu1 %v600_v61  ;;  %1216 = vmatpush.msra.mxu2 %v621_v62  ;;  %v462_v61 = vld [vmem:[%s1744_s24 + $0x638] sm:$0xff]  ;;  %v632_v62 = vld [vmem:[%s1744_s24 + $0xb88] sm:$0xff] }
  0xc2   : > { %1060 = vmatmul.f32.vlgmr.msra.gmra.mxu1 %v1839_v15  ;;  %1080 = vmatmul.f32.vlgmr.msra.gmra.mxu3 %v1843_v18 }
  0xc3   : > { %1120 = vmatmul.f32.vlgmr.msrb.gmra.mxu2 %v1839_v15  ;;  %1166 = vmatpush.msrb.mxu3 %v401_v63  ;;  %v591_v15 = vld [vmem:[%s1744_s24 + $0xa40] sm:$0xff]  ;;  %v322_v63 = vld [vmem:[%s1744_s24 + $0x1d8] sm:$0xff] }
  0xc4   : > { %1137 = vmatpush.msra.mxu0 %v450_v0  ;;  %1159 = vmatpush.msrb.mxu1 %v590_v1  ;;  %v741_v0 = vpop.f32.mrf.mxu2  ;;  %v431_v1 = vld [vmem:[%s1744_s24 + $0x540] sm:$0xff] }
  0xc5   : > { %1217 = vmatpush.msra.mxu2 %v611_v2  ;;  %1167 = vmatpush.msrb.mxu3 %v391_v3  ;;  %v2157_v45 = vpop.f32.mrf.mxu0  ;;  %v452_v2 = vld [vmem:[%s1744_s24 + $0x5e8] sm:$0xff] }
  0xc6   : > { %1184 = vmatpush.msra.mxu1 %v581_v4  ;;  %1138 = vmatpush.msra.mxu0 %v440_v5  ;;  %v622_v4 = vld [vmem:[%s1744_s24 + $0xb38] sm:$0xff]  ;;  %v312_v5 = vld [vmem:[%s1744_s24 + $0x188] sm:$0xff] }
  0xc7   : > { %1218 = vmatpush.msra.mxu2 %v601_v6  ;;  %1168 = vmatpush.msrb.mxu3 %v381_v7  ;;  %v442_v6 = vld [vmem:[%s1744_s24 + $0x598] sm:$0xff]  ;;  %v721_v7 = vpop.f32.mrf.mxu1 }
  0xc8   : > { %1185 = vmatpush.msra.mxu1 %v571_v8  ;;  %1139 = vmatpush.msra.mxu0 %v430_v9  ;;  %v612_v8 = vld [vmem:[%s1744_s24 + $0xae8] sm:$0xff] }
  0xc9   : > { %1219 = vmatpush.msra.mxu2 %v591_v15  ;;  %1140 = vmatmul.f32.vlgmr.msra.gmra.mxu0 %v1843_v18  ;;  %v341_v18 = vld [vmem:[%s1744_s24 + $0x270] sm:$0xff]  ;;  %v1647_v9 = vld.sshfl [vmem:[#allocation1 + $0x8] sm:$0xff pattern:$0x73625140]  ;;  %v302_v15 = vld [vmem:[%s1744_s24 + $0x138] sm:$0xff] }
  0xca   : > { %1169 = vmatpush.msrb.mxu3 %v371_v10  ;;  %1186 = vmatpush.msra.mxu1 %v561_v11  ;;  %v432_v10 = vld [vmem:[%s1744_s24 + $0x548] sm:$0xff]  ;;  %v602_v11 = vld [vmem:[%s1744_s24 + $0xa98] sm:$0xff] }
  0xcb   : > { %1244 = vmatpush.msrb.mxu2 %v582_v12  ;;  %1570 = vmatmul.msk.f32.vlgmr.msrb.gmra.mxu1 %vm650_vm6, %v2101_v60  ;;  %v292_v12 = vld [vmem:[%s1744_s24 + $0xe8] sm:$0xff] }
  0xcc   : > { %1170 = vmatpush.msrb.mxu3 %v361_v13  ;;  %1187 = vmatpush.msra.mxu1 %v551_v14  ;;  %v592_v13 = vld [vmem:[%s1744_s24 + $0xa48] sm:$0xff]  ;;  %v282_v14 = vld [vmem:[%s1744_s24 + $0x98] sm:$0xff] }
  0xcd   : > { %1245 = vmatpush.msrb.mxu2 %v572_v16  ;;  %1224 = vmatpush.msrb.mxu0 %v422_v19 }
  0xce   : > { %1171 = vmatpush.msrb.mxu3 %v351_v17  ;;  %1188 = vmatpush.msra.mxu1 %v541_v20  ;;  %v761_v17 = vpop.f32.mrf.mxu3  ;;  %v781_v19 = vpop.f32.mrf.mxu2  ;;  %v272_v20 = vld [vmem:[%s1744_s24 + $0x48] sm:$0xff] }
  0xcf   : > { %1246 = vmatpush.msrb.mxu2 %v562_v21  ;;  %1225 = vmatpush.msrb.mxu0 %v412_v22  ;;  %v801_v3 = vpop.f32.mrf.mxu0 }
  0xd0   : > { %1172 = vmatpush.msrb.mxu3 %v341_v18  ;;  %1189 = vmatpush.msra.mxu1 %v531_v23  ;;  %v782_v18 = vadd.f32 %v781_v19, %v761_v17  ;;  %v261_v17 = vld [vmem:[%s1749_s5 + $0x10] sm:$0xf] }
  0xd1   : > { %1247 = vmatpush.msrb.mxu2 %v552_v24  ;;  %1226 = vmatpush.msrb.mxu0 %v402_v26 }
  0xd2   : > { %1173 = vmatpush.msrb.mxu3 %v331_v25  ;;  %1190 = vmatpush.msra.mxu1 %v521_v27  ;;  %v802_v22 = vadd.f32 %v801_v3, %v782_v18  ;;  %v722_v27 = vadd.f32 %v721_v7, %v2157_v45 }
  0xd3   : > { %1248 = vmatpush.msrb.mxu2 %v542_v28  ;;  %1227 = vmatpush.msrb.mxu0 %v392_v30 }
  0xd4   : > { %1174 = vmatpush.msrb.mxu3 %v321_v29  ;;  %1191 = vmatpush.msra.mxu1 %v511_v31  ;;  %v1294_v31 = vrot.slane %v802_v22, 6 }
  0xd5   : > { %1249 = vmatpush.msrb.mxu2 %v532_v32  ;;  %1228 = vmatpush.msrb.mxu0 %v382_v34 }
  0xd6   : > { %1175 = vmatpush.msrb.mxu3 %v311_v33  ;;  %1192 = vmatpush.msra.mxu1 %v501_v35  ;;  %v259_v35 = vld [vmem:[%s1749_s5] sm:$0xff] }
  0xd7   : > { %1250 = vmatpush.msrb.mxu2 %v522_v36  ;;  %1229 = vmatpush.msrb.mxu0 %v372_v38 }
  0xd8   : > { %1176 = vmatpush.msrb.mxu3 %v301_v37  ;;  %1193 = vmatpush.msra.mxu1 %v491_v39 }
  0xd9   : > { %1251 = vmatpush.msrb.mxu2 %v512_v40  ;;  %1230 = vmatpush.msrb.mxu0 %v362_v42 }
  0xda   : > { %1177 = vmatpush.msrb.mxu3 %v291_v41  ;;  %1194 = vmatpush.msra.mxu1 %v481_v43 }
  0xdb   : > { %1252 = vmatpush.msrb.mxu2 %v502_v44  ;;  %1231 = vmatpush.msrb.mxu0 %v352_v47 }
  0xdc   : > { %1178 = vmatpush.msrb.mxu3 %v281_v46  ;;  %1195 = vmatpush.msra.mxu1 %v471_v48 }
  0xdd   : > { %1253 = vmatpush.msrb.mxu2 %v492_v49  ;;  %1232 = vmatpush.msrb.mxu0 %v342_v51 }
  0xde   : > { %1179 = vmatpush.msrb.mxu3 %v271_v50  ;;  %1196 = vmatpush.msra.mxu1 %v461_v52 }
  0xdf   : > { %1254 = vmatpush.msrb.mxu2 %v482_v53  ;;  %1180 = vmatmul.f32.vlgmr.msrb.gmra.mxu3 %v1646_v58 }
  0xe0   : > { %1572 = vmatmul.msk.f32.vlgmr.msra.gmra.mxu2 %vm650_vm6, %v2101_v60  ;;  %1197 = vmatpush.msra.mxu1 %v451_v54 }
  0xe1   : > { %1255 = vmatpush.msrb.mxu2 %v472_v55  ;;  %1573 = vmatpush.msk.msra.mxu3 %vm653_vm5, %v642_v56 }
  0xe2   : > { %1233 = vmatpush.msrb.mxu0 %v332_v57  ;;  %1198 = vmatpush.msra.mxu1 %v441_v59 }
  0xe3   : > { %1256 = vmatpush.msrb.mxu2 %v462_v61  ;;  %1275 = vmatpush.msra.mxu3 %v632_v62 }
  0xe4   : > { %1234 = vmatpush.msrb.mxu0 %v322_v63  ;;  %1199 = vmatpush.msra.mxu1 %v431_v1 }
  0xe5   : > { %1257 = vmatpush.msrb.mxu2 %v452_v2  ;;  %1276 = vmatpush.msra.mxu3 %v622_v4 }
  0xe6   : > { %1200 = vmatmul.f32.vlgmr.msra.gmra.mxu1 %v1647_v9  ;;  %1235 = vmatpush.msrb.mxu0 %v312_v5 }
  0xe7   : > { %1258 = vmatpush.msrb.mxu2 %v442_v6  ;;  %1277 = vmatpush.msra.mxu3 %v612_v8  ;;  %v861_v16 = vpop.f32.mrf.mxu0 }
  0xe8   : > { %1236 = vmatpush.msrb.mxu0 %v302_v15 }
  0xe9   : > { %1259 = vmatpush.msrb.mxu2 %v432_v10  ;;  %1278 = vmatpush.msra.mxu3 %v602_v11 }
  0xea   : > { %1260 = vmatmul.f32.vlgmr.msrb.gmra.mxu2 %v1647_v9  ;;  %1237 = vmatpush.msrb.mxu0 %v292_v12 }
  0xeb   : > { %1279 = vmatpush.msra.mxu3 %v592_v13  ;;  %v821_v21 = vpop.f32.mrf.mxu1 }
  0xec   : > { %1574 = vmatmul.msk.f32.vlgmr.msra.gmra.mxu3 %vm650_vm6, %v2101_v60  ;;  %1238 = vmatpush.msrb.mxu0 %v282_v14  ;;  %v742_v60 = vadd.f32 %v741_v0, %v722_v27  ;;  %v260_v0 = vld [vmem:[%s1749_s5 + $0x8] sm:$0xff]  ;;  %vm2215_vm6 = vmor %vm1415_vm3, %vm1414_vm2 }
  0xee   : > { %1239 = vmatpush.msrb.mxu0 %v272_v20  ;;  %v1302_v36 = vsel %vm1301_vm7, %v742_v60, %v1294_v31 }
  0xef   : > { %1240 = vmatmul.f32.vlgmr.msrb.gmra.mxu0 %v1646_v58 }
  0xf3   : > { %v841_v23 = vpop.f32.mrf.mxu3 }
  0xf4   : > { %v881_v24 = vpop.f32.mrf.mxu2  ;;  %v842_v25 = vadd.f32 %v841_v23, %v821_v21  ;;  %v901_v26 = vpop.f32.mrf.mxu0 }
  0xf5   : > { %v902_v28 = vadd.f32 %v901_v26, %v881_v24 }
  0xf6   : > { %v862_v29 = vadd.f32 %v861_v16, %v842_v25 }
  0xf7   : > { %v921_v30 = vpop.f32.mrf.mxu1 }
  0xf8   : > { %v922_v32 = vadd.f32 %v921_v30, %v902_v28  ;;  %v1295_v33 = vrot.slane %v862_v29, 4 }
  0xfa   : > { %v1296_v34 = vrot.slane %v922_v32, 2 }
  0xfc   : > { %v1304_v37 = vsel %vm1303_vm8, %v1295_v33, %v1296_v34 }
  0xfd   : > { %v1305_v38 = vsel %vm653_vm5, %v1302_v36, %v1304_v37 }
  0xfe   : > { %v1313_v39 = vadd.f32 %v1305_v38, %v259_v35 }
 0x100   : > { %1337 = vrot.lane.b32.xlu0 %v1313_v39, %s1689_s9  ;;  %v1575_v21 = vmul.f32 -1.442695, %v1313_v39 }
 0x114   : > { %v981_v40 = vpop.f32.mrf.mxu2 }
 0x116   : > { %v941_v41 = vpop.f32.mrf.mxu3 }
 0x11c   : > { %v961_v43 = vpop.f32.mrf.mxu1 }
 0x11d   : > { %v1021_v45 = vpop.f32.mrf.mxu2  ;;  %v962_v54 = vadd.f32 %v961_v43, %v941_v41 }
 0x11e   : > { %v1001_v42 = vpop.f32.mrf.mxu0 }
 0x11f   : > { %v1022_v48 = vadd.f32 %v1021_v45, %v1001_v42  ;;  %v982_v62 = vadd.f32 %v981_v40, %v962_v54 }
 0x120   : > { %v1041_v46 = vpop.f32.mrf.mxu3 }
 0x121   : > { %v1042_v49 = vadd.f32 %v1041_v46, %v1022_v48 }
 0x123   : > { %v1297_v58 = vrot.slane %v1042_v49, 6 }
 0x125   : > { %v1306_v1 = vsel %vm1301_vm7, %v982_v62, %v1297_v58 }
 0x13c   : > { %v1101_v44 = vpop.f32.mrf.mxu0 }
 0x13f   : > { %v1061_v47 = vpop.f32.mrf.mxu1 }
 0x145   : > { %v1081_v50 = vpop.f32.mrf.mxu3 }
 0x146   : > { %v1121_v51 = vpop.f32.mrf.mxu2  ;;  %v1082_v52 = vadd.f32 %v1081_v50, %v1061_v47  ;;  %v1141_v53 = vpop.f32.mrf.mxu0 }
 0x147   : > { %v1142_v55 = vadd.f32 %v1141_v53, %v1121_v51 }
 0x148   : > { %v1102_v56 = vadd.f32 %v1101_v44, %v1082_v52  ;;  %v1161_v57 = vpop.f32.mrf.mxu1 }
 0x149   : > { %v1162_v59 = vadd.f32 %v1161_v57, %v1142_v55  ;;  %v1400_v55 = vld [vmem:[#allocation3] sm:$0x3f] }
 0x14a   : > { %v1298_v61 = vrot.slane %v1102_v56, 4 }
 0x14b   : > { %v1299_v63 = vrot.slane %v1162_v59, 2 }
 0x14d   : > { %v1307_v2 = vsel %vm1303_vm8, %v1298_v61, %v1299_v63  ;;  %vm1378_vm8 = vcmask 1014784  }
 0x14e   : > { %v1308_v3 = vsel %vm653_vm5, %v1306_v1, %v1307_v2 }
 0x14f   : > { %v1314_v4 = vadd.f32 %v1308_v3, %v260_v0 }
 0x151   : > { %1371 = vrot.lane.b32.xlu1 %v1314_v4, %s1690_s10  ;;  %1339 = vrot.lane.b32.xlu0 %v1314_v4, %s1689_s9  ;;  %1629 = vtanh.f32 %v1314_v4 }
 0x152   : > { %1631 = vpow2.f32 %v1575_v21 }
 0x157   : > { %v1630_v5 = vpop.eup %1629 }
 0x158   : > { %1403 = vrot.lane.b32.xlu2 %v1630_v5, %s1691_s17  ;;  %v1632_v22 = vpop.eup %1631 }
 0x159   : > { %v1319_v23 = vadd.f32 1.0, %v1632_v22 }
 0x15b   : > { %1633 = vrcp.f32 %v1319_v23  ;;  %vm1325_vm10 = vweird.f32 %v1319_v23  ;;  %v1329_v43 = vand.u32 2147483647, %v1319_v23  ;;  %v1331_v44 = vand.u32 2147483648, %v1319_v23 }
 0x15d   : > { %v1332_v52 = vor.u32 1.1754944e-38, %v1331_v44  ;;  %vm1330_vm4 = vcmp.eq.f32.partialorder %v1329_v43, 8.507059e+37 }
 0x161   : > { %v1634_v33 = vpop.eup %1633 }
 0x162   : > { %v1181_v7 = vpop.f32.mrf.mxu3  ;;  %v1321_v34 = vmul.f32 %v1634_v33, %v1319_v23  ;;  %vm1326_vm11 = vweird.f32 %v1634_v33 }
 0x163   : > { %v1221_v6 = vpop.f32.mrf.mxu2  ;;  %v1201_v8 = vpop.f32.mrf.mxu1  ;;  %vm2208_vm15 = vmor %vm1325_vm10, %vm1326_vm11 }
 0x164   : > { %v1202_v11 = vadd.f32 %v1201_v8, %v1181_v7  ;;  %v1322_v36 = vsub.f32 1.0, %v1321_v34 }
 0x166   : > { %v1222_v14 = vadd.f32 %v1221_v6, %v1202_v11  ;;  %v1323_v37 = vmul.f32 %v1634_v33, %v1322_v36 }
 0x168   : > { %v1324_v41 = vadd.f32 %v1634_v33, %v1323_v37 }
 0x16a   : > { %v1328_v50 = vsel %vm2208_vm15, %v1634_v33, %v1324_v41 }
 0x16b   : > { %v1333_v58 = vsel %vm1330_vm4, %v1332_v52, %v1328_v50 }
 0x16c   : > { %v1241_v9 = vpop.f32.mrf.mxu0 }
 0x16d   : > { %v1261_v15 = vpop.f32.mrf.mxu2 }
 0x16e   : > { %v1262_v10 = vadd.f32 %v1261_v15, %v1241_v9 }
 0x16f   : > { %v1281_v12 = vpop.f32.mrf.mxu3 }
 0x170   : > { %v1282_v13 = vadd.f32 %v1281_v12, %v1262_v10 }
 0x172   : > { %v1300_v16 = vrot.slane %v1282_v13, 6  ;;  %v1338_v18 = vpop.permute.xlu0 %1337 }
 0x173   : > { %v1341_v24 = vrot.slane %v1338_v18, 4  ;;  %v1343_v26 = vrot.slane %v1338_v18, 6 }
 0x174   : > { %v1309_v19 = vsel %vm1301_vm7, %v1222_v14, %v1300_v16 }
 0x175   : > { %v1315_v20 = vadd.f32 %v1309_v19, %v261_v17 }
 0x177   : > { %1373 = vrot.lane.b32.xlu1 %v1315_v20, %s1690_s10 }
 0x1b2   : > { %v1404_v39 = vpop.permute.xlu2 %1403 }
 0x1b3   : > { %v1405_v45 = vrot.slane %v1404_v39, 2 }
 0x1b5   : > { %v1407_v53 = vsel %vm1406_vm12, %v1404_v39, %v1405_v45 }
 0x1b6   : > { %v1409_v61 = vmul.f32 %v1407_v53, %v1333_v58 }
 0x1c3   : > { %v1340_v25 = vpop.permute.xlu0 %1339  ;;  %v1372_v54 = vpop.permute.xlu1 %1371 }
 0x1c4   : > { %v1342_v27 = vrot.slane %v1340_v25, 4  ;;  %v1344_v28 = vrot.slane %v1340_v25, 6  ;;  %v1375_v2 = vrot.slane %v1372_v54, 6 }
 0x1c6   : > { %v1345_v29 = vsel %vm653_vm5, %v1341_v24, %v1342_v27  ;;  %v1346_v30 = vsel %vm1301_vm7, %v1343_v26, %v1344_v28 }
 0x1c7   : > { %v1348_v31 = vsel %vm1347_vm9, %v1345_v29, %v1346_v30 }
 0x1c8   : > { %v1576_v32 = vmul.f32 -1.442695, %v1348_v31 }
 0x1ca   : > { %1635 = vpow2.f32 %v1576_v32 }
 0x1d0   : > { %v1636_v60 = vpop.eup %1635 }
 0x1d1   : > { %v1353_v35 = vadd.f32 1.0, %v1636_v60 }
 0x1d3   : > { %1637 = vrcp.f32 %v1353_v35  ;;  %v1365_v46 = vand.u32 2147483648, %v1353_v35  ;;  %v1363_v48 = vand.u32 2147483647, %v1353_v35  ;;  %vm1359_vm0 = vweird.f32 %v1353_v35 }
 0x1d5   : > { %v1366_v56 = vor.u32 1.1754944e-38, %v1365_v46  ;;  %vm1364_vm5 = vcmp.eq.f32.partialorder %v1363_v48, 8.507059e+37 }
 0x1d9   : > { %v1638_v38 = vpop.eup %1637 }
 0x1da   : > { %v1355_v40 = vmul.f32 %v1638_v38, %v1353_v35  ;;  %vm1360_vm13 = vweird.f32 %v1638_v38 }
 0x1db   : > { %vm1361_vm1 = vmor %vm1359_vm0, %vm1360_vm13 }
 0x1dc   : > { %v1356_v42 = vsub.f32 1.0, %v1355_v40 }
 0x1de   : > { %v1357_v47 = vmul.f32 %v1638_v38, %v1356_v42 }
 0x1e0   : > { %v1358_v51 = vadd.f32 %v1638_v38, %v1357_v47 }
 0x1e2   : > { %v1362_v57 = vsel %vm1361_vm1, %v1638_v38, %v1358_v51 }
 0x1e3   : > { %v1367_v59 = vsel %vm1364_vm5, %v1366_v56, %v1362_v57 }
 0x1e4   : > { %v1401_v62 = vmul.f32 %v1400_v55, %v1367_v59 }
 0x1e6   : > { %v1410_v0 = vadd.f32 %v1409_v61, %v1401_v62 }
 0x1e8   : > { %1417 = vst.msk [vmem:[#allocation3] sm:$0x3f] %vm2215_vm6, %v1410_v0 }
 0x1e9   : > { %v1374_v1 = vpop.permute.xlu1 %1373 }
 0x1ea   : > { %v1376_v3 = vrot.slane %v1374_v1, 6 }
 0x1ec   : > { %v1377_v4 = vsel %vm1301_vm7, %v1375_v2, %v1376_v3 }
 0x1ed   : > { %v1379_v5 = vsel %vm1378_vm8, %v1377_v4, %v1374_v1 }
 0x1ee   : > { %v1577_v6 = vmul.f32 -1.442695, %v1379_v5 }
 0x1f0   : > { %1639 = vpow2.f32 %v1577_v6 }
 0x1f6   : > { %v1640_v7 = vpop.eup %1639 }
 0x1f7   : > { %v1384_v8 = vadd.f32 1.0, %v1640_v7 }
 0x1f9   : > { %1641 = vrcp.f32 %v1384_v8  ;;  %v1396_v11 = vand.u32 2147483648, %v1384_v8  ;;  %v1394_v13 = vand.u32 2147483647, %v1384_v8  ;;  %vm1390_vm10 = vweird.f32 %v1384_v8 }
 0x1fa   : > { %1643 = vtanh.f32 %v1410_v0 }
 0x1fb   : > { %v1397_v16 = vor.u32 1.1754944e-38, %v1396_v11  ;;  %vm1395_vm7 = vcmp.eq.f32.partialorder %v1394_v13, 8.507059e+37 }
 0x1ff   : > { %v1642_v9 = vpop.eup %1641 }
 0x200   : > { %v1386_v15 = vmul.f32 %v1642_v9, %v1384_v8  ;;  %vm1391_vm9 = vweird.f32 %v1642_v9  ;;  %v1644_v19 = vpop.eup %1643 }
 0x201   : > { %vm1392_vm11 = vmor %vm1390_vm10, %vm1391_vm9 }
 0x202   : > { %v1387_v10 = vsub.f32 1.0, %v1386_v15 }
 0x204   : > { %v1388_v12 = vmul.f32 %v1642_v9, %v1387_v10 }
 0x206   : > { %v1389_v14 = vadd.f32 %v1642_v9, %v1388_v12 }
 0x208   : > { %v1393_v17 = vsel %vm1392_vm11, %v1642_v9, %v1389_v14 }
 0x209   : > { %v1398_v20 = vsel %vm1395_vm7, %v1397_v16, %v1393_v17 }
 0x20a   : > { %v1412_v21 = vmul.f32 %v1644_v19, %v1398_v20 }
 0x20c   : > { %1418 = vst.msk [vmem:[#allocation2] sm:$0x3f] %vm2215_vm6, %v1412_v21 }
 0x20d   : > { %1419 = vst.msk [vmem:[%s1754_s16] sm:$0x3f] %vm2215_vm6, %v1412_v21 }
 0x20e PF: > { %s12_s13 = sadd.s32 1, %s1686_s13   ;;  %s2249_s9 = smov %s1678_s11 }
 0x20f   : > { %p9_p8 = scmp.ge.s32.totalorder %s12_s13, 18   ;;  %s2250_s10 = smov %s1682_s12 }
 0x210   : > { %s2251_s11 = smov %s2254_s14  ;;  %s2252_s12 = smov %s2258_s15 }
 0x211   :  { %11 = sbr.rel (!%p9_p8) target bundleno = 3 (0x3), region = 65 }

// kernel: bilstm_forward.5
= control target key start
LH: loop header
LB: loop body
LE: loop exit
PB: predicated region body
PF: predicated region fallthrough
CT: control target
= control target key end

     0   :  { %vm194_vm0 = vcmask 1043456   ;;  %vm187_vm1 = vcmask 359424   ;;  %s1384_s0 = inlined_call_operand.vmem [shape: f32[2,16,300], index: 0, kind: input, shape index: {}]   ;;  %s1385_s1 = inlined_call_operand.vmem [shape: f32[2,300,192], index: 1, kind: input, shape index: {}]   ;;  %s1386_s2 = inlined_call_operand.vmem [shape: f32[1,192], index: 2, kind: input, shape index: {}]   ;;  %s1387_s3 = inlined_call_operand.vmem [shape: f32[192,10], index: 3, kind: input, shape index: {}]   ;;  %s1388_s4 = inlined_call_operand.vmem [shape: f32[1,10], index: 4, kind: input, shape index: {}]   ;;  %s1389_s5 = inlined_call_operand.hbm [shape: f32[2,10], index: 5, kind: output, shape index: {}]  }
   0x1   :  { %v660_v0 = vld [vmem:[%s1385_s1 + $0x350] sm:$0xff]  ;;  %v661_v3 = vld [vmem:[%s1385_s1 + $0x358] sm:$0xff]  ;;  %v658_v4 = vld [vmem:[%s1385_s1 + $0x340] sm:$0xff] }
   0x2   :  { %v692_v1 = vld [vmem:[%s1385_s1 + $0x450] sm:$0xff]  ;;  %201 = vmatpush.msra.mxu0 %v660_v0  ;;  %v690_v5 = vld [vmem:[%s1385_s1 + $0x440] sm:$0xff]  ;;  %270 = vmatpush.msra.mxu3 %v661_v3  ;;  %v659_v7 = vld [vmem:[%s1385_s1 + $0x348] sm:$0xff] }
   0x3   :  { %v704_v2 = vld [vmem:[%s1385_s1 + $0x4b0] sm:$0xf]  ;;  %224 = vmatpush.msra.mxu1 %v692_v1  ;;  %v702_v6 = vld [vmem:[%s1385_s1 + $0x4a0] sm:$0xff]  ;;  %v657_v11 = vld [vmem:[%s1385_s1 + $0x338] sm:$0xff] }
   0x4   :  { %706 = vmatpush.msk.msra.mxu2 %vm194_vm0, %v704_v2  ;;  %v656_v8 = vld [vmem:[%s1385_s1 + $0x330] sm:$0xff]  ;;  %202 = vmatpush.msra.mxu0 %v658_v4  ;;  %v654_v12 = vld [vmem:[%s1385_s1 + $0x320] sm:$0xff]  ;;  %v655_v15 = vld [vmem:[%s1385_s1 + $0x328] sm:$0xff] }
   0x5   :  { %225 = vmatpush.msra.mxu1 %v690_v5  ;;  %v688_v9 = vld [vmem:[%s1385_s1 + $0x430] sm:$0xff]  ;;  %271 = vmatpush.msra.mxu3 %v659_v7  ;;  %v686_v13 = vld [vmem:[%s1385_s1 + $0x420] sm:$0xff]  ;;  %v653_v19 = vld [vmem:[%s1385_s1 + $0x318] sm:$0xff] }
   0x6   :  { %v700_v10 = vld [vmem:[%s1385_s1 + $0x490] sm:$0xff]  ;;  %258 = vmatpush.msra.mxu2 %v702_v6  ;;  %203 = vmatpush.msra.mxu0 %v656_v8  ;;  %v698_v14 = vld [vmem:[%s1385_s1 + $0x480] sm:$0xff]  ;;  %v651_v23 = vld [vmem:[%s1385_s1 + $0x308] sm:$0xff] }
   0x7   :  { %226 = vmatpush.msra.mxu1 %v688_v9  ;;  %272 = vmatpush.msra.mxu3 %v657_v11  ;;  %v652_v16 = vld [vmem:[%s1385_s1 + $0x310] sm:$0xff]  ;;  %v650_v20 = vld [vmem:[%s1385_s1 + $0x300] sm:$0xff]  ;;  %v693_v24 = vld [vmem:[%s1385_s1 + $0x458] sm:$0xff] }
   0x8   :  { %259 = vmatpush.msra.mxu2 %v700_v10  ;;  %v684_v17 = vld [vmem:[%s1385_s1 + $0x410] sm:$0xff]  ;;  %204 = vmatpush.msra.mxu0 %v654_v12  ;;  %v682_v21 = vld [vmem:[%s1385_s1 + $0x400] sm:$0xff]  ;;  %v649_v27 = vld [vmem:[%s1385_s1 + $0x2f8] sm:$0xff] }
   0x9   :  { %227 = vmatpush.msra.mxu1 %v686_v13  ;;  %v696_v18 = vld [vmem:[%s1385_s1 + $0x470] sm:$0xff]  ;;  %273 = vmatpush.msra.mxu3 %v655_v15  ;;  %v694_v22 = vld [vmem:[%s1385_s1 + $0x460] sm:$0xff]  ;;  %v691_v28 = vld [vmem:[%s1385_s1 + $0x448] sm:$0xff] }
   0xa   :  { %260 = vmatpush.msra.mxu2 %v698_v14  ;;  %205 = vmatpush.msra.mxu0 %v652_v16  ;;  %v648_v25 = vld [vmem:[%s1385_s1 + $0x2f0] sm:$0xff]  ;;  %v646_v29 = vld [vmem:[%s1385_s1 + $0x2e0] sm:$0xff]  ;;  %v647_v31 = vld [vmem:[%s1385_s1 + $0x2e8] sm:$0xff] }
   0xb   :  { %228 = vmatpush.msra.mxu1 %v684_v17  ;;  %274 = vmatpush.msra.mxu3 %v653_v19  ;;  %v680_v26 = vld [vmem:[%s1385_s1 + $0x3f0] sm:$0xff]  ;;  %v678_v30 = vld [vmem:[%s1385_s1 + $0x3e0] sm:$0xff]  ;;  %v689_v32 = vld [vmem:[%s1385_s1 + $0x438] sm:$0xff] }
   0xc   :  { %261 = vmatpush.msra.mxu2 %v696_v18  ;;  %206 = vmatpush.msra.mxu0 %v650_v20  ;;  %v644_v33 = vld [vmem:[%s1385_s1 + $0x2d0] sm:$0xff]  ;;  %v645_v35 = vld [vmem:[%s1385_s1 + $0x2d8] sm:$0xff]  ;;  %v687_v36 = vld [vmem:[%s1385_s1 + $0x428] sm:$0xff] }
   0xd   :  { %229 = vmatpush.msra.mxu1 %v682_v21  ;;  %275 = vmatpush.msra.mxu3 %v651_v23  ;;  %v676_v34 = vld [vmem:[%s1385_s1 + $0x3d0] sm:$0xff]  ;;  %v642_v37 = vld [vmem:[%s1385_s1 + $0x2c0] sm:$0xff]  ;;  %v643_v39 = vld [vmem:[%s1385_s1 + $0x2c8] sm:$0xff] }
   0xe   :  { %262 = vmatpush.msra.mxu2 %v694_v22  ;;  %207 = vmatpush.msra.mxu0 %v648_v25  ;;  %v674_v38 = vld [vmem:[%s1385_s1 + $0x3c0] sm:$0xff]  ;;  %v685_v40 = vld [vmem:[%s1385_s1 + $0x418] sm:$0xff]  ;;  %v640_v41 = vld [vmem:[%s1385_s1 + $0x2b0] sm:$0xff] }
   0xf   :  { %230 = vmatpush.msra.mxu1 %v680_v26  ;;  %276 = vmatpush.msra.mxu3 %v649_v27  ;;  %v672_v42 = vld [vmem:[%s1385_s1 + $0x3b0] sm:$0xff]  ;;  %v641_v43 = vld [vmem:[%s1385_s1 + $0x2b8] sm:$0xff]  ;;  %v683_v44 = vld [vmem:[%s1385_s1 + $0x408] sm:$0xff] }
  0x10   :  { %293 = vmatpush.msrb.mxu2 %v693_v24  ;;  %208 = vmatpush.msra.mxu0 %v646_v29  ;;  %v638_v45 = vld [vmem:[%s1385_s1 + $0x2a0] sm:$0xff]  ;;  %v639_v47 = vld [vmem:[%s1385_s1 + $0x2a8] sm:$0xff]  ;;  %v681_v48 = vld [vmem:[%s1385_s1 + $0x3f8] sm:$0xff] }
  0x11   :  { %231 = vmatpush.msra.mxu1 %v678_v30  ;;  %277 = vmatpush.msra.mxu3 %v647_v31  ;;  %v670_v46 = vld [vmem:[%s1385_s1 + $0x3a0] sm:$0xff]  ;;  %v636_v49 = vld [vmem:[%s1385_s1 + $0x290] sm:$0xff]  ;;  %v637_v51 = vld [vmem:[%s1385_s1 + $0x298] sm:$0xff] }
  0x12   :  { %294 = vmatpush.msrb.mxu2 %v691_v28  ;;  %209 = vmatpush.msra.mxu0 %v644_v33  ;;  %v668_v50 = vld [vmem:[%s1385_s1 + $0x390] sm:$0xff]  ;;  %v679_v52 = vld [vmem:[%s1385_s1 + $0x3e8] sm:$0xff]  ;;  %v634_v53 = vld [vmem:[%s1385_s1 + $0x280] sm:$0xff] }
  0x13   :  { %232 = vmatpush.msra.mxu1 %v676_v34  ;;  %278 = vmatpush.msra.mxu3 %v645_v35  ;;  %v666_v54 = vld [vmem:[%s1385_s1 + $0x380] sm:$0xff]  ;;  %v635_v55 = vld [vmem:[%s1385_s1 + $0x288] sm:$0xff]  ;;  %v677_v56 = vld [vmem:[%s1385_s1 + $0x3d8] sm:$0xff] }
  0x14   :  { %295 = vmatpush.msrb.mxu2 %v689_v32  ;;  %210 = vmatpush.msra.mxu0 %v642_v37  ;;  %v632_v57 = vld [vmem:[%s1385_s1 + $0x270] sm:$0xff]  ;;  %v633_v59 = vld [vmem:[%s1385_s1 + $0x278] sm:$0xff]  ;;  %v675_v60 = vld [vmem:[%s1385_s1 + $0x3c8] sm:$0xff] }
  0x15   :  { %233 = vmatpush.msra.mxu1 %v674_v38  ;;  %279 = vmatpush.msra.mxu3 %v643_v39  ;;  %v664_v58 = vld [vmem:[%s1385_s1 + $0x370] sm:$0xff]  ;;  %v630_v61 = vld [vmem:[%s1385_s1 + $0x260] sm:$0xff]  ;;  %v631_v63 = vld [vmem:[%s1385_s1 + $0x268] sm:$0xff] }
  0x16   :  { %296 = vmatpush.msrb.mxu2 %v687_v36  ;;  %211 = vmatpush.msra.mxu0 %v640_v41  ;;  %v662_v62 = vld [vmem:[%s1385_s1 + $0x360] sm:$0xff]  ;;  %v673_v0 = vld [vmem:[%s1385_s1 + $0x3b8] sm:$0xff]  ;;  %v64_v2 = vld [vmem:[%s1385_s1 + $0xf0] sm:$0xff] }
  0x17   :  { %234 = vmatpush.msra.mxu1 %v672_v42  ;;  %280 = vmatpush.msra.mxu3 %v641_v43  ;;  %v705_v1 = vld [vmem:[%s1385_s1 + $0x4b8] sm:$0xf]  ;;  %v96_v3 = vld [vmem:[%s1385_s1 + $0x1f0] sm:$0xff]  ;;  %v995_v4 = vld [vmem:[%s1384_s0 + $0x40] sm:$0xff] }
  0x18   :  { %297 = vmatpush.msrb.mxu2 %v685_v40  ;;  %212 = vmatpush.msra.mxu0 %v638_v45  ;;  %v703_v5 = vld [vmem:[%s1385_s1 + $0x4a8] sm:$0xff]  ;;  %v62_v7 = vld [vmem:[%s1385_s1 + $0xe0] sm:$0xff]  ;;  %v701_v9 = vld [vmem:[%s1385_s1 + $0x498] sm:$0xff] }
  0x19   :  { %235 = vmatpush.msra.mxu1 %v670_v46  ;;  %281 = vmatpush.msra.mxu3 %v639_v47  ;;  %v671_v6 = vld [vmem:[%s1385_s1 + $0x3a8] sm:$0xff]  ;;  %v94_v8 = vld [vmem:[%s1385_s1 + $0x1e0] sm:$0xff]  ;;  %v669_v10 = vld [vmem:[%s1385_s1 + $0x398] sm:$0xff] }
  0x1a   :  { %298 = vmatpush.msrb.mxu2 %v683_v44  ;;  %213 = vmatpush.msra.mxu0 %v636_v49  ;;  %v60_v11 = vld [vmem:[%s1385_s1 + $0xd0] sm:$0xff]  ;;  %v699_v13 = vld [vmem:[%s1385_s1 + $0x488] sm:$0xff]  ;;  %v58_v15 = vld [vmem:[%s1385_s1 + $0xc0] sm:$0xff] }
  0x1b   :  { %236 = vmatpush.msra.mxu1 %v668_v50  ;;  %282 = vmatpush.msra.mxu3 %v637_v51  ;;  %v92_v12 = vld [vmem:[%s1385_s1 + $0x1d0] sm:$0xff]  ;;  %v667_v14 = vld [vmem:[%s1385_s1 + $0x388] sm:$0xff]  ;;  %v90_v16 = vld [vmem:[%s1385_s1 + $0x1c0] sm:$0xff] }
  0x1c   :  { %299 = vmatpush.msrb.mxu2 %v681_v48  ;;  %214 = vmatpush.msra.mxu0 %v634_v53  ;;  %v697_v17 = vld [vmem:[%s1385_s1 + $0x478] sm:$0xff]  ;;  %v56_v19 = vld [vmem:[%s1385_s1 + $0xb0] sm:$0xff]  ;;  %v663_v24 = vld [vmem:[%s1385_s1 + $0x368] sm:$0xff] }
  0x1d   :  { %237 = vmatpush.msra.mxu1 %v666_v54  ;;  %283 = vmatpush.msra.mxu3 %v635_v55  ;;  %v665_v18 = vld [vmem:[%s1385_s1 + $0x378] sm:$0xff]  ;;  %v88_v20 = vld [vmem:[%s1385_s1 + $0x1b0] sm:$0xff]  ;;  %v695_v25 = vld [vmem:[%s1385_s1 + $0x468] sm:$0xff] }
  0x1e   :  { %300 = vmatpush.msrb.mxu2 %v679_v52  ;;  %215 = vmatpush.msra.mxu0 %v632_v57  ;;  %v624_v21 = vld [vmem:[%s1384_s0 + $0x30] sm:$0xff]  ;;  %v625_v22 = vld [vmem:[%s1384_s0 + $0x38] sm:$0xff]  ;;  %v54_v26 = vld [vmem:[%s1385_s1 + $0xa0] sm:$0xff] }
  0x1f   :  { %238 = vmatpush.msra.mxu1 %v664_v58  ;;  %284 = vmatpush.msra.mxu3 %v633_v59  ;;  %v1057_v23 = vld [vmem:[%s1384_s0 + $0x58] sm:$0xff]  ;;  %v86_v27 = vld [vmem:[%s1385_s1 + $0x1a0] sm:$0xff]  ;;  %v108_v28 = vld [vmem:[%s1385_s1 + $0x250] sm:$0xf] }
  0x20   :  { %301 = vmatpush.msrb.mxu2 %v677_v56  ;;  %216 = vmatpush.msra.mxu0 %v630_v61  ;;  %v65_v29 = vld [vmem:[%s1385_s1 + $0xf8] sm:$0xff]  ;;  %v52_v30 = vld [vmem:[%s1385_s1 + $0x90] sm:$0xff]  ;;  %v106_v32 = vld [vmem:[%s1385_s1 + $0x240] sm:$0xff] }
  0x21   :  { %239 = vmatpush.msra.mxu1 %v662_v62  ;;  %285 = vmatpush.msra.mxu3 %v631_v63  ;;  %v84_v31 = vld [vmem:[%s1385_s1 + $0x190] sm:$0xff]  ;;  %v63_v33 = vld [vmem:[%s1385_s1 + $0xe8] sm:$0xff]  ;;  %v50_v34 = vld [vmem:[%s1385_s1 + $0x80] sm:$0xff] }
  0x22   :  { %302 = vmatpush.msrb.mxu2 %v675_v60  ;;  %709 = vmatpush.msk.msrb.mxu0 %vm194_vm0, %v705_v1  ;;  %v82_v35 = vld [vmem:[%s1385_s1 + $0x180] sm:$0xff]  ;;  %v104_v36 = vld [vmem:[%s1385_s1 + $0x230] sm:$0xff]  ;;  %v61_v37 = vld [vmem:[%s1385_s1 + $0xd8] sm:$0xff] }
  0x23   :  { %351 = vmatpush.msrb.mxu1 %v64_v2  ;;  %374 = vmatpush.msrb.mxu3 %v96_v3  ;;  %v48_v38 = vld [vmem:[%s1385_s1 + $0x70] sm:$0xff]  ;;  %v627_v40 = vld [vmem:[%s1384_s0 + $0x48] sm:$0xff] }
  0x24   :  { %303 = vmatpush.msrb.mxu2 %v673_v0  ;;  %327 = vmatpush.msrb.mxu0 %v703_v5  ;;  %v80_v39 = vld [vmem:[%s1385_s1 + $0x170] sm:$0xff] }
  0x25   :  { %707 = vmatmul.msk.f32.vlgmr.msra.gmra.mxu2 %vm187_vm1, %v995_v4  ;;  %352 = vmatpush.msrb.mxu1 %v62_v7  ;;  %v628_v41 = vld [vmem:[%s1384_s0 + $0x50] sm:$0xff] }
  0x26   :  { %304 = vmatpush.msrb.mxu2 %v671_v6  ;;  %375 = vmatpush.msrb.mxu3 %v94_v8 }
  0x27   :  { %328 = vmatpush.msrb.mxu0 %v701_v9  ;;  %353 = vmatpush.msrb.mxu1 %v60_v11 }
  0x28   :  { %305 = vmatpush.msrb.mxu2 %v669_v10  ;;  %376 = vmatpush.msrb.mxu3 %v92_v12 }
  0x29   :  { %329 = vmatpush.msrb.mxu0 %v699_v13  ;;  %354 = vmatpush.msrb.mxu1 %v58_v15 }
  0x2a   :  { %306 = vmatpush.msrb.mxu2 %v667_v14  ;;  %377 = vmatpush.msrb.mxu3 %v90_v16 }
  0x2b   :  { %330 = vmatpush.msrb.mxu0 %v697_v17  ;;  %355 = vmatpush.msrb.mxu1 %v56_v19 }
  0x2c   :  { %307 = vmatpush.msrb.mxu2 %v665_v18  ;;  %378 = vmatpush.msrb.mxu3 %v88_v20 }
  0x2d   :  { %217 = vmatmul.f32.vlgmr.msra.gmra.mxu0 %v624_v21  ;;  %240 = vmatmul.f32.vlgmr.msra.gmra.mxu1 %v625_v22 }
  0x2e   :  { %708 = vmatmul.msk.f32.gmra.mxu2 %vm187_vm1, %v1057_v23  ;;  %331 = vmatpush.msrb.mxu0 %v695_v25 }
  0x2f   :  { %308 = vmatpush.msrb.mxu2 %v663_v24  ;;  %356 = vmatpush.msrb.mxu1 %v54_v26 }
  0x30   :  { %379 = vmatpush.msrb.mxu3 %v86_v27  ;;  %420 = vmatpush.msra.mxu0 %v65_v29 }
  0x31   :  { %712 = vmatpush.msk.msra.mxu2 %vm194_vm0, %v108_v28  ;;  %357 = vmatpush.msrb.mxu1 %v52_v30 }
  0x32   :  { %380 = vmatpush.msrb.mxu3 %v84_v31  ;;  %421 = vmatpush.msra.mxu0 %v63_v33 }
  0x33   :  { %408 = vmatpush.msra.mxu2 %v106_v32  ;;  %358 = vmatpush.msrb.mxu1 %v50_v34 }
  0x34   :  { %381 = vmatpush.msrb.mxu3 %v82_v35 }
  0x35   :  { %286 = vmatmul.f32.vlgmr.msra.gmra.mxu3 %v624_v21  ;;  %409 = vmatpush.msra.mxu2 %v104_v36 }
  0x36   :  { %10 = vsyncpa [#allocation3], 0  ;;  %422 = vmatpush.msra.mxu0 %v61_v37  ;;  %359 = vmatpush.msrb.mxu1 %v48_v38  ;;  %v102_v42 = vld [vmem:[%s1385_s1 + $0x220] sm:$0xff]  ;;  %v59_v43 = vld [vmem:[%s1385_s1 + $0xc8] sm:$0xff]  ;;  %vm527_vm2 = vcmask 523264   ;;  %s756_s16 = smov [#allocation2]  }
  0x37   :  { %382 = vmatpush.msrb.mxu3 %v80_v39  ;;  %220 = vmatmul.f32.gmra.mxu0 %v627_v40  ;;  %v46_v44 = vld [vmem:[%s1385_s1 + $0x60] sm:$0xff]  ;;  %v100_v46 = vld [vmem:[%s1385_s1 + $0x210] sm:$0xff]  ;;  %v57_v47 = vld [vmem:[%s1385_s1 + $0xb8] sm:$0xff]  ;;  %s613_s17 = sshll.u32 %s756_s16, 4  ;;  %s615_s20 = sshll.u32 %s1389_s5, 4  ;;  %vm606_vm3 = vcmask 74752   ;;  %s614_s17 = int_to_ptr.vmem [resolvable:$true] %s613_s17  ;;  %s616_s20 = int_to_ptr.hbm [resolvable:$true] %s615_s20 }
  0x38   :  { %v78_v45 = vld [vmem:[%s1385_s1 + $0x160] sm:$0xff]  ;;  %243 = vmatmul.f32.gmra.mxu1 %v628_v41  ;;  %309 = vmatmul.f32.vlgmr.msrb.gmra.mxu2 %v625_v22  ;;  %v44_v48 = vld [vmem:[%s1385_s1 + $0x50] sm:$0xff]  ;;  %v55_v51 = vld [vmem:[%s1385_s1 + $0xa8] sm:$0xff] }
  0x39   :  { %410 = vmatpush.msra.mxu2 %v102_v42  ;;  %423 = vmatpush.msra.mxu0 %v59_v43  ;;  %v76_v49 = vld [vmem:[%s1385_s1 + $0x150] sm:$0xff]  ;;  %v98_v50 = vld [vmem:[%s1385_s1 + $0x200] sm:$0xff]  ;;  %v97_v54 = vld [vmem:[%s1385_s1 + $0x1f8] sm:$0xff] }
  0x3a   :  { %360 = vmatpush.msrb.mxu1 %v46_v44  ;;  %383 = vmatpush.msrb.mxu3 %v78_v45  ;;  %v42_v52 = vld [vmem:[%s1385_s1 + $0x40] sm:$0xff]  ;;  %v53_v55 = vld [vmem:[%s1385_s1 + $0x98] sm:$0xff]  ;;  %v40_v56 = vld [vmem:[%s1385_s1 + $0x30] sm:$0xff] }
  0x3b   :  { %411 = vmatpush.msra.mxu2 %v100_v46  ;;  %424 = vmatpush.msra.mxu0 %v57_v47  ;;  %v74_v53 = vld [vmem:[%s1385_s1 + $0x140] sm:$0xff]  ;;  %v72_v57 = vld [vmem:[%s1385_s1 + $0x130] sm:$0xff]  ;;  %v95_v58 = vld [vmem:[%s1385_s1 + $0x1e8] sm:$0xff] }
  0x3c   :  { %361 = vmatpush.msrb.mxu1 %v44_v48  ;;  %384 = vmatpush.msrb.mxu3 %v76_v49  ;;  %v51_v59 = vld [vmem:[%s1385_s1 + $0x88] sm:$0xff]  ;;  %v38_v60 = vld [vmem:[%s1385_s1 + $0x20] sm:$0xff]  ;;  %v93_v62 = vld [vmem:[%s1385_s1 + $0x1d8] sm:$0xff] }
  0x3d   :  { %412 = vmatpush.msra.mxu2 %v98_v50  ;;  %425 = vmatpush.msra.mxu0 %v55_v51  ;;  %v70_v61 = vld [vmem:[%s1385_s1 + $0x120] sm:$0xff]  ;;  %v49_v63 = vld [vmem:[%s1385_s1 + $0x78] sm:$0xff]  ;;  %v36_v0 = vld [vmem:[%s1385_s1 + $0x10] sm:$0xff] }
  0x3e   :  { %362 = vmatpush.msrb.mxu1 %v42_v52  ;;  %385 = vmatpush.msrb.mxu3 %v74_v53  ;;  %v68_v1 = vld [vmem:[%s1385_s1 + $0x110] sm:$0xff]  ;;  %v91_v2 = vld [vmem:[%s1385_s1 + $0x1c8] sm:$0xff]  ;;  %v34_v5 = vld [vmem:[%s1385_s1] sm:$0xff] }
  0x3f   :  { %443 = vmatpush.msrb.mxu2 %v97_v54  ;;  %289 = vmatmul.f32.gmra.mxu3 %v627_v40  ;;  %v47_v3 = vld [vmem:[%s1385_s1 + $0x68] sm:$0xff]  ;;  %v89_v6 = vld [vmem:[%s1385_s1 + $0x1b8] sm:$0xff]  ;;  %v21_v7 = vld [vmem:[%s1384_s0] sm:$0xff] }
  0x40   :  { %426 = vmatpush.msra.mxu0 %v53_v55  ;;  %363 = vmatpush.msrb.mxu1 %v40_v56  ;;  %v1211_v8 = vld [vmem:[%s1384_s0 + $0x8] sm:$0xff]  ;;  %v45_v9 = vld [vmem:[%s1385_s1 + $0x58] sm:$0xff]  ;;  %v23_v11 = vld [vmem:[%s1384_s0 + $0x10] sm:$0xff] }
  0x41   :  { %386 = vmatpush.msrb.mxu3 %v72_v57  ;;  %444 = vmatpush.msrb.mxu2 %v95_v58  ;;  %v87_v10 = vld [vmem:[%s1385_s1 + $0x1a8] sm:$0xff]  ;;  %v85_v13 = vld [vmem:[%s1385_s1 + $0x198] sm:$0xff]  ;;  %v25_v21 = vld [vmem:[%s1384_s0 + $0x20] sm:$0xff] }
  0x42   :  { %312 = vmatmul.f32.gmra.mxu2 %v628_v41  ;;  %427 = vmatpush.msra.mxu0 %v51_v59  ;;  %v43_v12 = vld [vmem:[%s1385_s1 + $0x48] sm:$0xff]  ;;  %v109_v14 = vld [vmem:[%s1385_s1 + $0x258] sm:$0xf]  ;;  %v517_v37 = vld [vmem:[%s1387_s3 + $0x70] sm:$0xff] }
  0x43   :  { %710 = vmatmul.msk.f32.vlgmr.msrb.gmra.mxu0 %vm187_vm1, %v995_v4  ;;  %364 = vmatpush.msrb.mxu1 %v38_v60  ;;  %v66_v4 = vld [vmem:[%s1385_s1 + $0x100] sm:$0xff]  ;;  %v41_v15 = vld [vmem:[%s1385_s1 + $0x38] sm:$0xff]  ;;  %v83_v16 = vld [vmem:[%s1385_s1 + $0x188] sm:$0xff] }
  0x44   :  { %387 = vmatpush.msrb.mxu3 %v70_v61  ;;  %445 = vmatpush.msrb.mxu2 %v93_v62  ;;  %v107_v17 = vld [vmem:[%s1385_s1 + $0x248] sm:$0xff]  ;;  %v81_v19 = vld [vmem:[%s1385_s1 + $0x178] sm:$0xff]  ;;  %v515_v39 = vld [vmem:[%s1387_s3 + $0x60] sm:$0xff] }
  0x45   :  { %428 = vmatpush.msra.mxu0 %v49_v63  ;;  %365 = vmatpush.msrb.mxu1 %v36_v0  ;;  %v39_v18 = vld [vmem:[%s1385_s1 + $0x28] sm:$0xff]  ;;  %v24_v20 = vld [vmem:[%s1384_s0 + $0x18] sm:$0xff]  ;;  %v513_v41 = vld [vmem:[%s1387_s3 + $0x50] sm:$0xff] }
  0x46   :  { %388 = vmatpush.msrb.mxu3 %v68_v1  ;;  %446 = vmatpush.msrb.mxu2 %v91_v2  ;;  %v37_v22 = vld [vmem:[%s1385_s1 + $0x18] sm:$0xff]  ;;  %v26_v24 = vld [vmem:[%s1384_s0 + $0x28] sm:$0xff]  ;;  %v511_v43 = vld [vmem:[%s1387_s3 + $0x40] sm:$0xff] }
  0x47   :  { %429 = vmatpush.msra.mxu0 %v47_v3  ;;  %366 = vmatpush.msrb.mxu1 %v34_v5  ;;  %v105_v25 = vld [vmem:[%s1385_s1 + $0x238] sm:$0xff]  ;;  %v35_v26 = vld [vmem:[%s1385_s1 + $0x8] sm:$0xff]  ;;  %v509_v45 = vld [vmem:[%s1387_s3 + $0x30] sm:$0xff] }
  0x48   :  { %389 = vmatpush.msrb.mxu3 %v66_v4  ;;  %447 = vmatpush.msrb.mxu2 %v89_v6  ;;  %v77_v27 = vld [vmem:[%s1385_s1 + $0x158] sm:$0xff]  ;;  %v103_v28 = vld [vmem:[%s1385_s1 + $0x228] sm:$0xff]  ;;  %v507_v48 = vld [vmem:[%s1387_s3 + $0x20] sm:$0xff] }
  0x49   :  { %367 = vmatmul.f32.vlgmr.msrb.gmra.mxu1 %v21_v7  ;;  %390 = vmatmul.f32.vlgmr.msrb.gmra.mxu3 %v1211_v8  ;;  %v75_v29 = vld [vmem:[%s1385_s1 + $0x148] sm:$0xff]  ;;  %v101_v30 = vld [vmem:[%s1385_s1 + $0x218] sm:$0xff]  ;;  %v505_v50 = vld [vmem:[%s1387_s3 + $0x10] sm:$0xff] }
  0x4a   :  { %430 = vmatpush.msra.mxu0 %v45_v9  ;;  %448 = vmatpush.msrb.mxu2 %v87_v10  ;;  %v73_v31 = vld [vmem:[%s1385_s1 + $0x138] sm:$0xff]  ;;  %v99_v32 = vld [vmem:[%s1385_s1 + $0x208] sm:$0xff]  ;;  %v503_v55 = vld [vmem:[%s1387_s3] sm:$0xff] }
  0x4b   :  { %713 = vmatmul.msk.f32.vlgmr.msra.gmra.mxu2 %vm187_vm1, %v23_v11  ;;  %711 = vmatmul.msk.f32.gmra.mxu0 %vm187_vm1, %v1057_v23  ;;  %v79_v23 = vld [vmem:[%s1385_s1 + $0x168] sm:$0xff]  ;;  %v69_v34 = vld [vmem:[%s1385_s1 + $0x118] sm:$0xff]  ;;  %v525_v59 = vld [vmem:[%s1387_s3 + $0xb0] sm:$0xff] }
  0x4c   :  { %431 = vmatpush.msra.mxu0 %v43_v12  ;;  %449 = vmatpush.msrb.mxu2 %v85_v13  ;;  %v71_v33 = vld [vmem:[%s1385_s1 + $0x128] sm:$0xff]  ;;  %v518_v36 = vld [vmem:[%s1387_s3 + $0x78] sm:$0xff]  ;;  %v523_v63 = vld [vmem:[%s1387_s3 + $0xa0] sm:$0xff] }
  0x4d   :  { %715 = vmatpush.msk.msra.mxu1 %vm194_vm0, %v109_v14  ;;  %v67_v35 = vld [vmem:[%s1385_s1 + $0x108] sm:$0xff]  ;;  %534 = vmatpush.msra.mxu3 %v518_v36  ;;  %v514_v40 = vld [vmem:[%s1387_s3 + $0x58] sm:$0xff]  ;;  %v521_v4 = vld [vmem:[%s1387_s3 + $0x90] sm:$0xff] }
  0x4e   :  { %432 = vmatpush.msra.mxu0 %v41_v15  ;;  %450 = vmatpush.msrb.mxu2 %v83_v16  ;;  %v516_v38 = vld [vmem:[%s1387_s3 + $0x68] sm:$0xff]  ;;  %v510_v44 = vld [vmem:[%s1387_s3 + $0x38] sm:$0xff]  ;;  %v519_v9 = vld [vmem:[%s1387_s3 + $0x80] sm:$0xff] }
  0x4f   :  { %477 = vmatpush.msra.mxu1 %v107_v17  ;;  %535 = vmatpush.msra.mxu3 %v517_v37  ;;  %v512_v42 = vld [vmem:[%s1387_s3 + $0x48] sm:$0xff]  ;;  %v506_v49 = vld [vmem:[%s1387_s3 + $0x18] sm:$0xff]  ;;  %v489_v10 = vld [vmem:[%s1386_s2] sm:$0x3] }
  0x50   :  { %433 = vmatpush.msra.mxu0 %v39_v18  ;;  %451 = vmatpush.msrb.mxu2 %v81_v19  ;;  %v508_v47 = vld [vmem:[%s1387_s3 + $0x28] sm:$0xff]  ;;  %v526_v58 = vld [vmem:[%s1387_s3 + $0xb8] sm:$0xff]  ;;  %v491_v15 = vperm.slane %v489_v10, 0 }
  0x51   :  { %370 = vmatmul.f32.gmra.mxu1 %v24_v20  ;;  %393 = vmatmul.f32.gmra.mxu3 %v25_v21  ;;  %v504_v52 = vld [vmem:[%s1387_s3 + $0x8] sm:$0xff]  ;;  %v522_v1 = vld [vmem:[%s1387_s3 + $0x98] sm:$0xff] }
  0x52   :  { %434 = vmatpush.msra.mxu0 %v37_v22  ;;  %452 = vmatpush.msrb.mxu2 %v79_v23  ;;  %v524_v60 = vld [vmem:[%s1387_s3 + $0xa8] sm:$0xff] }
  0x53   :  { %714 = vmatmul.msk.f32.gmra.mxu2 %vm187_vm1, %v26_v24  ;;  %478 = vmatpush.msra.mxu1 %v105_v25 }
  0x54   :  { %435 = vmatpush.msra.mxu0 %v35_v26  ;;  %453 = vmatpush.msrb.mxu2 %v77_v27 }
  0x55   :  { %436 = vmatmul.f32.vlgmr.msra.gmra.mxu0 %v21_v7  ;;  %479 = vmatpush.msra.mxu1 %v103_v28  ;;  %v520_v7 = vld [vmem:[%s1387_s3 + $0x88] sm:$0xff] }
  0x56   :  { %454 = vmatpush.msrb.mxu2 %v75_v29  ;;  %536 = vmatpush.msra.mxu3 %v516_v38  ;;  %v492_v38 = vperm.slane %v489_v10, 1 }
  0x57   :  { %480 = vmatpush.msra.mxu1 %v101_v30  ;;  %565 = vmatpush.msrb.mxu0 %v526_v58 }
  0x58   :  { %455 = vmatpush.msrb.mxu2 %v73_v31  ;;  %537 = vmatpush.msra.mxu3 %v515_v39 }
  0x59   :  { %481 = vmatpush.msra.mxu1 %v99_v32  ;;  %566 = vmatpush.msrb.mxu0 %v525_v59 }
  0x5a   :  { %456 = vmatpush.msrb.mxu2 %v71_v33  ;;  %716 = vmatmul.msk.f32.vlgmr.msra.gmra.mxu1 %vm187_vm1, %v23_v11 }
  0x5b   :  { %538 = vmatpush.msra.mxu3 %v514_v40  ;;  %720 = vmatpush.msrb.mxu1 %v526_v58 }
  0x5c   :  { %457 = vmatpush.msrb.mxu2 %v69_v34  ;;  %567 = vmatpush.msrb.mxu0 %v524_v60 }
  0x5d   :  { %439 = vmatmul.f32.gmra.mxu0 %v24_v20  ;;  %539 = vmatpush.msra.mxu3 %v513_v41 }
  0x5e   :  { %458 = vmatpush.msrb.mxu2 %v67_v35  ;;  %721 = vmatpush.msrb.mxu1 %v525_v59 }
  0x5f   :  { %459 = vmatmul.f32.vlgmr.msrb.gmra.mxu2 %v1211_v8  ;;  %540 = vmatpush.msra.mxu3 %v512_v42 }
  0x60   :  { %722 = vmatpush.msrb.mxu1 %v524_v60  ;;  %568 = vmatpush.msrb.mxu0 %v523_v63 }
  0x61   :  { %541 = vmatpush.msra.mxu3 %v511_v43 }
  0x62   :  { %717 = vmatmul.msk.f32.gmra.mxu1 %vm187_vm1, %v26_v24  ;;  %569 = vmatpush.msrb.mxu0 %v522_v1 }
  0x63   :  { %542 = vmatpush.msra.mxu3 %v510_v44  ;;  %723 = vmatpush.msrb.mxu1 %v523_v63 }
  0x64   :  { %570 = vmatpush.msrb.mxu0 %v521_v4 }
  0x65   :  { %543 = vmatpush.msra.mxu3 %v509_v45  ;;  %724 = vmatpush.msrb.mxu1 %v522_v1 }
  0x66   :  { %571 = vmatpush.msrb.mxu0 %v520_v7 }
  0x67   :  { %462 = vmatmul.f32.gmra.mxu2 %v25_v21  ;;  %544 = vmatpush.msra.mxu3 %v508_v47 }
  0x68   :  { %725 = vmatpush.msrb.mxu1 %v521_v4  ;;  %572 = vmatpush.msrb.mxu0 %v519_v9  ;;  %v729_v4 = vld [vmem:[%s1388_s4] ss:$0 sm:$0xff] }
  0x69   :  { %545 = vmatpush.msra.mxu3 %v507_v48 }
  0x6a   :  { %726 = vmatpush.msrb.mxu1 %v520_v7 }
  0x6b   :  { %546 = vmatpush.msra.mxu3 %v506_v49 }
  0x6c   :  { %727 = vmatpush.msrb.mxu1 %v519_v9 }
  0x6d   :  { %547 = vmatpush.msra.mxu3 %v505_v50 }
  0x6f   :  { %548 = vmatpush.msra.mxu3 %v504_v52 }
  0x71   :  { %549 = vmatpush.msra.mxu3 %v503_v55 }
  0xa8   :  { %v264_v46 = vpop.f32.mrf.mxu2 }
  0xaa   :  { %v218_v53 = vpop.f32.mrf.mxu0  ;;  %v241_v54 = vpop.f32.mrf.mxu1 }
  0xab   :  { %v242_v2 = vadd.f32 %v241_v54, %v218_v53 }
  0xad   :  { %v265_v8 = vadd.f32 %v264_v46, %v242_v2 }
  0xb1   :  { %v267_v51 = vpop.f32.mrf.mxu2 }
  0xb4   :  { %v221_v61 = vpop.f32.mrf.mxu0 }
  0xb5   :  { %v244_v62 = vpop.f32.mrf.mxu1 }
  0xb6   :  { %v245_v13 = vadd.f32 %v244_v62, %v221_v61 }
  0xb8   :  { %v287_v56 = vpop.f32.mrf.mxu3  ;;  %v268_v19 = vadd.f32 %v267_v51, %v245_v13 }
  0xbb   :  { %v310_v57 = vpop.f32.mrf.mxu2 }
  0xbc   :  { %v311_v29 = vadd.f32 %v310_v57, %v287_v56 }
  0xc0   :  { %v333_v6 = vpop.f32.mrf.mxu0 }
  0xc1   :  { %v334_v32 = vadd.f32 %v333_v6, %v311_v29 }
  0xc2   :  { %v290_v0 = vpop.f32.mrf.mxu3 }
  0xc5   :  { %v313_v3 = vpop.f32.mrf.mxu2 }
  0xc6   :  { %v368_v5 = vpop.f32.mrf.mxu1  ;;  %v314_v36 = vadd.f32 %v313_v3, %v290_v0 }
  0xc7   :  { %v369_v11 = vadd.f32 %v368_v5, %v265_v8 }
  0xc8   :  { %v336_v21 = vpop.f32.mrf.mxu0 }
  0xc9   :  { %v337_v41 = vadd.f32 %v336_v21, %v314_v36 }
  0xcc   :  { %v391_v12 = vpop.f32.mrf.mxu3 }
  0xcd   :  { %v392_v14 = vadd.f32 %v391_v12, %v369_v11 }
  0xce   :  { %v414_v16 = vpop.f32.mrf.mxu2  ;;  %v371_v18 = vpop.f32.mrf.mxu1 }
  0xcf   :  { %v415_v17 = vadd.f32 %v414_v16, %v392_v14  ;;  %v372_v22 = vadd.f32 %v371_v18, %v268_v19 }
  0xd1   :  { %v495_v20 = vadd.f32 %v491_v15, %v415_v17 }
  0xd2   :  { %v437_v31 = vpop.f32.mrf.mxu0 }
  0xd3   :  { %v499_v23 = vmax.f32 %v495_v20, 0.0  ;;  %v438_v34 = vadd.f32 %v437_v31, %v334_v32 }
  0xd4   :  { %v394_v24 = vpop.f32.mrf.mxu3 }
  0xd5   :  { %v395_v25 = vadd.f32 %v394_v24, %v372_v22  ;;  %550 = vmatmul.f32.vlgmr.msra.gmra.mxu3 %v499_v23 }
  0xd6   :  { %v417_v26 = vpop.f32.mrf.mxu2 }
  0xd7   :  { %v418_v27 = vadd.f32 %v417_v26, %v395_v25  ;;  %v483_v33 = vpop.f32.mrf.mxu1 }
  0xd9   :  { %v497_v28 = vadd.f32 %v491_v15, %v418_v27 }
  0xda   :  { %v440_v40 = vpop.f32.mrf.mxu0 }
  0xdb   :  { %v501_v30 = vmax.f32 %v497_v28, 0.0  ;;  %v441_v43 = vadd.f32 %v440_v40, %v337_v41 }
  0xdd   :  { %553 = vmatmul.f32.gmra.mxu3 %v501_v30 }
  0xdf   :  { %v486_v46 = vpop.f32.mrf.mxu1 }
  0xe2   :  { %v460_v35 = vpop.f32.mrf.mxu2 }
  0xe3   :  { %v461_v37 = vadd.f32 %v460_v35, %v438_v34 }
  0xe5   :  { %v484_v39 = vadd.f32 %v483_v33, %v461_v37 }
  0xe7   :  { %v496_v42 = vadd.f32 %v492_v38, %v484_v39 }
  0xe9   :  { %v500_v44 = vmax.f32 %v496_v42, 0.0 }
  0xea   :  { %v463_v45 = vpop.f32.mrf.mxu2 }
  0xeb   :  { %v464_v47 = vadd.f32 %v463_v45, %v441_v43  ;;  %718 = vmatmul.msk.f32.vlgmr.msrb.gmra.mxu0 %vm527_vm2, %v500_v44 }
  0xed   :  { %v487_v48 = vadd.f32 %v486_v46, %v464_v47 }
  0xef   :  { %v498_v49 = vadd.f32 %v492_v38, %v487_v48 }
  0xf1   :  { %v502_v50 = vmax.f32 %v498_v49, 0.0 }
  0xf3   :  { %719 = vmatmul.msk.f32.vlgmr.msrb.gmra.mxu1 %vm527_vm2, %v502_v50 }
 0x158   :  { %v551_v51 = vpop.f32.mrf.mxu3 }
 0x160   :  { %v554_v59 = vpop.f32.mrf.mxu3 }
 0x168   :  { %v574_v52 = vpop.f32.mrf.mxu0 }
 0x169   :  { %v575_v53 = vadd.f32 %v574_v52, %v551_v51 }
 0x16b   :  { %v581_v54 = vrot.slane %v575_v53, 2  ;;  %v584_v56 = vrot.slane %v575_v53, 4  ;;  %v587_v58 = vrot.slane %v575_v53, 6 }
 0x16d   :  { %v583_v55 = vmax.f32 %v575_v53, %v581_v54 }
 0x16f   :  { %v586_v57 = vmax.f32 %v583_v55, %v584_v56 }
 0x170   :  { %v577_v60 = vpop.f32.mrf.mxu1 }
 0x171   :  { %v578_v61 = vadd.f32 %v577_v60, %v554_v59  ;;  %v589_v62 = vmax.f32 %v586_v57, %v587_v58 }
 0x173   :  { %v590_v63 = vmax.f32 %v589_v62, %v578_v61  ;;  %v592_v0 = vrot.slane %v578_v61, 2  ;;  %v595_v2 = vrot.slane %v578_v61, 4  ;;  %v598_v3 = vrot.slane %v578_v61, 6 }
 0x175   :  { %v594_v1 = vmax.f32 %v590_v63, %v592_v0 }
 0x177   :  { %v597_v5 = vmax.f32 %v594_v1, %v595_v2 }
 0x179   :  { %v600_v6 = vmax.f32 %v597_v5, %v598_v3 }
 0x17b   :  { %v605_v7 = vadd.f32 %v729_v4, %v600_v6 }
 0x17d   :  { %607 = vst.msk [vmem:[#allocation2] sm:$0x3] %vm606_vm3, %v605_v7 }
 0x17e   :  { %618 = dma.vmem_to_hbm [thread:$0]  %s614_s17, 32, %s616_s20, [#allocation3]  }
 0x17f   :  { %754 = dma.done.wait [#allocation3], 32  }
 0x180   :  { %755 = vsyncadd [#allocation3], 4294967264 }
 0x181   :  { %623 = vsyncpa [#allocation3], 1 }

</bundles_post_ra>
